<compile_context>
chip_gen: v6e
topology: v6e:2x2x1
jax: 0.10.0
libtpu: 0.0.40
codegen_flags: <defaults>
</compile_context>

<pallas_src>
import functools
import math

import jax
import jax.numpy as jnp
from jax.experimental import pallas as pl
from jax.experimental.pallas import tpu as pltpu


# ----------------------------------------------------------------------------
# Pallas kernel: PartialConv2d (+bias) + ReLU for `nb` batch elements.
# ----------------------------------------------------------------------------
def _pconv_relu_kernel(x_ref, m_ref, w_ref, b_ref, y_ref, mo_ref, slab_ref,
                       *, nb, c_in, c_m, kh, kw, wp, p_out):
    taps = [di * wp + dj for di in range(kh) for dj in range(kw)]
    winsize = float(c_in * kh * kw)
    chan_scale = float(c_in) / float(c_m)        # 1 (multi-chan mask) or c_in

    acc_scales = []        # per-batch (1, p_out): mask_ratio * upd  (data term)
    upds = []              # per-batch (1, p_out): clamp(msum, 0, 1)

    for b in range(nb):
        x_b = x_ref[b].astype(jnp.float32)       # (c_in, pp)
        m_b = m_ref[b].astype(jnp.float32)       # (c_m,  pp), c_m in {c_in, 1}
        xm_b = x_b * m_b                         # sublane-broadcast if c_m == 1

        # Data path: scatter the kh*kw shifted windows into the K-row slab so
        # the whole conv becomes ONE MXU contraction with K = kh*kw*c_in.
        for t, s in enumerate(taps):
            slab_ref[t * c_in:(t + 1) * c_in,
                     b * p_out:(b + 1) * p_out] = xm_b[:, s:s + p_out]

        # Mask path: one channel-reduced (1, pp) row + kh*kw shifted row adds.
        mrow = jnp.sum(m_b, axis=0, keepdims=True) if c_m > 1 else m_b
        msum = mrow[:, taps[0]:taps[0] + p_out]
        for s in taps[1:]:
            msum = msum + mrow[:, s:s + p_out]
        if chan_scale != 1.0:
            msum = msum * chan_scale             # single-channel carried mask

        ratio = winsize * pl.reciprocal(msum + 1e-8, approx=True)   # EUP slot
        upd = jnp.clip(msum, 0.0, 1.0)
        r = ratio * upd                          # NVIDIA mask_ratio
        acc_scales.append(r * upd)
        upds.append(upd)

    # One matmul for all taps / input channels / folded batch elements.
    acc = jnp.dot(w_ref[...], slab_ref[...],
                  preferred_element_type=jnp.float32)   # (c_out, nb*p_out)

    bias = b_ref[...]                            # (c_out, 1)
    for b in range(nb):
        cols = slice(b * p_out, (b + 1) * p_out)
        # out = (conv_nobias * mask_ratio + bias) * update_mask, fused ReLU.
        out_b = acc[:, cols] * acc_scales[b] + bias * upds[b]
        y_ref[0, :, cols] = jnp.maximum(out_b, 0.0).astype(y_ref.dtype)
        mo_ref[0, :, cols] = upds[b]


def partial_conv2d_relu(x, mask, weight, bias, padding):
    """x: (N, C_in, H, W).  mask: (N, C_in, H, W) or channel-uniform (N, 1, H, W).
    weight: (C_out, C_in, kh, kw).  padding: ((top, bottom), (left, right)).
    Returns (y bf16 (N, C_out, H_out, W_out), update_mask f32 (N, 1, H_out, W_out))."""
    n, c_in, h, w = x.shape
    c_m = mask.shape[1]
    c_out, _, kh, kw = weight.shape
    (pt, pb), (plf, prt) = padding

    hp, wp = h + pt + pb, w + plf + prt
    h_out, w_out = hp - kh + 1, wp - kw + 1
    p_out = h_out * wp                 # flat output length (incl. kw-1 garbage
                                       # columns per row, sliced away below)
    pp = (hp + 1) * wp                 # +1 dummy bottom row keeps tap slices
                                       # of length p_out in bounds
    kdim = kh * kw * c_in

    # Fold the whole batch into one lane-dense grid step for the small layers.
    nb = n if (n > 1 and p_out < 128 and n * p_out <= 2048) else 1
    g = n // nb

    # bf16 activation DMA; mask bf16 only when multi-channel (layer 1, binary
    # -> lossless), carried single-channel (possibly fractional) mask stays f32.
    m_dtype = jnp.bfloat16 if c_m > 1 else jnp.float32
    xp = jnp.pad(x.astype(jnp.bfloat16),
                 ((0, 0), (0, 0), (pt, pb + 1), (plf, prt))).reshape(n, c_in, pp)
    mp = jnp.pad(mask.astype(m_dtype),
                 ((0, 0), (0, 0), (pt, pb + 1), (plf, prt))).reshape(n, c_m, pp)

    # Weight slab: w_flat[co, t*c_in + ci] = weight[co, ci, di, dj], t = di*kw+dj.
    w_flat = jnp.transpose(weight.astype(jnp.float32),
                           (0, 2, 3, 1)).reshape(c_out, kdim)
    b2 = bias.astype(jnp.float32).reshape(c_out, 1)

    kernel = functools.partial(_pconv_relu_kernel, nb=nb, c_in=c_in, c_m=c_m,
                               kh=kh, kw=kw, wp=wp, p_out=p_out)

    y_flat, mo_flat = pl.pallas_call(
        kernel,
        out_shape=(jax.ShapeDtypeStruct((g, c_out, nb * p_out), jnp.bfloat16),
                   jax.ShapeDtypeStruct((g, 1, nb * p_out), jnp.float32)),
        grid=(g,),
        in_specs=[
            pl.BlockSpec((nb, c_in, pp), lambda i: (i, 0, 0)),
            pl.BlockSpec((nb, c_m, pp), lambda i: (i, 0, 0)),
            pl.BlockSpec((c_out, kdim), lambda i: (0, 0)),
            pl.BlockSpec((c_out, 1), lambda i: (0, 0)),
        ],
        out_specs=(
            pl.BlockSpec((1, c_out, nb * p_out), lambda i: (i, 0, 0)),
            pl.BlockSpec((1, 1, nb * p_out), lambda i: (i, 0, 0)),
        ),
        scratch_shapes=[pltpu.VMEM((kdim, nb * p_out), jnp.float32)],
        compiler_params=pltpu.CompilerParams(
            dimension_semantics=("parallel",)),
    )(xp, mp, w_flat, b2)

    # Un-fold the batch (free reshape/transpose) and drop the kw-1 wrap-around
    # garbage columns per row.
    y = (y_flat.reshape(g, c_out, nb, h_out, wp)
               .transpose(0, 2, 1, 3, 4)
               .reshape(n, c_out, h_out, wp)[:, :, :, :w_out])
    upd = (mo_flat.reshape(g, 1, nb, h_out, wp)
                  .transpose(0, 2, 1, 3, 4)
                  .reshape(n, 1, h_out, wp)[:, :, :, :w_out])
    return y, upd


# ----------------------------------------------------------------------------
# Glue ops (tiny, plain JAX): MaxPool2d(ceil_mode=True), bilinear Upsample
# (align_corners=False, torch half-pixel convention).
# ----------------------------------------------------------------------------
def maxpool_ceil(x, p):
    n, c, h, w = x.shape
    ho, wo = -(-h // p), -(-w // p)
    xp = jnp.pad(x, ((0, 0), (0, 0), (0, ho * p - h), (0, wo * p - w)),
                 constant_values=-jnp.inf)
    return xp.reshape(n, c, ho, p, wo, p).max(axis=(3, 5))


def _bilinear_matrix(in_size, out_size):
    if in_size == out_size:
        return jnp.eye(in_size, dtype=jnp.float32)
    scale = in_size / out_size
    dst = jnp.arange(out_size, dtype=jnp.float32)
    src = jnp.maximum((dst + 0.5) * scale - 0.5, 0.0)
    i0 = jnp.minimum(jnp.floor(src).astype(jnp.int32), in_size - 1)
    lam = src - i0.astype(jnp.float32)
    i1 = jnp.minimum(i0 + 1, in_size - 1)
    return ((1.0 - lam)[:, None] * jax.nn.one_hot(i0, in_size, dtype=jnp.float32)
            + lam[:, None] * jax.nn.one_hot(i1, in_size, dtype=jnp.float32))


def upsample_bilinear(x, out_hw):
    _, _, h, w = x.shape
    mh = _bilinear_matrix(h, out_hw[0])
    mw = _bilinear_matrix(w, out_hw[1])
    return jnp.einsum('oh,nchw,pw->ncop', mh, x, mw)


# ----------------------------------------------------------------------------
# Model: sizes, parameters, forward.
# ----------------------------------------------------------------------------
def calculate_sizes(nrows, ncols, pooling_sizes, n_layers):
    w, h = [nrows], [ncols]
    for i in range(1, n_layers):
        w.append(math.ceil(w[i - 1] / pooling_sizes[i - 1]))
        h.append(math.ceil(h[i - 1] / pooling_sizes[i - 1]))
    return w, h


def init_params(key, n_channels, middle_channels, kernel_sizes, output_size):
    mc, ks = middle_channels, kernel_sizes
    enc_defs = [(n_channels, mc[0], ks[0]), (mc[0], mc[1], ks[1]),
                (mc[1], mc[2], ks[2]), (mc[2], mc[3], ks[3]),
                (mc[3], mc[4], ks[4])]
    dec_defs = [(mc[4], mc[3], ks[4]), (mc[3], mc[2], ks[3]),
                (mc[2], mc[1], ks[2]), (mc[1], mc[0], ks[1]),
                (mc[0], output_size, ks[0])]
    params = {'enc': [], 'dec': []}
    for name, defs in (('enc', enc_defs), ('dec', dec_defs)):
        for (cin, cout, k) in defs:
            key, k_w, k_b = jax.random.split(key, 3)
            bound = 1.0 / math.sqrt(cin * k * k)
            w_ = jax.random.uniform(k_w, (cout, cin, k, k), jnp.float32, -bound, bound)
            b_ = jax.random.uniform(k_b, (cout,), jnp.float32, -bound, bound)
            params[name].append((w_, b_))
    return params


def _same_pad(k):
    total = k - 1
    left = total // 2
    return ((left, total - left), (left, total - left))


def _sym_pad(p):
    return ((p, p), (p, p))


def dincae_pconvs_forward(params, x, mask, *, kernel_sizes, pooling_sizes,
                          w_sizes, h_sizes, image_nrows, image_ncols):
    # ------------------ encoder ------------------
    # The update mask is channel-uniform from layer 1 onward, so it is carried
    # as a single channel; only the first pconv sees the multi-channel mask.
    xs, ms = [], []
    cur_x, cur_m = x, mask
    for i in range(5):
        w_, b_ = params['enc'][i]
        pad = _sym_pad(kernel_sizes[0] // 2) if i == 0 else _same_pad(kernel_sizes[i])
        y, mo = partial_conv2d_relu(cur_x, cur_m, w_, b_, pad)
        y = maxpool_ceil(y, pooling_sizes[i])
        mo = maxpool_ceil(mo, pooling_sizes[i])
        xs.append(y)
        ms.append(mo)
        cur_x, cur_m = y, mo

    # ------------------ decoder ------------------
    tgt_sizes = [(w_sizes[4], h_sizes[4]), (w_sizes[3], h_sizes[3]),
                 (w_sizes[2], h_sizes[2]), (w_sizes[1], h_sizes[1]),
                 (image_nrows, image_ncols)]
    dec_ks = [kernel_sizes[4], kernel_sizes[3], kernel_sizes[2],
              kernel_sizes[1], kernel_sizes[0]]
    skips = [3, 2, 1, 0, None]          # add x4, x3, x2, x1; final layer: none

    cur_x, cur_m = xs[4], ms[4]
    for i in range(5):
        ux = upsample_bilinear(cur_x, tgt_sizes[i])
        um = upsample_bilinear(cur_m, tgt_sizes[i])
        w_, b_ = params['dec'][i]
        d, dm = partial_conv2d_relu(ux, um, w_, b_, _same_pad(dec_ks[i]))
        if skips[i] is not None:
            cur_x = d + xs[skips[i]]
            cur_m = dm + ms[skips[i]]
        else:
            cur_x, cur_m = d, dm

    out = cur_x.astype(jnp.float32)
    n, c_out, ho, wo = out.shape
    out_mask = jnp.broadcast_to(cur_m.astype(jnp.float32), (n, c_out, ho, wo))
    return out, out_mask


# ----------------------------------------------------------------------------
if __name__ == "__main__":
    # Small but faithful configuration (all legal constructor args of the
    # PyTorch module).  Kernel size 3 keeps 'same' padding symmetric.
    batch = 2
    n_channels = 4
    image_nrows = image_ncols = 16
    middle_channels = [8, 8, 8, 8, 8]
    kernel_sizes = [3, 3, 3, 3, 3]
    pooling_sizes = [2, 2, 2, 2, 2]

    w_sizes, h_sizes = calculate_sizes(image_nrows, image_ncols,
                                       pooling_sizes, len(middle_channels))

    key = jax.random.PRNGKey(0)
    kx, km, kp = jax.random.split(key, 3)
    x = jax.random.normal(kx, (batch, n_channels, image_nrows, image_ncols),
                          dtype=jnp.float32)
    mask = (jax.random.uniform(km, (batch, n_channels, image_nrows, image_ncols))
            > 0.3).astype(jnp.float32)

    params = init_params(kp, n_channels, middle_channels, kernel_sizes,
                         n_channels)

    fwd = jax.jit(functools.partial(
        dincae_pconvs_forward,
        kernel_sizes=kernel_sizes, pooling_sizes=pooling_sizes,
        w_sizes=w_sizes, h_sizes=h_sizes,
        image_nrows=image_nrows, image_ncols=image_ncols))

    out, out_mask = fwd(params, x, mask)
    jax.block_until_ready((out, out_mask))

    assert out.shape == (batch, n_channels, image_nrows, image_ncols)
    assert out_mask.shape == (batch, n_channels, image_nrows, image_ncols)
    assert bool(jnp.all(jnp.isfinite(out)))
    assert bool(jnp.all(jnp.isfinite(out_mask)))
    print("KERNEL_OK")
</pallas_src>

<mosaic_0001>
module attributes {stable_mosaic.version = 11 : i64} {
  func.func @_pconv_relu_kernel(%arg0: i32, %arg1: memref<1x4x342xbf16, #tpu.memory_space<vmem>>, %arg2: memref<1x4x342xbf16, #tpu.memory_space<vmem>>, %arg3: memref<8x36xf32, #tpu.memory_space<vmem>>, %arg4: memref<8x1xf32, #tpu.memory_space<vmem>>, %arg5: memref<1x8x288xbf16, #tpu.memory_space<vmem>>, %arg6: memref<1x1x288xf32, #tpu.memory_space<vmem>>, %arg7: memref<36x288xf32, #tpu.memory_space<vmem>>) attributes {dimension_semantics = [#tpu.dimension_semantics<parallel>], iteration_bounds = array<i64: 2>, scalar_prefetch = 0 : i64, scratch_operands = 1 : i64, tpu.core_type = #tpu.core_type<tc>, window_params = [{transform_indices = @transform_0, window_bounds = array<i64: 1, 4, 342>}, {transform_indices = @transform_1, window_bounds = array<i64: 1, 4, 342>}, {pipeline_mode = #tpu.pipeline_mode<synchronous>, transform_indices = @transform_2, window_bounds = array<i64: 8, 36>}, {pipeline_mode = #tpu.pipeline_mode<synchronous>, transform_indices = @transform_3, window_bounds = array<i64: 8, 1>}, {transform_indices = @transform_4, window_bounds = array<i64: 1, 8, 288>}, {transform_indices = @transform_5, window_bounds = array<i64: 1, 1, 288>}]} {
    %c0 = arith.constant 0 : index
    %c0_0 = arith.constant 0 : index
    %c0_1 = arith.constant 0 : index
    %0 = vector.load %arg1[%c0, %c0_0, %c0_1] : memref<1x4x342xbf16, #tpu.memory_space<vmem>>, vector<1x4x342xbf16>
    %1 = vector.shape_cast %0 : vector<1x4x342xbf16> to vector<4x342xbf16>
    %2 = arith.extf %1 : vector<4x342xbf16> to vector<4x342xf32>
    %c0_2 = arith.constant 0 : index
    %c0_3 = arith.constant 0 : index
    %c0_4 = arith.constant 0 : index
    %3 = vector.load %arg2[%c0_2, %c0_3, %c0_4] : memref<1x4x342xbf16, #tpu.memory_space<vmem>>, vector<1x4x342xbf16>
    %4 = vector.shape_cast %3 : vector<1x4x342xbf16> to vector<4x342xbf16>
    %5 = arith.extf %4 : vector<4x342xbf16> to vector<4x342xf32>
    %6 = arith.mulf %2, %5 : vector<4x342xf32>
    %7 = vector.extract_strided_slice %6 {offsets = [0, 0], sizes = [4, 288], strides = [1, 1]} : vector<4x342xf32> to vector<4x288xf32>
    %c0_5 = arith.constant 0 : index
    %c0_6 = arith.constant 0 : index
    %8 = vector.load %arg7[%c0_5, %c0_6] : memref<36x288xf32, #tpu.memory_space<vmem>>, vector<4x288xf32>
    tpu.vector_store %arg7[%c0_5, %c0_6], %7 {strides = array<i32>} : memref<36x288xf32, #tpu.memory_space<vmem>>, vector<4x288xf32>,
    %9 = vector.extract_strided_slice %6 {offsets = [0, 1], sizes = [4, 288], strides = [1, 1]} : vector<4x342xf32> to vector<4x288xf32>
    %c4 = arith.constant 4 : index
    %c0_7 = arith.constant 0 : index
    %10 = vector.load %arg7[%c4, %c0_7] : memref<36x288xf32, #tpu.memory_space<vmem>>, vector<4x288xf32>
    tpu.vector_store %arg7[%c4, %c0_7], %9 {strides = array<i32>} : memref<36x288xf32, #tpu.memory_space<vmem>>, vector<4x288xf32>,
    %11 = vector.extract_strided_slice %6 {offsets = [0, 2], sizes = [4, 288], strides = [1, 1]} : vector<4x342xf32> to vector<4x288xf32>
    %c8 = arith.constant 8 : index
    %c0_8 = arith.constant 0 : index
    %12 = vector.load %arg7[%c8, %c0_8] : memref<36x288xf32, #tpu.memory_space<vmem>>, vector<4x288xf32>
    tpu.vector_store %arg7[%c8, %c0_8], %11 {strides = array<i32>} : memref<36x288xf32, #tpu.memory_space<vmem>>, vector<4x288xf32>,
    %13 = vector.extract_strided_slice %6 {offsets = [0, 18], sizes = [4, 288], strides = [1, 1]} : vector<4x342xf32> to vector<4x288xf32>
    %c12 = arith.constant 12 : index
    %c0_9 = arith.constant 0 : index
    %14 = vector.load %arg7[%c12, %c0_9] : memref<36x288xf32, #tpu.memory_space<vmem>>, vector<4x288xf32>
    tpu.vector_store %arg7[%c12, %c0_9], %13 {strides = array<i32>} : memref<36x288xf32, #tpu.memory_space<vmem>>, vector<4x288xf32>,
    %15 = vector.extract_strided_slice %6 {offsets = [0, 19], sizes = [4, 288], strides = [1, 1]} : vector<4x342xf32> to vector<4x288xf32>
    %c16 = arith.constant 16 : index
    %c0_10 = arith.constant 0 : index
    %16 = vector.load %arg7[%c16, %c0_10] : memref<36x288xf32, #tpu.memory_space<vmem>>, vector<4x288xf32>
    tpu.vector_store %arg7[%c16, %c0_10], %15 {strides = array<i32>} : memref<36x288xf32, #tpu.memory_space<vmem>>, vector<4x288xf32>,
    %17 = vector.extract_strided_slice %6 {offsets = [0, 20], sizes = [4, 288], strides = [1, 1]} : vector<4x342xf32> to vector<4x288xf32>
    %c20 = arith.constant 20 : index
    %c0_11 = arith.constant 0 : index
    %18 = vector.load %arg7[%c20, %c0_11] : memref<36x288xf32, #tpu.memory_space<vmem>>, vector<4x288xf32>
    tpu.vector_store %arg7[%c20, %c0_11], %17 {strides = array<i32>} : memref<36x288xf32, #tpu.memory_space<vmem>>, vector<4x288xf32>,
    %19 = vector.extract_strided_slice %6 {offsets = [0, 36], sizes = [4, 288], strides = [1, 1]} : vector<4x342xf32> to vector<4x288xf32>
    %c24 = arith.constant 24 : index
    %c0_12 = arith.constant 0 : index
    %20 = vector.load %arg7[%c24, %c0_12] : memref<36x288xf32, #tpu.memory_space<vmem>>, vector<4x288xf32>
    tpu.vector_store %arg7[%c24, %c0_12], %19 {strides = array<i32>} : memref<36x288xf32, #tpu.memory_space<vmem>>, vector<4x288xf32>,
    %21 = vector.extract_strided_slice %6 {offsets = [0, 37], sizes = [4, 288], strides = [1, 1]} : vector<4x342xf32> to vector<4x288xf32>
    %c28 = arith.constant 28 : index
    %c0_13 = arith.constant 0 : index
    %22 = vector.load %arg7[%c28, %c0_13] : memref<36x288xf32, #tpu.memory_space<vmem>>, vector<4x288xf32>
    tpu.vector_store %arg7[%c28, %c0_13], %21 {strides = array<i32>} : memref<36x288xf32, #tpu.memory_space<vmem>>, vector<4x288xf32>,
    %23 = vector.extract_strided_slice %6 {offsets = [0, 38], sizes = [4, 288], strides = [1, 1]} : vector<4x342xf32> to vector<4x288xf32>
    %c32 = arith.constant 32 : index
    %c0_14 = arith.constant 0 : index
    %24 = vector.load %arg7[%c32, %c0_14] : memref<36x288xf32, #tpu.memory_space<vmem>>, vector<4x288xf32>
    tpu.vector_store %arg7[%c32, %c0_14], %23 {strides = array<i32>} : memref<36x288xf32, #tpu.memory_space<vmem>>, vector<4x288xf32>,
    %cst = arith.constant dense<0.000000e+00> : vector<342xf32>
    %25 = vector.multi_reduction <add>, %5, %cst [0] : vector<4x342xf32> to vector<342xf32>
    %26 = vector.shape_cast %25 : vector<342xf32> to vector<1x342xf32>
    %27 = vector.extract_strided_slice %26 {offsets = [0, 0], sizes = [1, 288], strides = [1, 1]} : vector<1x342xf32> to vector<1x288xf32>
    %28 = vector.extract_strided_slice %26 {offsets = [0, 1], sizes = [1, 288], strides = [1, 1]} : vector<1x342xf32> to vector<1x288xf32>
    %29 = arith.addf %27, %28 : vector<1x288xf32>
    %30 = vector.extract_strided_slice %26 {offsets = [0, 2], sizes = [1, 288], strides = [1, 1]} : vector<1x342xf32> to vector<1x288xf32>
    %31 = arith.addf %29, %30 : vector<1x288xf32>
    %32 = vector.extract_strided_slice %26 {offsets = [0, 18], sizes = [1, 288], strides = [1, 1]} : vector<1x342xf32> to vector<1x288xf32>
    %33 = arith.addf %31, %32 : vector<1x288xf32>
    %34 = vector.extract_strided_slice %26 {offsets = [0, 19], sizes = [1, 288], strides = [1, 1]} : vector<1x342xf32> to vector<1x288xf32>
    %35 = arith.addf %33, %34 : vector<1x288xf32>
    %36 = vector.extract_strided_slice %26 {offsets = [0, 20], sizes = [1, 288], strides = [1, 1]} : vector<1x342xf32> to vector<1x288xf32>
    %37 = arith.addf %35, %36 : vector<1x288xf32>
    %38 = vector.extract_strided_slice %26 {offsets = [0, 36], sizes = [1, 288], strides = [1, 1]} : vector<1x342xf32> to vector<1x288xf32>
    %39 = arith.addf %37, %38 : vector<1x288xf32>
    %40 = vector.extract_strided_slice %26 {offsets = [0, 37], sizes = [1, 288], strides = [1, 1]} : vector<1x342xf32> to vector<1x288xf32>
    %41 = arith.addf %39, %40 : vector<1x288xf32>
    %42 = vector.extract_strided_slice %26 {offsets = [0, 38], sizes = [1, 288], strides = [1, 1]} : vector<1x342xf32> to vector<1x288xf32>
    %43 = arith.addf %41, %42 : vector<1x288xf32>
    %cst_15 = arith.constant 9.99999993E-9 : f32
    %44 = vector.broadcast %cst_15 : f32 to vector<1x288xf32>
    %45 = arith.addf %43, %44 : vector<1x288xf32>
    %46 = tpu.reciprocal %45 {approx = true} : vector<1x288xf32> -> vector<1x288xf32>
    %cst_16 = arith.constant 3.600000e+01 : f32
    %47 = vector.broadcast %cst_16 : f32 to vector<1x288xf32>
    %48 = arith.mulf %47, %46 : vector<1x288xf32>
    %cst_17 = arith.constant 0.000000e+00 : f32
    %cst_18 = arith.constant 1.000000e+00 : f32
    %49 = vector.broadcast %cst_17 : f32 to vector<1x288xf32>
    %50 = arith.maximumf %49, %43 : vector<1x288xf32>
    %51 = vector.broadcast %cst_18 : f32 to vector<1x288xf32>
    %52 = arith.minimumf %51, %50 : vector<1x288xf32>
    %53 = arith.mulf %48, %52 : vector<1x288xf32>
    %54 = arith.mulf %53, %52 : vector<1x288xf32>
    %c0_19 = arith.constant 0 : index
    %c0_20 = arith.constant 0 : index
    %55 = vector.load %arg3[%c0_19, %c0_20] : memref<8x36xf32, #tpu.memory_space<vmem>>, vector<8x36xf32>
    %c0_21 = arith.constant 0 : index
    %c0_22 = arith.constant 0 : index
    %56 = vector.load %arg7[%c0_21, %c0_22] : memref<36x288xf32, #tpu.memory_space<vmem>>, vector<36x288xf32>
    %cst_23 = arith.constant dense<0.000000e+00> : vector<8x288xf32>
    %57 = tpu.matmul %55, %56, %cst_23 {dimension_numbers = #tpu.dot_dimension_numbers<[1], [0], [0], [1], [0, 0, 1, 1], [], []>} : vector<8x36xf32>, vector<36x288xf32>, vector<8x288xf32> -> vector<8x288xf32>
    %c0_24 = arith.constant 0 : index
    %c0_25 = arith.constant 0 : index
    %58 = vector.load %arg4[%c0_24, %c0_25] : memref<8x1xf32, #tpu.memory_space<vmem>>, vector<8x1xf32>
    %59 = vector.broadcast %54 : vector<1x288xf32> to vector<8x288xf32>
    %60 = arith.mulf %57, %59 : vector<8x288xf32>
    %61 = vector.broadcast %58 : vector<8x1xf32> to vector<8x288xf32>
    %62 = vector.broadcast %52 : vector<1x288xf32> to vector<8x288xf32>
    %63 = arith.mulf %61, %62 : vector<8x288xf32>
    %64 = arith.addf %60, %63 : vector<8x288xf32>
    %cst_26 = arith.constant 0.000000e+00 : f32
    %65 = vector.broadcast %cst_26 : f32 to vector<8x288xf32>
    %66 = arith.maximumf %64, %65 : vector<8x288xf32>
    %67 = arith.truncf %66 : vector<8x288xf32> to vector<8x288xbf16>
    %c0_27 = arith.constant 0 : index
    %c0_28 = arith.constant 0 : index
    %c0_29 = arith.constant 0 : index
    %68 = vector.load %arg5[%c0_27, %c0_28, %c0_29] : memref<1x8x288xbf16, #tpu.memory_space<vmem>>, vector<1x8x288xbf16>
    %69 = vector.shape_cast %68 : vector<1x8x288xbf16> to vector<8x288xbf16>
    %70 = vector.shape_cast %67 : vector<8x288xbf16> to vector<1x8x288xbf16>
    tpu.vector_store %arg5[%c0_27, %c0_28, %c0_29], %70 {strides = array<i32>} : memref<1x8x288xbf16, #tpu.memory_space<vmem>>, vector<1x8x288xbf16>,
    %c0_30 = arith.constant 0 : index
    %c0_31 = arith.constant 0 : index
    %c0_32 = arith.constant 0 : index
    %71 = vector.load %arg6[%c0_30, %c0_31, %c0_32] : memref<1x1x288xf32, #tpu.memory_space<vmem>>, vector<1x1x288xf32>
    %72 = vector.shape_cast %71 : vector<1x1x288xf32> to vector<1x288xf32>
    %73 = vector.shape_cast %52 : vector<1x288xf32> to vector<1x1x288xf32>
    tpu.vector_store %arg6[%c0_30, %c0_31, %c0_32], %73 {strides = array<i32>} : memref<1x1x288xf32, #tpu.memory_space<vmem>>, vector<1x1x288xf32>,
    return
  }
  func.func @transform_0(%arg0: i32) -> (i32, i32, i32) {
    %c0_i32 = arith.constant 0 : i32
    %c0_i32_0 = arith.constant 0 : i32
    %c0_i32_1 = arith.constant 0 : i32
    return %arg0, %c0_i32, %c0_i32_0 : i32, i32, i32
  }
  func.func @transform_1(%arg0: i32) -> (i32, i32, i32) {
    %c0_i32 = arith.constant 0 : i32
    %c0_i32_0 = arith.constant 0 : i32
    %c0_i32_1 = arith.constant 0 : i32
    return %arg0, %c0_i32, %c0_i32_0 : i32, i32, i32
  }
  func.func @transform_2(%arg0: i32) -> (i32, i32) {
    %c0_i32 = arith.constant 0 : i32
    %c0_i32_0 = arith.constant 0 : i32
    %c0_i32_1 = arith.constant 0 : i32
    return %c0_i32, %c0_i32_0 : i32, i32
  }
  func.func @transform_3(%arg0: i32) -> (i32, i32) {
    %c0_i32 = arith.constant 0 : i32
    %c0_i32_0 = arith.constant 0 : i32
    %c0_i32_1 = arith.constant 0 : i32
    return %c0_i32, %c0_i32_0 : i32, i32
  }
  func.func @transform_4(%arg0: i32) -> (i32, i32, i32) {
    %c0_i32 = arith.constant 0 : i32
    %c0_i32_0 = arith.constant 0 : i32
    %c0_i32_1 = arith.constant 0 : i32
    return %arg0, %c0_i32, %c0_i32_0 : i32, i32, i32
  }
  func.func @transform_5(%arg0: i32) -> (i32, i32, i32) {
    %c0_i32 = arith.constant 0 : i32
    %c0_i32_0 = arith.constant 0 : i32
    %c0_i32_1 = arith.constant 0 : i32
    return %arg0, %c0_i32, %c0_i32_0 : i32, i32, i32
  }
}

module attributes {stable_mosaic.version = 11 : i64} {
  func.func @_pconv_relu_kernel(%arg0: i32, %arg1: memref<2x8x110xbf16, #tpu.memory_space<vmem>>, %arg2: memref<2x1x110xf32, #tpu.memory_space<vmem>>, %arg3: memref<8x72xf32, #tpu.memory_space<vmem>>, %arg4: memref<8x1xf32, #tpu.memory_space<vmem>>, %arg5: memref<1x8x160xbf16, #tpu.memory_space<vmem>>, %arg6: memref<1x1x160xf32, #tpu.memory_space<vmem>>, %arg7: memref<72x160xf32, #tpu.memory_space<vmem>>) attributes {dimension_semantics = [#tpu.dimension_semantics<parallel>], iteration_bounds = array<i64: 1>, scalar_prefetch = 0 : i64, scratch_operands = 1 : i64, tpu.core_type = #tpu.core_type<tc>, window_params = [{transform_indices = @transform_0, window_bounds = array<i64: 2, 8, 110>}, {transform_indices = @transform_1, window_bounds = array<i64: 2, 1, 110>}, {pipeline_mode = #tpu.pipeline_mode<synchronous>, transform_indices = @transform_2, window_bounds = array<i64: 8, 72>}, {pipeline_mode = #tpu.pipeline_mode<synchronous>, transform_indices = @transform_3, window_bounds = array<i64: 8, 1>}, {transform_indices = @transform_4, window_bounds = array<i64: 1, 8, 160>}, {transform_indices = @transform_5, window_bounds = array<i64: 1, 1, 160>}]} {
    %c0 = arith.constant 0 : index
    %c0_0 = arith.constant 0 : index
    %c0_1 = arith.constant 0 : index
    %0 = vector.load %arg1[%c0, %c0_0, %c0_1] : memref<2x8x110xbf16, #tpu.memory_space<vmem>>, vector<1x8x110xbf16>
    %1 = vector.shape_cast %0 : vector<1x8x110xbf16> to vector<8x110xbf16>
    %2 = arith.extf %1 : vector<8x110xbf16> to vector<8x110xf32>
    %c0_2 = arith.constant 0 : index
    %c0_3 = arith.constant 0 : index
    %c0_4 = arith.constant 0 : index
    %3 = vector.load %arg2[%c0_2, %c0_3, %c0_4] : memref<2x1x110xf32, #tpu.memory_space<vmem>>, vector<1x1x110xf32>
    %4 = vector.shape_cast %3 : vector<1x1x110xf32> to vector<1x110xf32>
    %5 = vector.broadcast %4 : vector<1x110xf32> to vector<8x110xf32>
    %6 = arith.mulf %2, %5 : vector<8x110xf32>
    %7 = vector.extract_strided_slice %6 {offsets = [0, 0], sizes = [8, 80], strides = [1, 1]} : vector<8x110xf32> to vector<8x80xf32>
    %c0_5 = arith.constant 0 : index
    %c0_6 = arith.constant 0 : index
    %8 = vector.load %arg7[%c0_5, %c0_6] : memref<72x160xf32, #tpu.memory_space<vmem>>, vector<8x80xf32>
    tpu.vector_store %arg7[%c0_5, %c0_6], %7 {strides = array<i32>} : memref<72x160xf32, #tpu.memory_space<vmem>>, vector<8x80xf32>,
    %9 = vector.extract_strided_slice %6 {offsets = [0, 1], sizes = [8, 80], strides = [1, 1]} : vector<8x110xf32> to vector<8x80xf32>
    %c8 = arith.constant 8 : index
    %c0_7 = arith.constant 0 : index
    %10 = vector.load %arg7[%c8, %c0_7] : memref<72x160xf32, #tpu.memory_space<vmem>>, vector<8x80xf32>
    tpu.vector_store %arg7[%c8, %c0_7], %9 {strides = array<i32>} : memref<72x160xf32, #tpu.memory_space<vmem>>, vector<8x80xf32>,
    %11 = vector.extract_strided_slice %6 {offsets = [0, 2], sizes = [8, 80], strides = [1, 1]} : vector<8x110xf32> to vector<8x80xf32>
    %c16 = arith.constant 16 : index
    %c0_8 = arith.constant 0 : index
    %12 = vector.load %arg7[%c16, %c0_8] : memref<72x160xf32, #tpu.memory_space<vmem>>, vector<8x80xf32>
    tpu.vector_store %arg7[%c16, %c0_8], %11 {strides = array<i32>} : memref<72x160xf32, #tpu.memory_space<vmem>>, vector<8x80xf32>,
    %13 = vector.extract_strided_slice %6 {offsets = [0, 10], sizes = [8, 80], strides = [1, 1]} : vector<8x110xf32> to vector<8x80xf32>
    %c24 = arith.constant 24 : index
    %c0_9 = arith.constant 0 : index
    %14 = vector.load %arg7[%c24, %c0_9] : memref<72x160xf32, #tpu.memory_space<vmem>>, vector<8x80xf32>
    tpu.vector_store %arg7[%c24, %c0_9], %13 {strides = array<i32>} : memref<72x160xf32, #tpu.memory_space<vmem>>, vector<8x80xf32>,
    %15 = vector.extract_strided_slice %6 {offsets = [0, 11], sizes = [8, 80], strides = [1, 1]} : vector<8x110xf32> to vector<8x80xf32>
    %c32 = arith.constant 32 : index
    %c0_10 = arith.constant 0 : index
    %16 = vector.load %arg7[%c32, %c0_10] : memref<72x160xf32, #tpu.memory_space<vmem>>, vector<8x80xf32>
    tpu.vector_store %arg7[%c32, %c0_10], %15 {strides = array<i32>} : memref<72x160xf32, #tpu.memory_space<vmem>>, vector<8x80xf32>,
    %17 = vector.extract_strided_slice %6 {offsets = [0, 12], sizes = [8, 80], strides = [1, 1]} : vector<8x110xf32> to vector<8x80xf32>
    %c40 = arith.constant 40 : index
    %c0_11 = arith.constant 0 : index
    %18 = vector.load %arg7[%c40, %c0_11] : memref<72x160xf32, #tpu.memory_space<vmem>>, vector<8x80xf32>
    tpu.vector_store %arg7[%c40, %c0_11], %17 {strides = array<i32>} : memref<72x160xf32, #tpu.memory_space<vmem>>, vector<8x80xf32>,
    %19 = vector.extract_strided_slice %6 {offsets = [0, 20], sizes = [8, 80], strides = [1, 1]} : vector<8x110xf32> to vector<8x80xf32>
    %c48 = arith.constant 48 : index
    %c0_12 = arith.constant 0 : index
    %20 = vector.load %arg7[%c48, %c0_12] : memref<72x160xf32, #tpu.memory_space<vmem>>, vector<8x80xf32>
    tpu.vector_store %arg7[%c48, %c0_12], %19 {strides = array<i32>} : memref<72x160xf32, #tpu.memory_space<vmem>>, vector<8x80xf32>,
    %21 = vector.extract_strided_slice %6 {offsets = [0, 21], sizes = [8, 80], strides = [1, 1]} : vector<8x110xf32> to vector<8x80xf32>
    %c56 = arith.constant 56 : index
    %c0_13 = arith.constant 0 : index
    %22 = vector.load %arg7[%c56, %c0_13] : memref<72x160xf32, #tpu.memory_space<vmem>>, vector<8x80xf32>
    tpu.vector_store %arg7[%c56, %c0_13], %21 {strides = array<i32>} : memref<72x160xf32, #tpu.memory_space<vmem>>, vector<8x80xf32>,
    %23 = vector.extract_strided_slice %6 {offsets = [0, 22], sizes = [8, 80], strides = [1, 1]} : vector<8x110xf32> to vector<8x80xf32>
    %c64 = arith.constant 64 : index
    %c0_14 = arith.constant 0 : index
    %24 = vector.load %arg7[%c64, %c0_14] : memref<72x160xf32, #tpu.memory_space<vmem>>, vector<8x80xf32>
    tpu.vector_store %arg7[%c64, %c0_14], %23 {strides = array<i32>} : memref<72x160xf32, #tpu.memory_space<vmem>>, vector<8x80xf32>,
    %25 = vector.extract_strided_slice %4 {offsets = [0, 0], sizes = [1, 80], strides = [1, 1]} : vector<1x110xf32> to vector<1x80xf32>
    %26 = vector.extract_strided_slice %4 {offsets = [0, 1], sizes = [1, 80], strides = [1, 1]} : vector<1x110xf32> to vector<1x80xf32>
    %27 = arith.addf %25, %26 : vector<1x80xf32>
    %28 = vector.extract_strided_slice %4 {offsets = [0, 2], sizes = [1, 80], strides = [1, 1]} : vector<1x110xf32> to vector<1x80xf32>
    %29 = arith.addf %27, %28 : vector<1x80xf32>
    %30 = vector.extract_strided_slice %4 {offsets = [0, 10], sizes = [1, 80], strides = [1, 1]} : vector<1x110xf32> to vector<1x80xf32>
    %31 = arith.addf %29, %30 : vector<1x80xf32>
    %32 = vector.extract_strided_slice %4 {offsets = [0, 11], sizes = [1, 80], strides = [1, 1]} : vector<1x110xf32> to vector<1x80xf32>
    %33 = arith.addf %31, %32 : vector<1x80xf32>
    %34 = vector.extract_strided_slice %4 {offsets = [0, 12], sizes = [1, 80], strides = [1, 1]} : vector<1x110xf32> to vector<1x80xf32>
    %35 = arith.addf %33, %34 : vector<1x80xf32>
    %36 = vector.extract_strided_slice %4 {offsets = [0, 20], sizes = [1, 80], strides = [1, 1]} : vector<1x110xf32> to vector<1x80xf32>
    %37 = arith.addf %35, %36 : vector<1x80xf32>
    %38 = vector.extract_strided_slice %4 {offsets = [0, 21], sizes = [1, 80], strides = [1, 1]} : vector<1x110xf32> to vector<1x80xf32>
    %39 = arith.addf %37, %38 : vector<1x80xf32>
    %40 = vector.extract_strided_slice %4 {offsets = [0, 22], sizes = [1, 80], strides = [1, 1]} : vector<1x110xf32> to vector<1x80xf32>
    %41 = arith.addf %39, %40 : vector<1x80xf32>
    %cst = arith.constant 8.000000e+00 : f32
    %42 = vector.broadcast %cst : f32 to vector<1x80xf32>
    %43 = arith.mulf %41, %42 : vector<1x80xf32>
    %cst_15 = arith.constant 9.99999993E-9 : f32
    %44 = vector.broadcast %cst_15 : f32 to vector<1x80xf32>
    %45 = arith.addf %43, %44 : vector<1x80xf32>
    %46 = tpu.reciprocal %45 {approx = true} : vector<1x80xf32> -> vector<1x80xf32>
    %cst_16 = arith.constant 7.200000e+01 : f32
    %47 = vector.broadcast %cst_16 : f32 to vector<1x80xf32>
    %48 = arith.mulf %47, %46 : vector<1x80xf32>
    %cst_17 = arith.constant 0.000000e+00 : f32
    %cst_18 = arith.constant 1.000000e+00 : f32
    %49 = vector.broadcast %cst_17 : f32 to vector<1x80xf32>
    %50 = arith.maximumf %49, %43 : vector<1x80xf32>
    %51 = vector.broadcast %cst_18 : f32 to vector<1x80xf32>
    %52 = arith.minimumf %51, %50 : vector<1x80xf32>
    %53 = arith.mulf %48, %52 : vector<1x80xf32>
    %54 = arith.mulf %53, %52 : vector<1x80xf32>
    %c1 = arith.constant 1 : index
    %c0_19 = arith.constant 0 : index
    %c0_20 = arith.constant 0 : index
    %55 = vector.load %arg1[%c1, %c0_19, %c0_20] : memref<2x8x110xbf16, #tpu.memory_space<vmem>>, vector<1x8x110xbf16>
    %56 = vector.shape_cast %55 : vector<1x8x110xbf16> to vector<8x110xbf16>
    %57 = arith.extf %56 : vector<8x110xbf16> to vector<8x110xf32>
    %c1_21 = arith.constant 1 : index
    %c0_22 = arith.constant 0 : index
    %c0_23 = arith.constant 0 : index
    %58 = vector.load %arg2[%c1_21, %c0_22, %c0_23] : memref<2x1x110xf32, #tpu.memory_space<vmem>>, vector<1x1x110xf32>
    %59 = vector.shape_cast %58 : vector<1x1x110xf32> to vector<1x110xf32>
    %60 = vector.broadcast %59 : vector<1x110xf32> to vector<8x110xf32>
    %61 = arith.mulf %57, %60 : vector<8x110xf32>
    %62 = vector.extract_strided_slice %61 {offsets = [0, 0], sizes = [8, 80], strides = [1, 1]} : vector<8x110xf32> to vector<8x80xf32>
    %c0_24 = arith.constant 0 : index
    %c80 = arith.constant 80 : index
    %63 = vector.load %arg7[%c0_24, %c80] : memref<72x160xf32, #tpu.memory_space<vmem>>, vector<8x80xf32>
    tpu.vector_store %arg7[%c0_24, %c80], %62 {strides = array<i32>} : memref<72x160xf32, #tpu.memory_space<vmem>>, vector<8x80xf32>,
    %64 = vector.extract_strided_slice %61 {offsets = [0, 1], sizes = [8, 80], strides = [1, 1]} : vector<8x110xf32> to vector<8x80xf32>
    %c8_25 = arith.constant 8 : index
    %c80_26 = arith.constant 80 : index
    %65 = vector.load %arg7[%c8_25, %c80_26] : memref<72x160xf32, #tpu.memory_space<vmem>>, vector<8x80xf32>
    tpu.vector_store %arg7[%c8_25, %c80_26], %64 {strides = array<i32>} : memref<72x160xf32, #tpu.memory_space<vmem>>, vector<8x80xf32>,
    %66 = vector.extract_strided_slice %61 {offsets = [0, 2], sizes = [8, 80], strides = [1, 1]} : vector<8x110xf32> to vector<8x80xf32>
    %c16_27 = arith.constant 16 : index
    %c80_28 = arith.constant 80 : index
    %67 = vector.load %arg7[%c16_27, %c80_28] : memref<72x160xf32, #tpu.memory_space<vmem>>, vector<8x80xf32>
    tpu.vector_store %arg7[%c16_27, %c80_28], %66 {strides = array<i32>} : memref<72x160xf32, #tpu.memory_space<vmem>>, vector<8x80xf32>,
    %68 = vector.extract_strided_slice %61 {offsets = [0, 10], sizes = [8, 80], strides = [1, 1]} : vector<8x110xf32> to vector<8x80xf32>
    %c24_29 = arith.constant 24 : index
    %c80_30 = arith.constant 80 : index
    %69 = vector.load %arg7[%c24_29, %c80_30] : memref<72x160xf32, #tpu.memory_space<vmem>>, vector<8x80xf32>
    tpu.vector_store %arg7[%c24_29, %c80_30], %68 {strides = array<i32>} : memref<72x160xf32, #tpu.memory_space<vmem>>, vector<8x80xf32>,
    %70 = vector.extract_strided_slice %61 {offsets = [0, 11], sizes = [8, 80], strides = [1, 1]} : vector<8x110xf32> to vector<8x80xf32>
    %c32_31 = arith.constant 32 : index
    %c80_32 = arith.constant 80 : index
    %71 = vector.load %arg7[%c32_31, %c80_32] : memref<72x160xf32, #tpu.memory_space<vmem>>, vector<8x80xf32>
    tpu.vector_store %arg7[%c32_31, %c80_32], %70 {strides = array<i32>} : memref<72x160xf32, #tpu.memory_space<vmem>>, vector<8x80xf32>,
    %72 = vector.extract_strided_slice %61 {offsets = [0, 12], sizes = [8, 80], strides = [1, 1]} : vector<8x110xf32> to vector<8x80xf32>
    %c40_33 = arith.constant 40 : index
    %c80_34 = arith.constant 80 : index
    %73 = vector.load %arg7[%c40_33, %c80_34] : memref<72x160xf32, #tpu.memory_space<vmem>>, vector<8x80xf32>
    tpu.vector_store %arg7[%c40_33, %c80_34], %72 {strides = array<i32>} : memref<72x160xf32, #tpu.memory_space<vmem>>, vector<8x80xf32>,
    %74 = vector.extract_strided_slice %61 {offsets = [0, 20], sizes = [8, 80], strides = [1, 1]} : vector<8x110xf32> to vector<8x80xf32>
    %c48_35 = arith.constant 48 : index
    %c80_36 = arith.constant 80 : index
    %75 = vector.load %arg7[%c48_35, %c80_36] : memref<72x160xf32, #tpu.memory_space<vmem>>, vector<8x80xf32>
    tpu.vector_store %arg7[%c48_35, %c80_36], %74 {strides = array<i32>} : memref<72x160xf32, #tpu.memory_space<vmem>>, vector<8x80xf32>,
    %76 = vector.extract_strided_slice %61 {offsets = [0, 21], sizes = [8, 80], strides = [1, 1]} : vector<8x110xf32> to vector<8x80xf32>
    %c56_37 = arith.constant 56 : index
    %c80_38 = arith.constant 80 : index
    %77 = vector.load %arg7[%c56_37, %c80_38] : memref<72x160xf32, #tpu.memory_space<vmem>>, vector<8x80xf32>
    tpu.vector_store %arg7[%c56_37, %c80_38], %76 {strides = array<i32>} : memref<72x160xf32, #tpu.memory_space<vmem>>, vector<8x80xf32>,
    %78 = vector.extract_strided_slice %61 {offsets = [0, 22], sizes = [8, 80], strides = [1, 1]} : vector<8x110xf32> to vector<8x80xf32>
    %c64_39 = arith.constant 64 : index
    %c80_40 = arith.constant 80 : index
    %79 = vector.load %arg7[%c64_39, %c80_40] : memref<72x160xf32, #tpu.memory_space<vmem>>, vector<8x80xf32>
    tpu.vector_store %arg7[%c64_39, %c80_40], %78 {strides = array<i32>} : memref<72x160xf32, #tpu.memory_space<vmem>>, vector<8x80xf32>,
    %80 = vector.extract_strided_slice %59 {offsets = [0, 0], sizes = [1, 80], strides = [1, 1]} : vector<1x110xf32> to vector<1x80xf32>
    %81 = vector.extract_strided_slice %59 {offsets = [0, 1], sizes = [1, 80], strides = [1, 1]} : vector<1x110xf32> to vector<1x80xf32>
    %82 = arith.addf %80, %81 : vector<1x80xf32>
    %83 = vector.extract_strided_slice %59 {offsets = [0, 2], sizes = [1, 80], strides = [1, 1]} : vector<1x110xf32> to vector<1x80xf32>
    %84 = arith.addf %82, %83 : vector<1x80xf32>
    %85 = vector.extract_strided_slice %59 {offsets = [0, 10], sizes = [1, 80], strides = [1, 1]} : vector<1x110xf32> to vector<1x80xf32>
    %86 = arith.addf %84, %85 : vector<1x80xf32>
    %87 = vector.extract_strided_slice %59 {offsets = [0, 11], sizes = [1, 80], strides = [1, 1]} : vector<1x110xf32> to vector<1x80xf32>
    %88 = arith.addf %86, %87 : vector<1x80xf32>
    %89 = vector.extract_strided_slice %59 {offsets = [0, 12], sizes = [1, 80], strides = [1, 1]} : vector<1x110xf32> to vector<1x80xf32>
    %90 = arith.addf %88, %89 : vector<1x80xf32>
    %91 = vector.extract_strided_slice %59 {offsets = [0, 20], sizes = [1, 80], strides = [1, 1]} : vector<1x110xf32> to vector<1x80xf32>
    %92 = arith.addf %90, %91 : vector<1x80xf32>
    %93 = vector.extract_strided_slice %59 {offsets = [0, 21], sizes = [1, 80], strides = [1, 1]} : vector<1x110xf32> to vector<1x80xf32>
    %94 = arith.addf %92, %93 : vector<1x80xf32>
    %95 = vector.extract_strided_slice %59 {offsets = [0, 22], sizes = [1, 80], strides = [1, 1]} : vector<1x110xf32> to vector<1x80xf32>
    %96 = arith.addf %94, %95 : vector<1x80xf32>
    %cst_41 = arith.constant 8.000000e+00 : f32
    %97 = vector.broadcast %cst_41 : f32 to vector<1x80xf32>
    %98 = arith.mulf %96, %97 : vector<1x80xf32>
    %cst_42 = arith.constant 9.99999993E-9 : f32
    %99 = vector.broadcast %cst_42 : f32 to vector<1x80xf32>
    %100 = arith.addf %98, %99 : vector<1x80xf32>
    %101 = tpu.reciprocal %100 {approx = true} : vector<1x80xf32> -> vector<1x80xf32>
    %cst_43 = arith.constant 7.200000e+01 : f32
    %102 = vector.broadcast %cst_43 : f32 to vector<1x80xf32>
    %103 = arith.mulf %102, %101 : vector<1x80xf32>
    %cst_44 = arith.constant 0.000000e+00 : f32
    %cst_45 = arith.constant 1.000000e+00 : f32
    %104 = vector.broadcast %cst_44 : f32 to vector<1x80xf32>
    %105 = arith.maximumf %104, %98 : vector<1x80xf32>
    %106 = vector.broadcast %cst_45 : f32 to vector<1x80xf32>
    %107 = arith.minimumf %106, %105 : vector<1x80xf32>
    %108 = arith.mulf %103, %107 : vector<1x80xf32>
    %109 = arith.mulf %108, %107 : vector<1x80xf32>
    %c0_46 = arith.constant 0 : index
    %c0_47 = arith.constant 0 : index
    %110 = vector.load %arg3[%c0_46, %c0_47] : memref<8x72xf32, #tpu.memory_space<vmem>>, vector<8x72xf32>
    %c0_48 = arith.constant 0 : index
    %c0_49 = arith.constant 0 : index
    %111 = vector.load %arg7[%c0_48, %c0_49] : memref<72x160xf32, #tpu.memory_space<vmem>>, vector<72x160xf32>
    %cst_50 = arith.constant dense<0.000000e+00> : vector<8x160xf32>
    %112 = tpu.matmul %110, %111, %cst_50 {dimension_numbers = #tpu.dot_dimension_numbers<[1], [0], [0], [1], [0, 0, 1, 1], [], []>} : vector<8x72xf32>, vector<72x160xf32>, vector<8x160xf32> -> vector<8x160xf32>
    %c0_51 = arith.constant 0 : index
    %c0_52 = arith.constant 0 : index
    %113 = vector.load %arg4[%c0_51, %c0_52] : memref<8x1xf32, #tpu.memory_space<vmem>>, vector<8x1xf32>
    %114 = vector.extract_strided_slice %112 {offsets = [0, 0], sizes = [8, 80], strides = [1, 1]} : vector<8x160xf32> to vector<8x80xf32>
    %115 = vector.broadcast %54 : vector<1x80xf32> to vector<8x80xf32>
    %116 = arith.mulf %114, %115 : vector<8x80xf32>
    %117 = vector.broadcast %113 : vector<8x1xf32> to vector<8x80xf32>
    %118 = vector.broadcast %52 : vector<1x80xf32> to vector<8x80xf32>
    %119 = arith.mulf %117, %118 : vector<8x80xf32>
    %120 = arith.addf %116, %119 : vector<8x80xf32>
    %cst_53 = arith.constant 0.000000e+00 : f32
    %121 = vector.broadcast %cst_53 : f32 to vector<8x80xf32>
    %122 = arith.maximumf %120, %121 : vector<8x80xf32>
    %123 = arith.truncf %122 : vector<8x80xf32> to vector<8x80xbf16>
    %c0_54 = arith.constant 0 : index
    %c0_55 = arith.constant 0 : index
    %c0_56 = arith.constant 0 : index
    %124 = vector.load %arg5[%c0_54, %c0_55, %c0_56] : memref<1x8x160xbf16, #tpu.memory_space<vmem>>, vector<1x8x80xbf16>
    %125 = vector.shape_cast %124 : vector<1x8x80xbf16> to vector<8x80xbf16>
    %126 = vector.shape_cast %123 : vector<8x80xbf16> to vector<1x8x80xbf16>
    tpu.vector_store %arg5[%c0_54, %c0_55, %c0_56], %126 {strides = array<i32>} : memref<1x8x160xbf16, #tpu.memory_space<vmem>>, vector<1x8x80xbf16>,
    %c0_57 = arith.constant 0 : index
    %c0_58 = arith.constant 0 : index
    %c0_59 = arith.constant 0 : index
    %127 = vector.load %arg6[%c0_57, %c0_58, %c0_59] : memref<1x1x160xf32, #tpu.memory_space<vmem>>, vector<1x1x80xf32>
    %128 = vector.shape_cast %127 : vector<1x1x80xf32> to vector<1x80xf32>
    %129 = vector.shape_cast %52 : vector<1x80xf32> to vector<1x1x80xf32>
    tpu.vector_store %arg6[%c0_57, %c0_58, %c0_59], %129 {strides = array<i32>} : memref<1x1x160xf32, #tpu.memory_space<vmem>>, vector<1x1x80xf32>,
    %130 = vector.extract_strided_slice %112 {offsets = [0, 80], sizes = [8, 80], strides = [1, 1]} : vector<8x160xf32> to vector<8x80xf32>
    %131 = vector.broadcast %109 : vector<1x80xf32> to vector<8x80xf32>
    %132 = arith.mulf %130, %131 : vector<8x80xf32>
    %133 = vector.broadcast %113 : vector<8x1xf32> to vector<8x80xf32>
    %134 = vector.broadcast %107 : vector<1x80xf32> to vector<8x80xf32>
    %135 = arith.mulf %133, %134 : vector<8x80xf32>
    %136 = arith.addf %132, %135 : vector<8x80xf32>
    %cst_60 = arith.constant 0.000000e+00 : f32
    %137 = vector.broadcast %cst_60 : f32 to vector<8x80xf32>
    %138 = arith.maximumf %136, %137 : vector<8x80xf32>
    %139 = arith.truncf %138 : vector<8x80xf32> to vector<8x80xbf16>
    %c0_61 = arith.constant 0 : index
    %c0_62 = arith.constant 0 : index
    %c80_63 = arith.constant 80 : index
    %140 = vector.load %arg5[%c0_61, %c0_62, %c80_63] : memref<1x8x160xbf16, #tpu.memory_space<vmem>>, vector<1x8x80xbf16>
    %141 = vector.shape_cast %140 : vector<1x8x80xbf16> to vector<8x80xbf16>
    %142 = vector.shape_cast %139 : vector<8x80xbf16> to vector<1x8x80xbf16>
    tpu.vector_store %arg5[%c0_61, %c0_62, %c80_63], %142 {strides = array<i32>} : memref<1x8x160xbf16, #tpu.memory_space<vmem>>, vector<1x8x80xbf16>,
    %c0_64 = arith.constant 0 : index
    %c0_65 = arith.constant 0 : index
    %c80_66 = arith.constant 80 : index
    %143 = vector.load %arg6[%c0_64, %c0_65, %c80_66] : memref<1x1x160xf32, #tpu.memory_space<vmem>>, vector<1x1x80xf32>
    %144 = vector.shape_cast %143 : vector<1x1x80xf32> to vector<1x80xf32>
    %145 = vector.shape_cast %107 : vector<1x80xf32> to vector<1x1x80xf32>
    tpu.vector_store %arg6[%c0_64, %c0_65, %c80_66], %145 {strides = array<i32>} : memref<1x1x160xf32, #tpu.memory_space<vmem>>, vector<1x1x80xf32>,
    return
  }
  func.func @transform_0(%arg0: i32) -> (i32, i32, i32) {
    %c0_i32 = arith.constant 0 : i32
    %c0_i32_0 = arith.constant 0 : i32
    %c0_i32_1 = arith.constant 0 : i32
    return %arg0, %c0_i32, %c0_i32_0 : i32, i32, i32
  }
  func.func @transform_1(%arg0: i32) -> (i32, i32, i32) {
    %c0_i32 = arith.constant 0 : i32
    %c0_i32_0 = arith.constant 0 : i32
    %c0_i32_1 = arith.constant 0 : i32
    return %arg0, %c0_i32, %c0_i32_0 : i32, i32, i32
  }
  func.func @transform_2(%arg0: i32) -> (i32, i32) {
    %c0_i32 = arith.constant 0 : i32
    %c0_i32_0 = arith.constant 0 : i32
    %c0_i32_1 = arith.constant 0 : i32
    return %c0_i32, %c0_i32_0 : i32, i32
  }
  func.func @transform_3(%arg0: i32) -> (i32, i32) {
    %c0_i32 = arith.constant 0 : i32
    %c0_i32_0 = arith.constant 0 : i32
    %c0_i32_1 = arith.constant 0 : i32
    return %c0_i32, %c0_i32_0 : i32, i32
  }
  func.func @transform_4(%arg0: i32) -> (i32, i32, i32) {
    %c0_i32 = arith.constant 0 : i32
    %c0_i32_0 = arith.constant 0 : i32
    %c0_i32_1 = arith.constant 0 : i32
    return %arg0, %c0_i32, %c0_i32_0 : i32, i32, i32
  }
  func.func @transform_5(%arg0: i32) -> (i32, i32, i32) {
    %c0_i32 = arith.constant 0 : i32
    %c0_i32_0 = arith.constant 0 : i32
    %c0_i32_1 = arith.constant 0 : i32
    return %arg0, %c0_i32, %c0_i32_0 : i32, i32, i32
  }
}

module attributes {stable_mosaic.version = 11 : i64} {
  func.func @_pconv_relu_kernel(%arg0: i32, %arg1: memref<2x8x42xbf16, #tpu.memory_space<vmem>>, %arg2: memref<2x1x42xf32, #tpu.memory_space<vmem>>, %arg3: memref<8x72xf32, #tpu.memory_space<vmem>>, %arg4: memref<8x1xf32, #tpu.memory_space<vmem>>, %arg5: memref<1x8x48xbf16, #tpu.memory_space<vmem>>, %arg6: memref<1x1x48xf32, #tpu.memory_space<vmem>>, %arg7: memref<72x48xf32, #tpu.memory_space<vmem>>) attributes {dimension_semantics = [#tpu.dimension_semantics<parallel>], iteration_bounds = array<i64: 1>, scalar_prefetch = 0 : i64, scratch_operands = 1 : i64, tpu.core_type = #tpu.core_type<tc>, window_params = [{transform_indices = @transform_0, window_bounds = array<i64: 2, 8, 42>}, {transform_indices = @transform_1, window_bounds = array<i64: 2, 1, 42>}, {pipeline_mode = #tpu.pipeline_mode<synchronous>, transform_indices = @transform_2, window_bounds = array<i64: 8, 72>}, {pipeline_mode = #tpu.pipeline_mode<synchronous>, transform_indices = @transform_3, window_bounds = array<i64: 8, 1>}, {transform_indices = @transform_4, window_bounds = array<i64: 1, 8, 48>}, {transform_indices = @transform_5, window_bounds = array<i64: 1, 1, 48>}]} {
    %c0 = arith.constant 0 : index
    %c0_0 = arith.constant 0 : index
    %c0_1 = arith.constant 0 : index
    %0 = vector.load %arg1[%c0, %c0_0, %c0_1] : memref<2x8x42xbf16, #tpu.memory_space<vmem>>, vector<1x8x42xbf16>
    %1 = vector.shape_cast %0 : vector<1x8x42xbf16> to vector<8x42xbf16>
    %2 = arith.extf %1 : vector<8x42xbf16> to vector<8x42xf32>
    %c0_2 = arith.constant 0 : index
    %c0_3 = arith.constant 0 : index
    %c0_4 = arith.constant 0 : index
    %3 = vector.load %arg2[%c0_2, %c0_3, %c0_4] : memref<2x1x42xf32, #tpu.memory_space<vmem>>, vector<1x1x42xf32>
    %4 = vector.shape_cast %3 : vector<1x1x42xf32> to vector<1x42xf32>
    %5 = vector.broadcast %4 : vector<1x42xf32> to vector<8x42xf32>
    %6 = arith.mulf %2, %5 : vector<8x42xf32>
    %7 = vector.extract_strided_slice %6 {offsets = [0, 0], sizes = [8, 24], strides = [1, 1]} : vector<8x42xf32> to vector<8x24xf32>
    %c0_5 = arith.constant 0 : index
    %c0_6 = arith.constant 0 : index
    %8 = vector.load %arg7[%c0_5, %c0_6] : memref<72x48xf32, #tpu.memory_space<vmem>>, vector<8x24xf32>
    tpu.vector_store %arg7[%c0_5, %c0_6], %7 {strides = array<i32>} : memref<72x48xf32, #tpu.memory_space<vmem>>, vector<8x24xf32>,
    %9 = vector.extract_strided_slice %6 {offsets = [0, 1], sizes = [8, 24], strides = [1, 1]} : vector<8x42xf32> to vector<8x24xf32>
    %c8 = arith.constant 8 : index
    %c0_7 = arith.constant 0 : index
    %10 = vector.load %arg7[%c8, %c0_7] : memref<72x48xf32, #tpu.memory_space<vmem>>, vector<8x24xf32>
    tpu.vector_store %arg7[%c8, %c0_7], %9 {strides = array<i32>} : memref<72x48xf32, #tpu.memory_space<vmem>>, vector<8x24xf32>,
    %11 = vector.extract_strided_slice %6 {offsets = [0, 2], sizes = [8, 24], strides = [1, 1]} : vector<8x42xf32> to vector<8x24xf32>
    %c16 = arith.constant 16 : index
    %c0_8 = arith.constant 0 : index
    %12 = vector.load %arg7[%c16, %c0_8] : memref<72x48xf32, #tpu.memory_space<vmem>>, vector<8x24xf32>
    tpu.vector_store %arg7[%c16, %c0_8], %11 {strides = array<i32>} : memref<72x48xf32, #tpu.memory_space<vmem>>, vector<8x24xf32>,
    %13 = vector.extract_strided_slice %6 {offsets = [0, 6], sizes = [8, 24], strides = [1, 1]} : vector<8x42xf32> to vector<8x24xf32>
    %c24 = arith.constant 24 : index
    %c0_9 = arith.constant 0 : index
    %14 = vector.load %arg7[%c24, %c0_9] : memref<72x48xf32, #tpu.memory_space<vmem>>, vector<8x24xf32>
    tpu.vector_store %arg7[%c24, %c0_9], %13 {strides = array<i32>} : memref<72x48xf32, #tpu.memory_space<vmem>>, vector<8x24xf32>,
    %15 = vector.extract_strided_slice %6 {offsets = [0, 7], sizes = [8, 24], strides = [1, 1]} : vector<8x42xf32> to vector<8x24xf32>
    %c32 = arith.constant 32 : index
    %c0_10 = arith.constant 0 : index
    %16 = vector.load %arg7[%c32, %c0_10] : memref<72x48xf32, #tpu.memory_space<vmem>>, vector<8x24xf32>
    tpu.vector_store %arg7[%c32, %c0_10], %15 {strides = array<i32>} : memref<72x48xf32, #tpu.memory_space<vmem>>, vector<8x24xf32>,
    %17 = vector.extract_strided_slice %6 {offsets = [0, 8], sizes = [8, 24], strides = [1, 1]} : vector<8x42xf32> to vector<8x24xf32>
    %c40 = arith.constant 40 : index
    %c0_11 = arith.constant 0 : index
    %18 = vector.load %arg7[%c40, %c0_11] : memref<72x48xf32, #tpu.memory_space<vmem>>, vector<8x24xf32>
    tpu.vector_store %arg7[%c40, %c0_11], %17 {strides = array<i32>} : memref<72x48xf32, #tpu.memory_space<vmem>>, vector<8x24xf32>,
    %19 = vector.extract_strided_slice %6 {offsets = [0, 12], sizes = [8, 24], strides = [1, 1]} : vector<8x42xf32> to vector<8x24xf32>
    %c48 = arith.constant 48 : index
    %c0_12 = arith.constant 0 : index
    %20 = vector.load %arg7[%c48, %c0_12] : memref<72x48xf32, #tpu.memory_space<vmem>>, vector<8x24xf32>
    tpu.vector_store %arg7[%c48, %c0_12], %19 {strides = array<i32>} : memref<72x48xf32, #tpu.memory_space<vmem>>, vector<8x24xf32>,
    %21 = vector.extract_strided_slice %6 {offsets = [0, 13], sizes = [8, 24], strides = [1, 1]} : vector<8x42xf32> to vector<8x24xf32>
    %c56 = arith.constant 56 : index
    %c0_13 = arith.constant 0 : index
    %22 = vector.load %arg7[%c56, %c0_13] : memref<72x48xf32, #tpu.memory_space<vmem>>, vector<8x24xf32>
    tpu.vector_store %arg7[%c56, %c0_13], %21 {strides = array<i32>} : memref<72x48xf32, #tpu.memory_space<vmem>>, vector<8x24xf32>,
    %23 = vector.extract_strided_slice %6 {offsets = [0, 14], sizes = [8, 24], strides = [1, 1]} : vector<8x42xf32> to vector<8x24xf32>
    %c64 = arith.constant 64 : index
    %c0_14 = arith.constant 0 : index
    %24 = vector.load %arg7[%c64, %c0_14] : memref<72x48xf32, #tpu.memory_space<vmem>>, vector<8x24xf32>
    tpu.vector_store %arg7[%c64, %c0_14], %23 {strides = array<i32>} : memref<72x48xf32, #tpu.memory_space<vmem>>, vector<8x24xf32>,
    %25 = vector.extract_strided_slice %4 {offsets = [0, 0], sizes = [1, 24], strides = [1, 1]} : vector<1x42xf32> to vector<1x24xf32>
    %26 = vector.extract_strided_slice %4 {offsets = [0, 1], sizes = [1, 24], strides = [1, 1]} : vector<1x42xf32> to vector<1x24xf32>
    %27 = arith.addf %25, %26 : vector<1x24xf32>
    %28 = vector.extract_strided_slice %4 {offsets = [0, 2], sizes = [1, 24], strides = [1, 1]} : vector<1x42xf32> to vector<1x24xf32>
    %29 = arith.addf %27, %28 : vector<1x24xf32>
    %30 = vector.extract_strided_slice %4 {offsets = [0, 6], sizes = [1, 24], strides = [1, 1]} : vector<1x42xf32> to vector<1x24xf32>
    %31 = arith.addf %29, %30 : vector<1x24xf32>
    %32 = vector.extract_strided_slice %4 {offsets = [0, 7], sizes = [1, 24], strides = [1, 1]} : vector<1x42xf32> to vector<1x24xf32>
    %33 = arith.addf %31, %32 : vector<1x24xf32>
    %34 = vector.extract_strided_slice %4 {offsets = [0, 8], sizes = [1, 24], strides = [1, 1]} : vector<1x42xf32> to vector<1x24xf32>
    %35 = arith.addf %33, %34 : vector<1x24xf32>
    %36 = vector.extract_strided_slice %4 {offsets = [0, 12], sizes = [1, 24], strides = [1, 1]} : vector<1x42xf32> to vector<1x24xf32>
    %37 = arith.addf %35, %36 : vector<1x24xf32>
    %38 = vector.extract_strided_slice %4 {offsets = [0, 13], sizes = [1, 24], strides = [1, 1]} : vector<1x42xf32> to vector<1x24xf32>
    %39 = arith.addf %37, %38 : vector<1x24xf32>
    %40 = vector.extract_strided_slice %4 {offsets = [0, 14], sizes = [1, 24], strides = [1, 1]} : vector<1x42xf32> to vector<1x24xf32>
    %41 = arith.addf %39, %40 : vector<1x24xf32>
    %cst = arith.constant 8.000000e+00 : f32
    %42 = vector.broadcast %cst : f32 to vector<1x24xf32>
    %43 = arith.mulf %41, %42 : vector<1x24xf32>
    %cst_15 = arith.constant 9.99999993E-9 : f32
    %44 = vector.broadcast %cst_15 : f32 to vector<1x24xf32>
    %45 = arith.addf %43, %44 : vector<1x24xf32>
    %46 = tpu.reciprocal %45 {approx = true} : vector<1x24xf32> -> vector<1x24xf32>
    %cst_16 = arith.constant 7.200000e+01 : f32
    %47 = vector.broadcast %cst_16 : f32 to vector<1x24xf32>
    %48 = arith.mulf %47, %46 : vector<1x24xf32>
    %cst_17 = arith.constant 0.000000e+00 : f32
    %cst_18 = arith.constant 1.000000e+00 : f32
    %49 = vector.broadcast %cst_17 : f32 to vector<1x24xf32>
    %50 = arith.maximumf %49, %43 : vector<1x24xf32>
    %51 = vector.broadcast %cst_18 : f32 to vector<1x24xf32>
    %52 = arith.minimumf %51, %50 : vector<1x24xf32>
    %53 = arith.mulf %48, %52 : vector<1x24xf32>
    %54 = arith.mulf %53, %52 : vector<1x24xf32>
    %c1 = arith.constant 1 : index
    %c0_19 = arith.constant 0 : index
    %c0_20 = arith.constant 0 : index
    %55 = vector.load %arg1[%c1, %c0_19, %c0_20] : memref<2x8x42xbf16, #tpu.memory_space<vmem>>, vector<1x8x42xbf16>
    %56 = vector.shape_cast %55 : vector<1x8x42xbf16> to vector<8x42xbf16>
    %57 = arith.extf %56 : vector<8x42xbf16> to vector<8x42xf32>
    %c1_21 = arith.constant 1 : index
    %c0_22 = arith.constant 0 : index
    %c0_23 = arith.constant 0 : index
    %58 = vector.load %arg2[%c1_21, %c0_22, %c0_23] : memref<2x1x42xf32, #tpu.memory_space<vmem>>, vector<1x1x42xf32>
    %59 = vector.shape_cast %58 : vector<1x1x42xf32> to vector<1x42xf32>
    %60 = vector.broadcast %59 : vector<1x42xf32> to vector<8x42xf32>
    %61 = arith.mulf %57, %60 : vector<8x42xf32>
    %62 = vector.extract_strided_slice %61 {offsets = [0, 0], sizes = [8, 24], strides = [1, 1]} : vector<8x42xf32> to vector<8x24xf32>
    %c0_24 = arith.constant 0 : index
    %c24_25 = arith.constant 24 : index
    %63 = vector.load %arg7[%c0_24, %c24_25] : memref<72x48xf32, #tpu.memory_space<vmem>>, vector<8x24xf32>
    tpu.vector_store %arg7[%c0_24, %c24_25], %62 {strides = array<i32>} : memref<72x48xf32, #tpu.memory_space<vmem>>, vector<8x24xf32>,
    %64 = vector.extract_strided_slice %61 {offsets = [0, 1], sizes = [8, 24], strides = [1, 1]} : vector<8x42xf32> to vector<8x24xf32>
    %c8_26 = arith.constant 8 : index
    %c24_27 = arith.constant 24 : index
    %65 = vector.load %arg7[%c8_26, %c24_27] : memref<72x48xf32, #tpu.memory_space<vmem>>, vector<8x24xf32>
    tpu.vector_store %arg7[%c8_26, %c24_27], %64 {strides = array<i32>} : memref<72x48xf32, #tpu.memory_space<vmem>>, vector<8x24xf32>,
    %66 = vector.extract_strided_slice %61 {offsets = [0, 2], sizes = [8, 24], strides = [1, 1]} : vector<8x42xf32> to vector<8x24xf32>
    %c16_28 = arith.constant 16 : index
    %c24_29 = arith.constant 24 : index
    %67 = vector.load %arg7[%c16_28, %c24_29] : memref<72x48xf32, #tpu.memory_space<vmem>>, vector<8x24xf32>
    tpu.vector_store %arg7[%c16_28, %c24_29], %66 {strides = array<i32>} : memref<72x48xf32, #tpu.memory_space<vmem>>, vector<8x24xf32>,
    %68 = vector.extract_strided_slice %61 {offsets = [0, 6], sizes = [8, 24], strides = [1, 1]} : vector<8x42xf32> to vector<8x24xf32>
    %c24_30 = arith.constant 24 : index
    %c24_31 = arith.constant 24 : index
    %69 = vector.load %arg7[%c24_30, %c24_31] : memref<72x48xf32, #tpu.memory_space<vmem>>, vector<8x24xf32>
    tpu.vector_store %arg7[%c24_30, %c24_31], %68 {strides = array<i32>} : memref<72x48xf32, #tpu.memory_space<vmem>>, vector<8x24xf32>,
    %70 = vector.extract_strided_slice %61 {offsets = [0, 7], sizes = [8, 24], strides = [1, 1]} : vector<8x42xf32> to vector<8x24xf32>
    %c32_32 = arith.constant 32 : index
    %c24_33 = arith.constant 24 : index
    %71 = vector.load %arg7[%c32_32, %c24_33] : memref<72x48xf32, #tpu.memory_space<vmem>>, vector<8x24xf32>
    tpu.vector_store %arg7[%c32_32, %c24_33], %70 {strides = array<i32>} : memref<72x48xf32, #tpu.memory_space<vmem>>, vector<8x24xf32>,
    %72 = vector.extract_strided_slice %61 {offsets = [0, 8], sizes = [8, 24], strides = [1, 1]} : vector<8x42xf32> to vector<8x24xf32>
    %c40_34 = arith.constant 40 : index
    %c24_35 = arith.constant 24 : index
    %73 = vector.load %arg7[%c40_34, %c24_35] : memref<72x48xf32, #tpu.memory_space<vmem>>, vector<8x24xf32>
    tpu.vector_store %arg7[%c40_34, %c24_35], %72 {strides = array<i32>} : memref<72x48xf32, #tpu.memory_space<vmem>>, vector<8x24xf32>,
    %74 = vector.extract_strided_slice %61 {offsets = [0, 12], sizes = [8, 24], strides = [1, 1]} : vector<8x42xf32> to vector<8x24xf32>
    %c48_36 = arith.constant 48 : index
    %c24_37 = arith.constant 24 : index
    %75 = vector.load %arg7[%c48_36, %c24_37] : memref<72x48xf32, #tpu.memory_space<vmem>>, vector<8x24xf32>
    tpu.vector_store %arg7[%c48_36, %c24_37], %74 {strides = array<i32>} : memref<72x48xf32, #tpu.memory_space<vmem>>, vector<8x24xf32>,
    %76 = vector.extract_strided_slice %61 {offsets = [0, 13], sizes = [8, 24], strides = [1, 1]} : vector<8x42xf32> to vector<8x24xf32>
    %c56_38 = arith.constant 56 : index
    %c24_39 = arith.constant 24 : index
    %77 = vector.load %arg7[%c56_38, %c24_39] : memref<72x48xf32, #tpu.memory_space<vmem>>, vector<8x24xf32>
    tpu.vector_store %arg7[%c56_38, %c24_39], %76 {strides = array<i32>} : memref<72x48xf32, #tpu.memory_space<vmem>>, vector<8x24xf32>,
    %78 = vector.extract_strided_slice %61 {offsets = [0, 14], sizes = [8, 24], strides = [1, 1]} : vector<8x42xf32> to vector<8x24xf32>
    %c64_40 = arith.constant 64 : index
    %c24_41 = arith.constant 24 : index
    %79 = vector.load %arg7[%c64_40, %c24_41] : memref<72x48xf32, #tpu.memory_space<vmem>>, vector<8x24xf32>
    tpu.vector_store %arg7[%c64_40, %c24_41], %78 {strides = array<i32>} : memref<72x48xf32, #tpu.memory_space<vmem>>, vector<8x24xf32>,
    %80 = vector.extract_strided_slice %59 {offsets = [0, 0], sizes = [1, 24], strides = [1, 1]} : vector<1x42xf32> to vector<1x24xf32>
    %81 = vector.extract_strided_slice %59 {offsets = [0, 1], sizes = [1, 24], strides = [1, 1]} : vector<1x42xf32> to vector<1x24xf32>
    %82 = arith.addf %80, %81 : vector<1x24xf32>
    %83 = vector.extract_strided_slice %59 {offsets = [0, 2], sizes = [1, 24], strides = [1, 1]} : vector<1x42xf32> to vector<1x24xf32>
    %84 = arith.addf %82, %83 : vector<1x24xf32>
    %85 = vector.extract_strided_slice %59 {offsets = [0, 6], sizes = [1, 24], strides = [1, 1]} : vector<1x42xf32> to vector<1x24xf32>
    %86 = arith.addf %84, %85 : vector<1x24xf32>
    %87 = vector.extract_strided_slice %59 {offsets = [0, 7], sizes = [1, 24], strides = [1, 1]} : vector<1x42xf32> to vector<1x24xf32>
    %88 = arith.addf %86, %87 : vector<1x24xf32>
    %89 = vector.extract_strided_slice %59 {offsets = [0, 8], sizes = [1, 24], strides = [1, 1]} : vector<1x42xf32> to vector<1x24xf32>
    %90 = arith.addf %88, %89 : vector<1x24xf32>
    %91 = vector.extract_strided_slice %59 {offsets = [0, 12], sizes = [1, 24], strides = [1, 1]} : vector<1x42xf32> to vector<1x24xf32>
    %92 = arith.addf %90, %91 : vector<1x24xf32>
    %93 = vector.extract_strided_slice %59 {offsets = [0, 13], sizes = [1, 24], strides = [1, 1]} : vector<1x42xf32> to vector<1x24xf32>
    %94 = arith.addf %92, %93 : vector<1x24xf32>
    %95 = vector.extract_strided_slice %59 {offsets = [0, 14], sizes = [1, 24], strides = [1, 1]} : vector<1x42xf32> to vector<1x24xf32>
    %96 = arith.addf %94, %95 : vector<1x24xf32>
    %cst_42 = arith.constant 8.000000e+00 : f32
    %97 = vector.broadcast %cst_42 : f32 to vector<1x24xf32>
    %98 = arith.mulf %96, %97 : vector<1x24xf32>
    %cst_43 = arith.constant 9.99999993E-9 : f32
    %99 = vector.broadcast %cst_43 : f32 to vector<1x24xf32>
    %100 = arith.addf %98, %99 : vector<1x24xf32>
    %101 = tpu.reciprocal %100 {approx = true} : vector<1x24xf32> -> vector<1x24xf32>
    %cst_44 = arith.constant 7.200000e+01 : f32
    %102 = vector.broadcast %cst_44 : f32 to vector<1x24xf32>
    %103 = arith.mulf %102, %101 : vector<1x24xf32>
    %cst_45 = arith.constant 0.000000e+00 : f32
    %cst_46 = arith.constant 1.000000e+00 : f32
    %104 = vector.broadcast %cst_45 : f32 to vector<1x24xf32>
    %105 = arith.maximumf %104, %98 : vector<1x24xf32>
    %106 = vector.broadcast %cst_46 : f32 to vector<1x24xf32>
    %107 = arith.minimumf %106, %105 : vector<1x24xf32>
    %108 = arith.mulf %103, %107 : vector<1x24xf32>
    %109 = arith.mulf %108, %107 : vector<1x24xf32>
    %c0_47 = arith.constant 0 : index
    %c0_48 = arith.constant 0 : index
    %110 = vector.load %arg3[%c0_47, %c0_48] : memref<8x72xf32, #tpu.memory_space<vmem>>, vector<8x72xf32>
    %c0_49 = arith.constant 0 : index
    %c0_50 = arith.constant 0 : index
    %111 = vector.load %arg7[%c0_49, %c0_50] : memref<72x48xf32, #tpu.memory_space<vmem>>, vector<72x48xf32>
    %cst_51 = arith.constant dense<0.000000e+00> : vector<8x48xf32>
    %112 = tpu.matmul %110, %111, %cst_51 {dimension_numbers = #tpu.dot_dimension_numbers<[1], [0], [0], [1], [0, 0, 1, 1], [], []>} : vector<8x72xf32>, vector<72x48xf32>, vector<8x48xf32> -> vector<8x48xf32>
    %c0_52 = arith.constant 0 : index
    %c0_53 = arith.constant 0 : index
    %113 = vector.load %arg4[%c0_52, %c0_53] : memref<8x1xf32, #tpu.memory_space<vmem>>, vector<8x1xf32>
    %114 = vector.extract_strided_slice %112 {offsets = [0, 0], sizes = [8, 24], strides = [1, 1]} : vector<8x48xf32> to vector<8x24xf32>
    %115 = vector.broadcast %54 : vector<1x24xf32> to vector<8x24xf32>
    %116 = arith.mulf %114, %115 : vector<8x24xf32>
    %117 = vector.broadcast %113 : vector<8x1xf32> to vector<8x24xf32>
    %118 = vector.broadcast %52 : vector<1x24xf32> to vector<8x24xf32>
    %119 = arith.mulf %117, %118 : vector<8x24xf32>
    %120 = arith.addf %116, %119 : vector<8x24xf32>
    %cst_54 = arith.constant 0.000000e+00 : f32
    %121 = vector.broadcast %cst_54 : f32 to vector<8x24xf32>
    %122 = arith.maximumf %120, %121 : vector<8x24xf32>
    %123 = arith.truncf %122 : vector<8x24xf32> to vector<8x24xbf16>
    %c0_55 = arith.constant 0 : index
    %c0_56 = arith.constant 0 : index
    %c0_57 = arith.constant 0 : index
    %124 = vector.load %arg5[%c0_55, %c0_56, %c0_57] : memref<1x8x48xbf16, #tpu.memory_space<vmem>>, vector<1x8x24xbf16>
    %125 = vector.shape_cast %124 : vector<1x8x24xbf16> to vector<8x24xbf16>
    %126 = vector.shape_cast %123 : vector<8x24xbf16> to vector<1x8x24xbf16>
    tpu.vector_store %arg5[%c0_55, %c0_56, %c0_57], %126 {strides = array<i32>} : memref<1x8x48xbf16, #tpu.memory_space<vmem>>, vector<1x8x24xbf16>,
    %c0_58 = arith.constant 0 : index
    %c0_59 = arith.constant 0 : index
    %c0_60 = arith.constant 0 : index
    %127 = vector.load %arg6[%c0_58, %c0_59, %c0_60] : memref<1x1x48xf32, #tpu.memory_space<vmem>>, vector<1x1x24xf32>
    %128 = vector.shape_cast %127 : vector<1x1x24xf32> to vector<1x24xf32>
    %129 = vector.shape_cast %52 : vector<1x24xf32> to vector<1x1x24xf32>
    tpu.vector_store %arg6[%c0_58, %c0_59, %c0_60], %129 {strides = array<i32>} : memref<1x1x48xf32, #tpu.memory_space<vmem>>, vector<1x1x24xf32>,
    %130 = vector.extract_strided_slice %112 {offsets = [0, 24], sizes = [8, 24], strides = [1, 1]} : vector<8x48xf32> to vector<8x24xf32>
    %131 = vector.broadcast %109 : vector<1x24xf32> to vector<8x24xf32>
    %132 = arith.mulf %130, %131 : vector<8x24xf32>
    %133 = vector.broadcast %113 : vector<8x1xf32> to vector<8x24xf32>
    %134 = vector.broadcast %107 : vector<1x24xf32> to vector<8x24xf32>
    %135 = arith.mulf %133, %134 : vector<8x24xf32>
    %136 = arith.addf %132, %135 : vector<8x24xf32>
    %cst_61 = arith.constant 0.000000e+00 : f32
    %137 = vector.broadcast %cst_61 : f32 to vector<8x24xf32>
    %138 = arith.maximumf %136, %137 : vector<8x24xf32>
    %139 = arith.truncf %138 : vector<8x24xf32> to vector<8x24xbf16>
    %c0_62 = arith.constant 0 : index
    %c0_63 = arith.constant 0 : index
    %c24_64 = arith.constant 24 : index
    %140 = vector.load %arg5[%c0_62, %c0_63, %c24_64] : memref<1x8x48xbf16, #tpu.memory_space<vmem>>, vector<1x8x24xbf16>
    %141 = vector.shape_cast %140 : vector<1x8x24xbf16> to vector<8x24xbf16>
    %142 = vector.shape_cast %139 : vector<8x24xbf16> to vector<1x8x24xbf16>
    tpu.vector_store %arg5[%c0_62, %c0_63, %c24_64], %142 {strides = array<i32>} : memref<1x8x48xbf16, #tpu.memory_space<vmem>>, vector<1x8x24xbf16>,
    %c0_65 = arith.constant 0 : index
    %c0_66 = arith.constant 0 : index
    %c24_67 = arith.constant 24 : index
    %143 = vector.load %arg6[%c0_65, %c0_66, %c24_67] : memref<1x1x48xf32, #tpu.memory_space<vmem>>, vector<1x1x24xf32>
    %144 = vector.shape_cast %143 : vector<1x1x24xf32> to vector<1x24xf32>
    %145 = vector.shape_cast %107 : vector<1x24xf32> to vector<1x1x24xf32>
    tpu.vector_store %arg6[%c0_65, %c0_66, %c24_67], %145 {strides = array<i32>} : memref<1x1x48xf32, #tpu.memory_space<vmem>>, vector<1x1x24xf32>,
    return
  }
  func.func @transform_0(%arg0: i32) -> (i32, i32, i32) {
    %c0_i32 = arith.constant 0 : i32
    %c0_i32_0 = arith.constant 0 : i32
    %c0_i32_1 = arith.constant 0 : i32
    return %arg0, %c0_i32, %c0_i32_0 : i32, i32, i32
  }
  func.func @transform_1(%arg0: i32) -> (i32, i32, i32) {
    %c0_i32 = arith.constant 0 : i32
    %c0_i32_0 = arith.constant 0 : i32
    %c0_i32_1 = arith.constant 0 : i32
    return %arg0, %c0_i32, %c0_i32_0 : i32, i32, i32
  }
  func.func @transform_2(%arg0: i32) -> (i32, i32) {
    %c0_i32 = arith.constant 0 : i32
    %c0_i32_0 = arith.constant 0 : i32
    %c0_i32_1 = arith.constant 0 : i32
    return %c0_i32, %c0_i32_0 : i32, i32
  }
  func.func @transform_3(%arg0: i32) -> (i32, i32) {
    %c0_i32 = arith.constant 0 : i32
    %c0_i32_0 = arith.constant 0 : i32
    %c0_i32_1 = arith.constant 0 : i32
    return %c0_i32, %c0_i32_0 : i32, i32
  }
  func.func @transform_4(%arg0: i32) -> (i32, i32, i32) {
    %c0_i32 = arith.constant 0 : i32
    %c0_i32_0 = arith.constant 0 : i32
    %c0_i32_1 = arith.constant 0 : i32
    return %arg0, %c0_i32, %c0_i32_0 : i32, i32, i32
  }
  func.func @transform_5(%arg0: i32) -> (i32, i32, i32) {
    %c0_i32 = arith.constant 0 : i32
    %c0_i32_0 = arith.constant 0 : i32
    %c0_i32_1 = arith.constant 0 : i32
    return %arg0, %c0_i32, %c0_i32_0 : i32, i32, i32
  }
}

module attributes {stable_mosaic.version = 11 : i64} {
  func.func @_pconv_relu_kernel(%arg0: i32, %arg1: memref<2x8x20xbf16, #tpu.memory_space<vmem>>, %arg2: memref<2x1x20xf32, #tpu.memory_space<vmem>>, %arg3: memref<8x72xf32, #tpu.memory_space<vmem>>, %arg4: memref<8x1xf32, #tpu.memory_space<vmem>>, %arg5: memref<1x8x16xbf16, #tpu.memory_space<vmem>>, %arg6: memref<1x1x16xf32, #tpu.memory_space<vmem>>, %arg7: memref<72x16xf32, #tpu.memory_space<vmem>>) attributes {dimension_semantics = [#tpu.dimension_semantics<parallel>], iteration_bounds = array<i64: 1>, scalar_prefetch = 0 : i64, scratch_operands = 1 : i64, tpu.core_type = #tpu.core_type<tc>, window_params = [{transform_indices = @transform_0, window_bounds = array<i64: 2, 8, 20>}, {transform_indices = @transform_1, window_bounds = array<i64: 2, 1, 20>}, {pipeline_mode = #tpu.pipeline_mode<synchronous>, transform_indices = @transform_2, window_bounds = array<i64: 8, 72>}, {pipeline_mode = #tpu.pipeline_mode<synchronous>, transform_indices = @transform_3, window_bounds = array<i64: 8, 1>}, {transform_indices = @transform_4, window_bounds = array<i64: 1, 8, 16>}, {transform_indices = @transform_5, window_bounds = array<i64: 1, 1, 16>}]} {
    %c0 = arith.constant 0 : index
    %c0_0 = arith.constant 0 : index
    %c0_1 = arith.constant 0 : index
    %0 = vector.load %arg1[%c0, %c0_0, %c0_1] : memref<2x8x20xbf16, #tpu.memory_space<vmem>>, vector<1x8x20xbf16>
    %1 = vector.shape_cast %0 : vector<1x8x20xbf16> to vector<8x20xbf16>
    %2 = arith.extf %1 : vector<8x20xbf16> to vector<8x20xf32>
    %c0_2 = arith.constant 0 : index
    %c0_3 = arith.constant 0 : index
    %c0_4 = arith.constant 0 : index
    %3 = vector.load %arg2[%c0_2, %c0_3, %c0_4] : memref<2x1x20xf32, #tpu.memory_space<vmem>>, vector<1x1x20xf32>
    %4 = vector.shape_cast %3 : vector<1x1x20xf32> to vector<1x20xf32>
    %5 = vector.broadcast %4 : vector<1x20xf32> to vector<8x20xf32>
    %6 = arith.mulf %2, %5 : vector<8x20xf32>
    %7 = vector.extract_strided_slice %6 {offsets = [0, 0], sizes = [8, 8], strides = [1, 1]} : vector<8x20xf32> to vector<8x8xf32>
    %c0_5 = arith.constant 0 : index
    %c0_6 = arith.constant 0 : index
    %8 = vector.load %arg7[%c0_5, %c0_6] : memref<72x16xf32, #tpu.memory_space<vmem>>, vector<8x8xf32>
    tpu.vector_store %arg7[%c0_5, %c0_6], %7 {strides = array<i32>} : memref<72x16xf32, #tpu.memory_space<vmem>>, vector<8x8xf32>,
    %9 = vector.extract_strided_slice %6 {offsets = [0, 1], sizes = [8, 8], strides = [1, 1]} : vector<8x20xf32> to vector<8x8xf32>
    %c8 = arith.constant 8 : index
    %c0_7 = arith.constant 0 : index
    %10 = vector.load %arg7[%c8, %c0_7] : memref<72x16xf32, #tpu.memory_space<vmem>>, vector<8x8xf32>
    tpu.vector_store %arg7[%c8, %c0_7], %9 {strides = array<i32>} : memref<72x16xf32, #tpu.memory_space<vmem>>, vector<8x8xf32>,
    %11 = vector.extract_strided_slice %6 {offsets = [0, 2], sizes = [8, 8], strides = [1, 1]} : vector<8x20xf32> to vector<8x8xf32>
    %c16 = arith.constant 16 : index
    %c0_8 = arith.constant 0 : index
    %12 = vector.load %arg7[%c16, %c0_8] : memref<72x16xf32, #tpu.memory_space<vmem>>, vector<8x8xf32>
    tpu.vector_store %arg7[%c16, %c0_8], %11 {strides = array<i32>} : memref<72x16xf32, #tpu.memory_space<vmem>>, vector<8x8xf32>,
    %13 = vector.extract_strided_slice %6 {offsets = [0, 4], sizes = [8, 8], strides = [1, 1]} : vector<8x20xf32> to vector<8x8xf32>
    %c24 = arith.constant 24 : index
    %c0_9 = arith.constant 0 : index
    %14 = vector.load %arg7[%c24, %c0_9] : memref<72x16xf32, #tpu.memory_space<vmem>>, vector<8x8xf32>
    tpu.vector_store %arg7[%c24, %c0_9], %13 {strides = array<i32>} : memref<72x16xf32, #tpu.memory_space<vmem>>, vector<8x8xf32>,
    %15 = vector.extract_strided_slice %6 {offsets = [0, 5], sizes = [8, 8], strides = [1, 1]} : vector<8x20xf32> to vector<8x8xf32>
    %c32 = arith.constant 32 : index
    %c0_10 = arith.constant 0 : index
    %16 = vector.load %arg7[%c32, %c0_10] : memref<72x16xf32, #tpu.memory_space<vmem>>, vector<8x8xf32>
    tpu.vector_store %arg7[%c32, %c0_10], %15 {strides = array<i32>} : memref<72x16xf32, #tpu.memory_space<vmem>>, vector<8x8xf32>,
    %17 = vector.extract_strided_slice %6 {offsets = [0, 6], sizes = [8, 8], strides = [1, 1]} : vector<8x20xf32> to vector<8x8xf32>
    %c40 = arith.constant 40 : index
    %c0_11 = arith.constant 0 : index
    %18 = vector.load %arg7[%c40, %c0_11] : memref<72x16xf32, #tpu.memory_space<vmem>>, vector<8x8xf32>
    tpu.vector_store %arg7[%c40, %c0_11], %17 {strides = array<i32>} : memref<72x16xf32, #tpu.memory_space<vmem>>, vector<8x8xf32>,
    %19 = vector.extract_strided_slice %6 {offsets = [0, 8], sizes = [8, 8], strides = [1, 1]} : vector<8x20xf32> to vector<8x8xf32>
    %c48 = arith.constant 48 : index
    %c0_12 = arith.constant 0 : index
    %20 = vector.load %arg7[%c48, %c0_12] : memref<72x16xf32, #tpu.memory_space<vmem>>, vector<8x8xf32>
    tpu.vector_store %arg7[%c48, %c0_12], %19 {strides = array<i32>} : memref<72x16xf32, #tpu.memory_space<vmem>>, vector<8x8xf32>,
    %21 = vector.extract_strided_slice %6 {offsets = [0, 9], sizes = [8, 8], strides = [1, 1]} : vector<8x20xf32> to vector<8x8xf32>
    %c56 = arith.constant 56 : index
    %c0_13 = arith.constant 0 : index
    %22 = vector.load %arg7[%c56, %c0_13] : memref<72x16xf32, #tpu.memory_space<vmem>>, vector<8x8xf32>
    tpu.vector_store %arg7[%c56, %c0_13], %21 {strides = array<i32>} : memref<72x16xf32, #tpu.memory_space<vmem>>, vector<8x8xf32>,
    %23 = vector.extract_strided_slice %6 {offsets = [0, 10], sizes = [8, 8], strides = [1, 1]} : vector<8x20xf32> to vector<8x8xf32>
    %c64 = arith.constant 64 : index
    %c0_14 = arith.constant 0 : index
    %24 = vector.load %arg7[%c64, %c0_14] : memref<72x16xf32, #tpu.memory_space<vmem>>, vector<8x8xf32>
    tpu.vector_store %arg7[%c64, %c0_14], %23 {strides = array<i32>} : memref<72x16xf32, #tpu.memory_space<vmem>>, vector<8x8xf32>,
    %25 = vector.extract_strided_slice %4 {offsets = [0, 0], sizes = [1, 8], strides = [1, 1]} : vector<1x20xf32> to vector<1x8xf32>
    %26 = vector.extract_strided_slice %4 {offsets = [0, 1], sizes = [1, 8], strides = [1, 1]} : vector<1x20xf32> to vector<1x8xf32>
    %27 = arith.addf %25, %26 : vector<1x8xf32>
    %28 = vector.extract_strided_slice %4 {offsets = [0, 2], sizes = [1, 8], strides = [1, 1]} : vector<1x20xf32> to vector<1x8xf32>
    %29 = arith.addf %27, %28 : vector<1x8xf32>
    %30 = vector.extract_strided_slice %4 {offsets = [0, 4], sizes = [1, 8], strides = [1, 1]} : vector<1x20xf32> to vector<1x8xf32>
    %31 = arith.addf %29, %30 : vector<1x8xf32>
    %32 = vector.extract_strided_slice %4 {offsets = [0, 5], sizes = [1, 8], strides = [1, 1]} : vector<1x20xf32> to vector<1x8xf32>
    %33 = arith.addf %31, %32 : vector<1x8xf32>
    %34 = vector.extract_strided_slice %4 {offsets = [0, 6], sizes = [1, 8], strides = [1, 1]} : vector<1x20xf32> to vector<1x8xf32>
    %35 = arith.addf %33, %34 : vector<1x8xf32>
    %36 = vector.extract_strided_slice %4 {offsets = [0, 8], sizes = [1, 8], strides = [1, 1]} : vector<1x20xf32> to vector<1x8xf32>
    %37 = arith.addf %35, %36 : vector<1x8xf32>
    %38 = vector.extract_strided_slice %4 {offsets = [0, 9], sizes = [1, 8], strides = [1, 1]} : vector<1x20xf32> to vector<1x8xf32>
    %39 = arith.addf %37, %38 : vector<1x8xf32>
    %40 = vector.extract_strided_slice %4 {offsets = [0, 10], sizes = [1, 8], strides = [1, 1]} : vector<1x20xf32> to vector<1x8xf32>
    %41 = arith.addf %39, %40 : vector<1x8xf32>
    %cst = arith.constant 8.000000e+00 : f32
    %42 = vector.broadcast %cst : f32 to vector<1x8xf32>
    %43 = arith.mulf %41, %42 : vector<1x8xf32>
    %cst_15 = arith.constant 9.99999993E-9 : f32
    %44 = vector.broadcast %cst_15 : f32 to vector<1x8xf32>
    %45 = arith.addf %43, %44 : vector<1x8xf32>
    %46 = tpu.reciprocal %45 {approx = true} : vector<1x8xf32> -> vector<1x8xf32>
    %cst_16 = arith.constant 7.200000e+01 : f32
    %47 = vector.broadcast %cst_16 : f32 to vector<1x8xf32>
    %48 = arith.mulf %47, %46 : vector<1x8xf32>
    %cst_17 = arith.constant 0.000000e+00 : f32
    %cst_18 = arith.constant 1.000000e+00 : f32
    %49 = vector.broadcast %cst_17 : f32 to vector<1x8xf32>
    %50 = arith.maximumf %49, %43 : vector<1x8xf32>
    %51 = vector.broadcast %cst_18 : f32 to vector<1x8xf32>
    %52 = arith.minimumf %51, %50 : vector<1x8xf32>
    %53 = arith.mulf %48, %52 : vector<1x8xf32>
    %54 = arith.mulf %53, %52 : vector<1x8xf32>
    %c1 = arith.constant 1 : index
    %c0_19 = arith.constant 0 : index
    %c0_20 = arith.constant 0 : index
    %55 = vector.load %arg1[%c1, %c0_19, %c0_20] : memref<2x8x20xbf16, #tpu.memory_space<vmem>>, vector<1x8x20xbf16>
    %56 = vector.shape_cast %55 : vector<1x8x20xbf16> to vector<8x20xbf16>
    %57 = arith.extf %56 : vector<8x20xbf16> to vector<8x20xf32>
    %c1_21 = arith.constant 1 : index
    %c0_22 = arith.constant 0 : index
    %c0_23 = arith.constant 0 : index
    %58 = vector.load %arg2[%c1_21, %c0_22, %c0_23] : memref<2x1x20xf32, #tpu.memory_space<vmem>>, vector<1x1x20xf32>
    %59 = vector.shape_cast %58 : vector<1x1x20xf32> to vector<1x20xf32>
    %60 = vector.broadcast %59 : vector<1x20xf32> to vector<8x20xf32>
    %61 = arith.mulf %57, %60 : vector<8x20xf32>
    %62 = vector.extract_strided_slice %61 {offsets = [0, 0], sizes = [8, 8], strides = [1, 1]} : vector<8x20xf32> to vector<8x8xf32>
    %c0_24 = arith.constant 0 : index
    %c8_25 = arith.constant 8 : index
    %63 = vector.load %arg7[%c0_24, %c8_25] : memref<72x16xf32, #tpu.memory_space<vmem>>, vector<8x8xf32>
    tpu.vector_store %arg7[%c0_24, %c8_25], %62 {strides = array<i32>} : memref<72x16xf32, #tpu.memory_space<vmem>>, vector<8x8xf32>,
    %64 = vector.extract_strided_slice %61 {offsets = [0, 1], sizes = [8, 8], strides = [1, 1]} : vector<8x20xf32> to vector<8x8xf32>
    %c8_26 = arith.constant 8 : index
    %c8_27 = arith.constant 8 : index
    %65 = vector.load %arg7[%c8_26, %c8_27] : memref<72x16xf32, #tpu.memory_space<vmem>>, vector<8x8xf32>
    tpu.vector_store %arg7[%c8_26, %c8_27], %64 {strides = array<i32>} : memref<72x16xf32, #tpu.memory_space<vmem>>, vector<8x8xf32>,
    %66 = vector.extract_strided_slice %61 {offsets = [0, 2], sizes = [8, 8], strides = [1, 1]} : vector<8x20xf32> to vector<8x8xf32>
    %c16_28 = arith.constant 16 : index
    %c8_29 = arith.constant 8 : index
    %67 = vector.load %arg7[%c16_28, %c8_29] : memref<72x16xf32, #tpu.memory_space<vmem>>, vector<8x8xf32>
    tpu.vector_store %arg7[%c16_28, %c8_29], %66 {strides = array<i32>} : memref<72x16xf32, #tpu.memory_space<vmem>>, vector<8x8xf32>,
    %68 = vector.extract_strided_slice %61 {offsets = [0, 4], sizes = [8, 8], strides = [1, 1]} : vector<8x20xf32> to vector<8x8xf32>
    %c24_30 = arith.constant 24 : index
    %c8_31 = arith.constant 8 : index
    %69 = vector.load %arg7[%c24_30, %c8_31] : memref<72x16xf32, #tpu.memory_space<vmem>>, vector<8x8xf32>
    tpu.vector_store %arg7[%c24_30, %c8_31], %68 {strides = array<i32>} : memref<72x16xf32, #tpu.memory_space<vmem>>, vector<8x8xf32>,
    %70 = vector.extract_strided_slice %61 {offsets = [0, 5], sizes = [8, 8], strides = [1, 1]} : vector<8x20xf32> to vector<8x8xf32>
    %c32_32 = arith.constant 32 : index
    %c8_33 = arith.constant 8 : index
    %71 = vector.load %arg7[%c32_32, %c8_33] : memref<72x16xf32, #tpu.memory_space<vmem>>, vector<8x8xf32>
    tpu.vector_store %arg7[%c32_32, %c8_33], %70 {strides = array<i32>} : memref<72x16xf32, #tpu.memory_space<vmem>>, vector<8x8xf32>,
    %72 = vector.extract_strided_slice %61 {offsets = [0, 6], sizes = [8, 8], strides = [1, 1]} : vector<8x20xf32> to vector<8x8xf32>
    %c40_34 = arith.constant 40 : index
    %c8_35 = arith.constant 8 : index
    %73 = vector.load %arg7[%c40_34, %c8_35] : memref<72x16xf32, #tpu.memory_space<vmem>>, vector<8x8xf32>
    tpu.vector_store %arg7[%c40_34, %c8_35], %72 {strides = array<i32>} : memref<72x16xf32, #tpu.memory_space<vmem>>, vector<8x8xf32>,
    %74 = vector.extract_strided_slice %61 {offsets = [0, 8], sizes = [8, 8], strides = [1, 1]} : vector<8x20xf32> to vector<8x8xf32>
    %c48_36 = arith.constant 48 : index
    %c8_37 = arith.constant 8 : index
    %75 = vector.load %arg7[%c48_36, %c8_37] : memref<72x16xf32, #tpu.memory_space<vmem>>, vector<8x8xf32>
    tpu.vector_store %arg7[%c48_36, %c8_37], %74 {strides = array<i32>} : memref<72x16xf32, #tpu.memory_space<vmem>>, vector<8x8xf32>,
    %76 = vector.extract_strided_slice %61 {offsets = [0, 9], sizes = [8, 8], strides = [1, 1]} : vector<8x20xf32> to vector<8x8xf32>
    %c56_38 = arith.constant 56 : index
    %c8_39 = arith.constant 8 : index
    %77 = vector.load %arg7[%c56_38, %c8_39] : memref<72x16xf32, #tpu.memory_space<vmem>>, vector<8x8xf32>
    tpu.vector_store %arg7[%c56_38, %c8_39], %76 {strides = array<i32>} : memref<72x16xf32, #tpu.memory_space<vmem>>, vector<8x8xf32>,
    %78 = vector.extract_strided_slice %61 {offsets = [0, 10], sizes = [8, 8], strides = [1, 1]} : vector<8x20xf32> to vector<8x8xf32>
    %c64_40 = arith.constant 64 : index
    %c8_41 = arith.constant 8 : index
    %79 = vector.load %arg7[%c64_40, %c8_41] : memref<72x16xf32, #tpu.memory_space<vmem>>, vector<8x8xf32>
    tpu.vector_store %arg7[%c64_40, %c8_41], %78 {strides = array<i32>} : memref<72x16xf32, #tpu.memory_space<vmem>>, vector<8x8xf32>,
    %80 = vector.extract_strided_slice %59 {offsets = [0, 0], sizes = [1, 8], strides = [1, 1]} : vector<1x20xf32> to vector<1x8xf32>
    %81 = vector.extract_strided_slice %59 {offsets = [0, 1], sizes = [1, 8], strides = [1, 1]} : vector<1x20xf32> to vector<1x8xf32>
    %82 = arith.addf %80, %81 : vector<1x8xf32>
    %83 = vector.extract_strided_slice %59 {offsets = [0, 2], sizes = [1, 8], strides = [1, 1]} : vector<1x20xf32> to vector<1x8xf32>
    %84 = arith.addf %82, %83 : vector<1x8xf32>
    %85 = vector.extract_strided_slice %59 {offsets = [0, 4], sizes = [1, 8], strides = [1, 1]} : vector<1x20xf32> to vector<1x8xf32>
    %86 = arith.addf %84, %85 : vector<1x8xf32>
    %87 = vector.extract_strided_slice %59 {offsets = [0, 5], sizes = [1, 8], strides = [1, 1]} : vector<1x20xf32> to vector<1x8xf32>
    %88 = arith.addf %86, %87 : vector<1x8xf32>
    %89 = vector.extract_strided_slice %59 {offsets = [0, 6], sizes = [1, 8], strides = [1, 1]} : vector<1x20xf32> to vector<1x8xf32>
    %90 = arith.addf %88, %89 : vector<1x8xf32>
    %91 = vector.extract_strided_slice %59 {offsets = [0, 8], sizes = [1, 8], strides = [1, 1]} : vector<1x20xf32> to vector<1x8xf32>
    %92 = arith.addf %90, %91 : vector<1x8xf32>
    %93 = vector.extract_strided_slice %59 {offsets = [0, 9], sizes = [1, 8], strides = [1, 1]} : vector<1x20xf32> to vector<1x8xf32>
    %94 = arith.addf %92, %93 : vector<1x8xf32>
    %95 = vector.extract_strided_slice %59 {offsets = [0, 10], sizes = [1, 8], strides = [1, 1]} : vector<1x20xf32> to vector<1x8xf32>
    %96 = arith.addf %94, %95 : vector<1x8xf32>
    %cst_42 = arith.constant 8.000000e+00 : f32
    %97 = vector.broadcast %cst_42 : f32 to vector<1x8xf32>
    %98 = arith.mulf %96, %97 : vector<1x8xf32>
    %cst_43 = arith.constant 9.99999993E-9 : f32
    %99 = vector.broadcast %cst_43 : f32 to vector<1x8xf32>
    %100 = arith.addf %98, %99 : vector<1x8xf32>
    %101 = tpu.reciprocal %100 {approx = true} : vector<1x8xf32> -> vector<1x8xf32>
    %cst_44 = arith.constant 7.200000e+01 : f32
    %102 = vector.broadcast %cst_44 : f32 to vector<1x8xf32>
    %103 = arith.mulf %102, %101 : vector<1x8xf32>
    %cst_45 = arith.constant 0.000000e+00 : f32
    %cst_46 = arith.constant 1.000000e+00 : f32
    %104 = vector.broadcast %cst_45 : f32 to vector<1x8xf32>
    %105 = arith.maximumf %104, %98 : vector<1x8xf32>
    %106 = vector.broadcast %cst_46 : f32 to vector<1x8xf32>
    %107 = arith.minimumf %106, %105 : vector<1x8xf32>
    %108 = arith.mulf %103, %107 : vector<1x8xf32>
    %109 = arith.mulf %108, %107 : vector<1x8xf32>
    %c0_47 = arith.constant 0 : index
    %c0_48 = arith.constant 0 : index
    %110 = vector.load %arg3[%c0_47, %c0_48] : memref<8x72xf32, #tpu.memory_space<vmem>>, vector<8x72xf32>
    %c0_49 = arith.constant 0 : index
    %c0_50 = arith.constant 0 : index
    %111 = vector.load %arg7[%c0_49, %c0_50] : memref<72x16xf32, #tpu.memory_space<vmem>>, vector<72x16xf32>
    %cst_51 = arith.constant dense<0.000000e+00> : vector<8x16xf32>
    %112 = tpu.matmul %110, %111, %cst_51 {dimension_numbers = #tpu.dot_dimension_numbers<[1], [0], [0], [1], [0, 0, 1, 1], [], []>} : vector<8x72xf32>, vector<72x16xf32>, vector<8x16xf32> -> vector<8x16xf32>
    %c0_52 = arith.constant 0 : index
    %c0_53 = arith.constant 0 : index
    %113 = vector.load %arg4[%c0_52, %c0_53] : memref<8x1xf32, #tpu.memory_space<vmem>>, vector<8x1xf32>
    %114 = vector.extract_strided_slice %112 {offsets = [0, 0], sizes = [8, 8], strides = [1, 1]} : vector<8x16xf32> to vector<8x8xf32>
    %115 = vector.broadcast %54 : vector<1x8xf32> to vector<8x8xf32>
    %116 = arith.mulf %114, %115 : vector<8x8xf32>
    %117 = vector.broadcast %113 : vector<8x1xf32> to vector<8x8xf32>
    %118 = vector.broadcast %52 : vector<1x8xf32> to vector<8x8xf32>
    %119 = arith.mulf %117, %118 : vector<8x8xf32>
    %120 = arith.addf %116, %119 : vector<8x8xf32>
    %cst_54 = arith.constant 0.000000e+00 : f32
    %121 = vector.broadcast %cst_54 : f32 to vector<8x8xf32>
    %122 = arith.maximumf %120, %121 : vector<8x8xf32>
    %123 = arith.truncf %122 : vector<8x8xf32> to vector<8x8xbf16>
    %c0_55 = arith.constant 0 : index
    %c0_56 = arith.constant 0 : index
    %c0_57 = arith.constant 0 : index
    %124 = vector.load %arg5[%c0_55, %c0_56, %c0_57] : memref<1x8x16xbf16, #tpu.memory_space<vmem>>, vector<1x8x8xbf16>
    %125 = vector.shape_cast %124 : vector<1x8x8xbf16> to vector<8x8xbf16>
    %126 = vector.shape_cast %123 : vector<8x8xbf16> to vector<1x8x8xbf16>
    tpu.vector_store %arg5[%c0_55, %c0_56, %c0_57], %126 {strides = array<i32>} : memref<1x8x16xbf16, #tpu.memory_space<vmem>>, vector<1x8x8xbf16>,
    %c0_58 = arith.constant 0 : index
    %c0_59 = arith.constant 0 : index
    %c0_60 = arith.constant 0 : index
    %127 = vector.load %arg6[%c0_58, %c0_59, %c0_60] : memref<1x1x16xf32, #tpu.memory_space<vmem>>, vector<1x1x8xf32>
    %128 = vector.shape_cast %127 : vector<1x1x8xf32> to vector<1x8xf32>
    %129 = vector.shape_cast %52 : vector<1x8xf32> to vector<1x1x8xf32>
    tpu.vector_store %arg6[%c0_58, %c0_59, %c0_60], %129 {strides = array<i32>} : memref<1x1x16xf32, #tpu.memory_space<vmem>>, vector<1x1x8xf32>,
    %130 = vector.extract_strided_slice %112 {offsets = [0, 8], sizes = [8, 8], strides = [1, 1]} : vector<8x16xf32> to vector<8x8xf32>
    %131 = vector.broadcast %109 : vector<1x8xf32> to vector<8x8xf32>
    %132 = arith.mulf %130, %131 : vector<8x8xf32>
    %133 = vector.broadcast %113 : vector<8x1xf32> to vector<8x8xf32>
    %134 = vector.broadcast %107 : vector<1x8xf32> to vector<8x8xf32>
    %135 = arith.mulf %133, %134 : vector<8x8xf32>
    %136 = arith.addf %132, %135 : vector<8x8xf32>
    %cst_61 = arith.constant 0.000000e+00 : f32
    %137 = vector.broadcast %cst_61 : f32 to vector<8x8xf32>
    %138 = arith.maximumf %136, %137 : vector<8x8xf32>
    %139 = arith.truncf %138 : vector<8x8xf32> to vector<8x8xbf16>
    %c0_62 = arith.constant 0 : index
    %c0_63 = arith.constant 0 : index
    %c8_64 = arith.constant 8 : index
    %140 = vector.load %arg5[%c0_62, %c0_63, %c8_64] : memref<1x8x16xbf16, #tpu.memory_space<vmem>>, vector<1x8x8xbf16>
    %141 = vector.shape_cast %140 : vector<1x8x8xbf16> to vector<8x8xbf16>
    %142 = vector.shape_cast %139 : vector<8x8xbf16> to vector<1x8x8xbf16>
    tpu.vector_store %arg5[%c0_62, %c0_63, %c8_64], %142 {strides = array<i32>} : memref<1x8x16xbf16, #tpu.memory_space<vmem>>, vector<1x8x8xbf16>,
    %c0_65 = arith.constant 0 : index
    %c0_66 = arith.constant 0 : index
    %c8_67 = arith.constant 8 : index
    %143 = vector.load %arg6[%c0_65, %c0_66, %c8_67] : memref<1x1x16xf32, #tpu.memory_space<vmem>>, vector<1x1x8xf32>
    %144 = vector.shape_cast %143 : vector<1x1x8xf32> to vector<1x8xf32>
    %145 = vector.shape_cast %107 : vector<1x8xf32> to vector<1x1x8xf32>
    tpu.vector_store %arg6[%c0_65, %c0_66, %c8_67], %145 {strides = array<i32>} : memref<1x1x16xf32, #tpu.memory_space<vmem>>, vector<1x1x8xf32>,
    return
  }
  func.func @transform_0(%arg0: i32) -> (i32, i32, i32) {
    %c0_i32 = arith.constant 0 : i32
    %c0_i32_0 = arith.constant 0 : i32
    %c0_i32_1 = arith.constant 0 : i32
    return %arg0, %c0_i32, %c0_i32_0 : i32, i32, i32
  }
  func.func @transform_1(%arg0: i32) -> (i32, i32, i32) {
    %c0_i32 = arith.constant 0 : i32
    %c0_i32_0 = arith.constant 0 : i32
    %c0_i32_1 = arith.constant 0 : i32
    return %arg0, %c0_i32, %c0_i32_0 : i32, i32, i32
  }
  func.func @transform_2(%arg0: i32) -> (i32, i32) {
    %c0_i32 = arith.constant 0 : i32
    %c0_i32_0 = arith.constant 0 : i32
    %c0_i32_1 = arith.constant 0 : i32
    return %c0_i32, %c0_i32_0 : i32, i32
  }
  func.func @transform_3(%arg0: i32) -> (i32, i32) {
    %c0_i32 = arith.constant 0 : i32
    %c0_i32_0 = arith.constant 0 : i32
    %c0_i32_1 = arith.constant 0 : i32
    return %c0_i32, %c0_i32_0 : i32, i32
  }
  func.func @transform_4(%arg0: i32) -> (i32, i32, i32) {
    %c0_i32 = arith.constant 0 : i32
    %c0_i32_0 = arith.constant 0 : i32
    %c0_i32_1 = arith.constant 0 : i32
    return %arg0, %c0_i32, %c0_i32_0 : i32, i32, i32
  }
  func.func @transform_5(%arg0: i32) -> (i32, i32, i32) {
    %c0_i32 = arith.constant 0 : i32
    %c0_i32_0 = arith.constant 0 : i32
    %c0_i32_1 = arith.constant 0 : i32
    return %arg0, %c0_i32, %c0_i32_0 : i32, i32, i32
  }
}

module attributes {stable_mosaic.version = 11 : i64} {
  func.func @_pconv_relu_kernel(%arg0: i32, %arg1: memref<2x8x12xbf16, #tpu.memory_space<vmem>>, %arg2: memref<2x1x12xf32, #tpu.memory_space<vmem>>, %arg3: memref<8x72xf32, #tpu.memory_space<vmem>>, %arg4: memref<8x1xf32, #tpu.memory_space<vmem>>, %arg5: memref<1x8x6xbf16, #tpu.memory_space<vmem>>, %arg6: memref<1x1x6xf32, #tpu.memory_space<vmem>>, %arg7: memref<72x6xf32, #tpu.memory_space<vmem>>) attributes {dimension_semantics = [#tpu.dimension_semantics<parallel>], iteration_bounds = array<i64: 1>, scalar_prefetch = 0 : i64, scratch_operands = 1 : i64, tpu.core_type = #tpu.core_type<tc>, window_params = [{transform_indices = @transform_0, window_bounds = array<i64: 2, 8, 12>}, {transform_indices = @transform_1, window_bounds = array<i64: 2, 1, 12>}, {pipeline_mode = #tpu.pipeline_mode<synchronous>, transform_indices = @transform_2, window_bounds = array<i64: 8, 72>}, {pipeline_mode = #tpu.pipeline_mode<synchronous>, transform_indices = @transform_3, window_bounds = array<i64: 8, 1>}, {transform_indices = @transform_4, window_bounds = array<i64: 1, 8, 6>}, {transform_indices = @transform_5, window_bounds = array<i64: 1, 1, 6>}]} {
    %c0 = arith.constant 0 : index
    %c0_0 = arith.constant 0 : index
    %c0_1 = arith.constant 0 : index
    %0 = vector.load %arg1[%c0, %c0_0, %c0_1] : memref<2x8x12xbf16, #tpu.memory_space<vmem>>, vector<1x8x12xbf16>
    %1 = vector.shape_cast %0 : vector<1x8x12xbf16> to vector<8x12xbf16>
    %2 = arith.extf %1 : vector<8x12xbf16> to vector<8x12xf32>
    %c0_2 = arith.constant 0 : index
    %c0_3 = arith.constant 0 : index
    %c0_4 = arith.constant 0 : index
    %3 = vector.load %arg2[%c0_2, %c0_3, %c0_4] : memref<2x1x12xf32, #tpu.memory_space<vmem>>, vector<1x1x12xf32>
    %4 = vector.shape_cast %3 : vector<1x1x12xf32> to vector<1x12xf32>
    %5 = vector.broadcast %4 : vector<1x12xf32> to vector<8x12xf32>
    %6 = arith.mulf %2, %5 : vector<8x12xf32>
    %7 = vector.extract_strided_slice %6 {offsets = [0, 0], sizes = [8, 3], strides = [1, 1]} : vector<8x12xf32> to vector<8x3xf32>
    %c0_5 = arith.constant 0 : index
    %c0_6 = arith.constant 0 : index
    %8 = vector.load %arg7[%c0_5, %c0_6] : memref<72x6xf32, #tpu.memory_space<vmem>>, vector<8x3xf32>
    tpu.vector_store %arg7[%c0_5, %c0_6], %7 {strides = array<i32>} : memref<72x6xf32, #tpu.memory_space<vmem>>, vector<8x3xf32>,
    %9 = vector.extract_strided_slice %6 {offsets = [0, 1], sizes = [8, 3], strides = [1, 1]} : vector<8x12xf32> to vector<8x3xf32>
    %c8 = arith.constant 8 : index
    %c0_7 = arith.constant 0 : index
    %10 = vector.load %arg7[%c8, %c0_7] : memref<72x6xf32, #tpu.memory_space<vmem>>, vector<8x3xf32>
    tpu.vector_store %arg7[%c8, %c0_7], %9 {strides = array<i32>} : memref<72x6xf32, #tpu.memory_space<vmem>>, vector<8x3xf32>,
    %11 = vector.extract_strided_slice %6 {offsets = [0, 2], sizes = [8, 3], strides = [1, 1]} : vector<8x12xf32> to vector<8x3xf32>
    %c16 = arith.constant 16 : index
    %c0_8 = arith.constant 0 : index
    %12 = vector.load %arg7[%c16, %c0_8] : memref<72x6xf32, #tpu.memory_space<vmem>>, vector<8x3xf32>
    tpu.vector_store %arg7[%c16, %c0_8], %11 {strides = array<i32>} : memref<72x6xf32, #tpu.memory_space<vmem>>, vector<8x3xf32>,
    %13 = vector.extract_strided_slice %6 {offsets = [0, 3], sizes = [8, 3], strides = [1, 1]} : vector<8x12xf32> to vector<8x3xf32>
    %c24 = arith.constant 24 : index
    %c0_9 = arith.constant 0 : index
    %14 = vector.load %arg7[%c24, %c0_9] : memref<72x6xf32, #tpu.memory_space<vmem>>, vector<8x3xf32>
    tpu.vector_store %arg7[%c24, %c0_9], %13 {strides = array<i32>} : memref<72x6xf32, #tpu.memory_space<vmem>>, vector<8x3xf32>,
    %15 = vector.extract_strided_slice %6 {offsets = [0, 4], sizes = [8, 3], strides = [1, 1]} : vector<8x12xf32> to vector<8x3xf32>
    %c32 = arith.constant 32 : index
    %c0_10 = arith.constant 0 : index
    %16 = vector.load %arg7[%c32, %c0_10] : memref<72x6xf32, #tpu.memory_space<vmem>>, vector<8x3xf32>
    tpu.vector_store %arg7[%c32, %c0_10], %15 {strides = array<i32>} : memref<72x6xf32, #tpu.memory_space<vmem>>, vector<8x3xf32>,
    %17 = vector.extract_strided_slice %6 {offsets = [0, 5], sizes = [8, 3], strides = [1, 1]} : vector<8x12xf32> to vector<8x3xf32>
    %c40 = arith.constant 40 : index
    %c0_11 = arith.constant 0 : index
    %18 = vector.load %arg7[%c40, %c0_11] : memref<72x6xf32, #tpu.memory_space<vmem>>, vector<8x3xf32>
    tpu.vector_store %arg7[%c40, %c0_11], %17 {strides = array<i32>} : memref<72x6xf32, #tpu.memory_space<vmem>>, vector<8x3xf32>,
    %19 = vector.extract_strided_slice %6 {offsets = [0, 6], sizes = [8, 3], strides = [1, 1]} : vector<8x12xf32> to vector<8x3xf32>
    %c48 = arith.constant 48 : index
    %c0_12 = arith.constant 0 : index
    %20 = vector.load %arg7[%c48, %c0_12] : memref<72x6xf32, #tpu.memory_space<vmem>>, vector<8x3xf32>
    tpu.vector_store %arg7[%c48, %c0_12], %19 {strides = array<i32>} : memref<72x6xf32, #tpu.memory_space<vmem>>, vector<8x3xf32>,
    %21 = vector.extract_strided_slice %6 {offsets = [0, 7], sizes = [8, 3], strides = [1, 1]} : vector<8x12xf32> to vector<8x3xf32>
    %c56 = arith.constant 56 : index
    %c0_13 = arith.constant 0 : index
    %22 = vector.load %arg7[%c56, %c0_13] : memref<72x6xf32, #tpu.memory_space<vmem>>, vector<8x3xf32>
    tpu.vector_store %arg7[%c56, %c0_13], %21 {strides = array<i32>} : memref<72x6xf32, #tpu.memory_space<vmem>>, vector<8x3xf32>,
    %23 = vector.extract_strided_slice %6 {offsets = [0, 8], sizes = [8, 3], strides = [1, 1]} : vector<8x12xf32> to vector<8x3xf32>
    %c64 = arith.constant 64 : index
    %c0_14 = arith.constant 0 : index
    %24 = vector.load %arg7[%c64, %c0_14] : memref<72x6xf32, #tpu.memory_space<vmem>>, vector<8x3xf32>
    tpu.vector_store %arg7[%c64, %c0_14], %23 {strides = array<i32>} : memref<72x6xf32, #tpu.memory_space<vmem>>, vector<8x3xf32>,
    %25 = vector.extract_strided_slice %4 {offsets = [0, 0], sizes = [1, 3], strides = [1, 1]} : vector<1x12xf32> to vector<1x3xf32>
    %26 = vector.extract_strided_slice %4 {offsets = [0, 1], sizes = [1, 3], strides = [1, 1]} : vector<1x12xf32> to vector<1x3xf32>
    %27 = arith.addf %25, %26 : vector<1x3xf32>
    %28 = vector.extract_strided_slice %4 {offsets = [0, 2], sizes = [1, 3], strides = [1, 1]} : vector<1x12xf32> to vector<1x3xf32>
    %29 = arith.addf %27, %28 : vector<1x3xf32>
    %30 = vector.extract_strided_slice %4 {offsets = [0, 3], sizes = [1, 3], strides = [1, 1]} : vector<1x12xf32> to vector<1x3xf32>
    %31 = arith.addf %29, %30 : vector<1x3xf32>
    %32 = vector.extract_strided_slice %4 {offsets = [0, 4], sizes = [1, 3], strides = [1, 1]} : vector<1x12xf32> to vector<1x3xf32>
    %33 = arith.addf %31, %32 : vector<1x3xf32>
    %34 = vector.extract_strided_slice %4 {offsets = [0, 5], sizes = [1, 3], strides = [1, 1]} : vector<1x12xf32> to vector<1x3xf32>
    %35 = arith.addf %33, %34 : vector<1x3xf32>
    %36 = vector.extract_strided_slice %4 {offsets = [0, 6], sizes = [1, 3], strides = [1, 1]} : vector<1x12xf32> to vector<1x3xf32>
    %37 = arith.addf %35, %36 : vector<1x3xf32>
    %38 = vector.extract_strided_slice %4 {offsets = [0, 7], sizes = [1, 3], strides = [1, 1]} : vector<1x12xf32> to vector<1x3xf32>
    %39 = arith.addf %37, %38 : vector<1x3xf32>
    %40 = vector.extract_strided_slice %4 {offsets = [0, 8], sizes = [1, 3], strides = [1, 1]} : vector<1x12xf32> to vector<1x3xf32>
    %41 = arith.addf %39, %40 : vector<1x3xf32>
    %cst = arith.constant 8.000000e+00 : f32
    %42 = vector.broadcast %cst : f32 to vector<1x3xf32>
    %43 = arith.mulf %41, %42 : vector<1x3xf32>
    %cst_15 = arith.constant 9.99999993E-9 : f32
    %44 = vector.broadcast %cst_15 : f32 to vector<1x3xf32>
    %45 = arith.addf %43, %44 : vector<1x3xf32>
    %46 = tpu.reciprocal %45 {approx = true} : vector<1x3xf32> -> vector<1x3xf32>
    %cst_16 = arith.constant 7.200000e+01 : f32
    %47 = vector.broadcast %cst_16 : f32 to vector<1x3xf32>
    %48 = arith.mulf %47, %46 : vector<1x3xf32>
    %cst_17 = arith.constant 0.000000e+00 : f32
    %cst_18 = arith.constant 1.000000e+00 : f32
    %49 = vector.broadcast %cst_17 : f32 to vector<1x3xf32>
    %50 = arith.maximumf %49, %43 : vector<1x3xf32>
    %51 = vector.broadcast %cst_18 : f32 to vector<1x3xf32>
    %52 = arith.minimumf %51, %50 : vector<1x3xf32>
    %53 = arith.mulf %48, %52 : vector<1x3xf32>
    %54 = arith.mulf %53, %52 : vector<1x3xf32>
    %c1 = arith.constant 1 : index
    %c0_19 = arith.constant 0 : index
    %c0_20 = arith.constant 0 : index
    %55 = vector.load %arg1[%c1, %c0_19, %c0_20] : memref<2x8x12xbf16, #tpu.memory_space<vmem>>, vector<1x8x12xbf16>
    %56 = vector.shape_cast %55 : vector<1x8x12xbf16> to vector<8x12xbf16>
    %57 = arith.extf %56 : vector<8x12xbf16> to vector<8x12xf32>
    %c1_21 = arith.constant 1 : index
    %c0_22 = arith.constant 0 : index
    %c0_23 = arith.constant 0 : index
    %58 = vector.load %arg2[%c1_21, %c0_22, %c0_23] : memref<2x1x12xf32, #tpu.memory_space<vmem>>, vector<1x1x12xf32>
    %59 = vector.shape_cast %58 : vector<1x1x12xf32> to vector<1x12xf32>
    %60 = vector.broadcast %59 : vector<1x12xf32> to vector<8x12xf32>
    %61 = arith.mulf %57, %60 : vector<8x12xf32>
    %62 = vector.extract_strided_slice %61 {offsets = [0, 0], sizes = [8, 3], strides = [1, 1]} : vector<8x12xf32> to vector<8x3xf32>
    %c0_24 = arith.constant 0 : index
    %c3 = arith.constant 3 : index
    %63 = vector.load %arg7[%c0_24, %c3] : memref<72x6xf32, #tpu.memory_space<vmem>>, vector<8x3xf32>
    tpu.vector_store %arg7[%c0_24, %c3], %62 {strides = array<i32>} : memref<72x6xf32, #tpu.memory_space<vmem>>, vector<8x3xf32>,
    %64 = vector.extract_strided_slice %61 {offsets = [0, 1], sizes = [8, 3], strides = [1, 1]} : vector<8x12xf32> to vector<8x3xf32>
    %c8_25 = arith.constant 8 : index
    %c3_26 = arith.constant 3 : index
    %65 = vector.load %arg7[%c8_25, %c3_26] : memref<72x6xf32, #tpu.memory_space<vmem>>, vector<8x3xf32>
    tpu.vector_store %arg7[%c8_25, %c3_26], %64 {strides = array<i32>} : memref<72x6xf32, #tpu.memory_space<vmem>>, vector<8x3xf32>,
    %66 = vector.extract_strided_slice %61 {offsets = [0, 2], sizes = [8, 3], strides = [1, 1]} : vector<8x12xf32> to vector<8x3xf32>
    %c16_27 = arith.constant 16 : index
    %c3_28 = arith.constant 3 : index
    %67 = vector.load %arg7[%c16_27, %c3_28] : memref<72x6xf32, #tpu.memory_space<vmem>>, vector<8x3xf32>
    tpu.vector_store %arg7[%c16_27, %c3_28], %66 {strides = array<i32>} : memref<72x6xf32, #tpu.memory_space<vmem>>, vector<8x3xf32>,
    %68 = vector.extract_strided_slice %61 {offsets = [0, 3], sizes = [8, 3], strides = [1, 1]} : vector<8x12xf32> to vector<8x3xf32>
    %c24_29 = arith.constant 24 : index
    %c3_30 = arith.constant 3 : index
    %69 = vector.load %arg7[%c24_29, %c3_30] : memref<72x6xf32, #tpu.memory_space<vmem>>, vector<8x3xf32>
    tpu.vector_store %arg7[%c24_29, %c3_30], %68 {strides = array<i32>} : memref<72x6xf32, #tpu.memory_space<vmem>>, vector<8x3xf32>,
    %70 = vector.extract_strided_slice %61 {offsets = [0, 4], sizes = [8, 3], strides = [1, 1]} : vector<8x12xf32> to vector<8x3xf32>
    %c32_31 = arith.constant 32 : index
    %c3_32 = arith.constant 3 : index
    %71 = vector.load %arg7[%c32_31, %c3_32] : memref<72x6xf32, #tpu.memory_space<vmem>>, vector<8x3xf32>
    tpu.vector_store %arg7[%c32_31, %c3_32], %70 {strides = array<i32>} : memref<72x6xf32, #tpu.memory_space<vmem>>, vector<8x3xf32>,
    %72 = vector.extract_strided_slice %61 {offsets = [0, 5], sizes = [8, 3], strides = [1, 1]} : vector<8x12xf32> to vector<8x3xf32>
    %c40_33 = arith.constant 40 : index
    %c3_34 = arith.constant 3 : index
    %73 = vector.load %arg7[%c40_33, %c3_34] : memref<72x6xf32, #tpu.memory_space<vmem>>, vector<8x3xf32>
    tpu.vector_store %arg7[%c40_33, %c3_34], %72 {strides = array<i32>} : memref<72x6xf32, #tpu.memory_space<vmem>>, vector<8x3xf32>,
    %74 = vector.extract_strided_slice %61 {offsets = [0, 6], sizes = [8, 3], strides = [1, 1]} : vector<8x12xf32> to vector<8x3xf32>
    %c48_35 = arith.constant 48 : index
    %c3_36 = arith.constant 3 : index
    %75 = vector.load %arg7[%c48_35, %c3_36] : memref<72x6xf32, #tpu.memory_space<vmem>>, vector<8x3xf32>
    tpu.vector_store %arg7[%c48_35, %c3_36], %74 {strides = array<i32>} : memref<72x6xf32, #tpu.memory_space<vmem>>, vector<8x3xf32>,
    %76 = vector.extract_strided_slice %61 {offsets = [0, 7], sizes = [8, 3], strides = [1, 1]} : vector<8x12xf32> to vector<8x3xf32>
    %c56_37 = arith.constant 56 : index
    %c3_38 = arith.constant 3 : index
    %77 = vector.load %arg7[%c56_37, %c3_38] : memref<72x6xf32, #tpu.memory_space<vmem>>, vector<8x3xf32>
    tpu.vector_store %arg7[%c56_37, %c3_38], %76 {strides = array<i32>} : memref<72x6xf32, #tpu.memory_space<vmem>>, vector<8x3xf32>,
    %78 = vector.extract_strided_slice %61 {offsets = [0, 8], sizes = [8, 3], strides = [1, 1]} : vector<8x12xf32> to vector<8x3xf32>
    %c64_39 = arith.constant 64 : index
    %c3_40 = arith.constant 3 : index
    %79 = vector.load %arg7[%c64_39, %c3_40] : memref<72x6xf32, #tpu.memory_space<vmem>>, vector<8x3xf32>
    tpu.vector_store %arg7[%c64_39, %c3_40], %78 {strides = array<i32>} : memref<72x6xf32, #tpu.memory_space<vmem>>, vector<8x3xf32>,
    %80 = vector.extract_strided_slice %59 {offsets = [0, 0], sizes = [1, 3], strides = [1, 1]} : vector<1x12xf32> to vector<1x3xf32>
    %81 = vector.extract_strided_slice %59 {offsets = [0, 1], sizes = [1, 3], strides = [1, 1]} : vector<1x12xf32> to vector<1x3xf32>
    %82 = arith.addf %80, %81 : vector<1x3xf32>
    %83 = vector.extract_strided_slice %59 {offsets = [0, 2], sizes = [1, 3], strides = [1, 1]} : vector<1x12xf32> to vector<1x3xf32>
    %84 = arith.addf %82, %83 : vector<1x3xf32>
    %85 = vector.extract_strided_slice %59 {offsets = [0, 3], sizes = [1, 3], strides = [1, 1]} : vector<1x12xf32> to vector<1x3xf32>
    %86 = arith.addf %84, %85 : vector<1x3xf32>
    %87 = vector.extract_strided_slice %59 {offsets = [0, 4], sizes = [1, 3], strides = [1, 1]} : vector<1x12xf32> to vector<1x3xf32>
    %88 = arith.addf %86, %87 : vector<1x3xf32>
    %89 = vector.extract_strided_slice %59 {offsets = [0, 5], sizes = [1, 3], strides = [1, 1]} : vector<1x12xf32> to vector<1x3xf32>
    %90 = arith.addf %88, %89 : vector<1x3xf32>
    %91 = vector.extract_strided_slice %59 {offsets = [0, 6], sizes = [1, 3], strides = [1, 1]} : vector<1x12xf32> to vector<1x3xf32>
    %92 = arith.addf %90, %91 : vector<1x3xf32>
    %93 = vector.extract_strided_slice %59 {offsets = [0, 7], sizes = [1, 3], strides = [1, 1]} : vector<1x12xf32> to vector<1x3xf32>
    %94 = arith.addf %92, %93 : vector<1x3xf32>
    %95 = vector.extract_strided_slice %59 {offsets = [0, 8], sizes = [1, 3], strides = [1, 1]} : vector<1x12xf32> to vector<1x3xf32>
    %96 = arith.addf %94, %95 : vector<1x3xf32>
    %cst_41 = arith.constant 8.000000e+00 : f32
    %97 = vector.broadcast %cst_41 : f32 to vector<1x3xf32>
    %98 = arith.mulf %96, %97 : vector<1x3xf32>
    %cst_42 = arith.constant 9.99999993E-9 : f32
    %99 = vector.broadcast %cst_42 : f32 to vector<1x3xf32>
    %100 = arith.addf %98, %99 : vector<1x3xf32>
    %101 = tpu.reciprocal %100 {approx = true} : vector<1x3xf32> -> vector<1x3xf32>
    %cst_43 = arith.constant 7.200000e+01 : f32
    %102 = vector.broadcast %cst_43 : f32 to vector<1x3xf32>
    %103 = arith.mulf %102, %101 : vector<1x3xf32>
    %cst_44 = arith.constant 0.000000e+00 : f32
    %cst_45 = arith.constant 1.000000e+00 : f32
    %104 = vector.broadcast %cst_44 : f32 to vector<1x3xf32>
    %105 = arith.maximumf %104, %98 : vector<1x3xf32>
    %106 = vector.broadcast %cst_45 : f32 to vector<1x3xf32>
    %107 = arith.minimumf %106, %105 : vector<1x3xf32>
    %108 = arith.mulf %103, %107 : vector<1x3xf32>
    %109 = arith.mulf %108, %107 : vector<1x3xf32>
    %c0_46 = arith.constant 0 : index
    %c0_47 = arith.constant 0 : index
    %110 = vector.load %arg3[%c0_46, %c0_47] : memref<8x72xf32, #tpu.memory_space<vmem>>, vector<8x72xf32>
    %c0_48 = arith.constant 0 : index
    %c0_49 = arith.constant 0 : index
    %111 = vector.load %arg7[%c0_48, %c0_49] : memref<72x6xf32, #tpu.memory_space<vmem>>, vector<72x6xf32>
    %cst_50 = arith.constant dense<0.000000e+00> : vector<8x6xf32>
    %112 = tpu.matmul %110, %111, %cst_50 {dimension_numbers = #tpu.dot_dimension_numbers<[1], [0], [0], [1], [0, 0, 1, 1], [], []>} : vector<8x72xf32>, vector<72x6xf32>, vector<8x6xf32> -> vector<8x6xf32>
    %c0_51 = arith.constant 0 : index
    %c0_52 = arith.constant 0 : index
    %113 = vector.load %arg4[%c0_51, %c0_52] : memref<8x1xf32, #tpu.memory_space<vmem>>, vector<8x1xf32>
    %114 = vector.extract_strided_slice %112 {offsets = [0, 0], sizes = [8, 3], strides = [1, 1]} : vector<8x6xf32> to vector<8x3xf32>
    %115 = vector.broadcast %54 : vector<1x3xf32> to vector<8x3xf32>
    %116 = arith.mulf %114, %115 : vector<8x3xf32>
    %117 = vector.broadcast %113 : vector<8x1xf32> to vector<8x3xf32>
    %118 = vector.broadcast %52 : vector<1x3xf32> to vector<8x3xf32>
    %119 = arith.mulf %117, %118 : vector<8x3xf32>
    %120 = arith.addf %116, %119 : vector<8x3xf32>
    %cst_53 = arith.constant 0.000000e+00 : f32
    %121 = vector.broadcast %cst_53 : f32 to vector<8x3xf32>
    %122 = arith.maximumf %120, %121 : vector<8x3xf32>
    %123 = arith.truncf %122 : vector<8x3xf32> to vector<8x3xbf16>
    %c0_54 = arith.constant 0 : index
    %c0_55 = arith.constant 0 : index
    %c0_56 = arith.constant 0 : index
    %124 = vector.load %arg5[%c0_54, %c0_55, %c0_56] : memref<1x8x6xbf16, #tpu.memory_space<vmem>>, vector<1x8x3xbf16>
    %125 = vector.shape_cast %124 : vector<1x8x3xbf16> to vector<8x3xbf16>
    %126 = vector.shape_cast %123 : vector<8x3xbf16> to vector<1x8x3xbf16>
    tpu.vector_store %arg5[%c0_54, %c0_55, %c0_56], %126 {strides = array<i32>} : memref<1x8x6xbf16, #tpu.memory_space<vmem>>, vector<1x8x3xbf16>,
    %c0_57 = arith.constant 0 : index
    %c0_58 = arith.constant 0 : index
    %c0_59 = arith.constant 0 : index
    %127 = vector.load %arg6[%c0_57, %c0_58, %c0_59] : memref<1x1x6xf32, #tpu.memory_space<vmem>>, vector<1x1x3xf32>
    %128 = vector.shape_cast %127 : vector<1x1x3xf32> to vector<1x3xf32>
    %129 = vector.shape_cast %52 : vector<1x3xf32> to vector<1x1x3xf32>
    tpu.vector_store %arg6[%c0_57, %c0_58, %c0_59], %129 {strides = array<i32>} : memref<1x1x6xf32, #tpu.memory_space<vmem>>, vector<1x1x3xf32>,
    %130 = vector.extract_strided_slice %112 {offsets = [0, 3], sizes = [8, 3], strides = [1, 1]} : vector<8x6xf32> to vector<8x3xf32>
    %131 = vector.broadcast %109 : vector<1x3xf32> to vector<8x3xf32>
    %132 = arith.mulf %130, %131 : vector<8x3xf32>
    %133 = vector.broadcast %113 : vector<8x1xf32> to vector<8x3xf32>
    %134 = vector.broadcast %107 : vector<1x3xf32> to vector<8x3xf32>
    %135 = arith.mulf %133, %134 : vector<8x3xf32>
    %136 = arith.addf %132, %135 : vector<8x3xf32>
    %cst_60 = arith.constant 0.000000e+00 : f32
    %137 = vector.broadcast %cst_60 : f32 to vector<8x3xf32>
    %138 = arith.maximumf %136, %137 : vector<8x3xf32>
    %139 = arith.truncf %138 : vector<8x3xf32> to vector<8x3xbf16>
    %c0_61 = arith.constant 0 : index
    %c0_62 = arith.constant 0 : index
    %c3_63 = arith.constant 3 : index
    %140 = vector.load %arg5[%c0_61, %c0_62, %c3_63] : memref<1x8x6xbf16, #tpu.memory_space<vmem>>, vector<1x8x3xbf16>
    %141 = vector.shape_cast %140 : vector<1x8x3xbf16> to vector<8x3xbf16>
    %142 = vector.shape_cast %139 : vector<8x3xbf16> to vector<1x8x3xbf16>
    tpu.vector_store %arg5[%c0_61, %c0_62, %c3_63], %142 {strides = array<i32>} : memref<1x8x6xbf16, #tpu.memory_space<vmem>>, vector<1x8x3xbf16>,
    %c0_64 = arith.constant 0 : index
    %c0_65 = arith.constant 0 : index
    %c3_66 = arith.constant 3 : index
    %143 = vector.load %arg6[%c0_64, %c0_65, %c3_66] : memref<1x1x6xf32, #tpu.memory_space<vmem>>, vector<1x1x3xf32>
    %144 = vector.shape_cast %143 : vector<1x1x3xf32> to vector<1x3xf32>
    %145 = vector.shape_cast %107 : vector<1x3xf32> to vector<1x1x3xf32>
    tpu.vector_store %arg6[%c0_64, %c0_65, %c3_66], %145 {strides = array<i32>} : memref<1x1x6xf32, #tpu.memory_space<vmem>>, vector<1x1x3xf32>,
    return
  }
  func.func @transform_0(%arg0: i32) -> (i32, i32, i32) {
    %c0_i32 = arith.constant 0 : i32
    %c0_i32_0 = arith.constant 0 : i32
    %c0_i32_1 = arith.constant 0 : i32
    return %arg0, %c0_i32, %c0_i32_0 : i32, i32, i32
  }
  func.func @transform_1(%arg0: i32) -> (i32, i32, i32) {
    %c0_i32 = arith.constant 0 : i32
    %c0_i32_0 = arith.constant 0 : i32
    %c0_i32_1 = arith.constant 0 : i32
    return %arg0, %c0_i32, %c0_i32_0 : i32, i32, i32
  }
  func.func @transform_2(%arg0: i32) -> (i32, i32) {
    %c0_i32 = arith.constant 0 : i32
    %c0_i32_0 = arith.constant 0 : i32
    %c0_i32_1 = arith.constant 0 : i32
    return %c0_i32, %c0_i32_0 : i32, i32
  }
  func.func @transform_3(%arg0: i32) -> (i32, i32) {
    %c0_i32 = arith.constant 0 : i32
    %c0_i32_0 = arith.constant 0 : i32
    %c0_i32_1 = arith.constant 0 : i32
    return %c0_i32, %c0_i32_0 : i32, i32
  }
  func.func @transform_4(%arg0: i32) -> (i32, i32, i32) {
    %c0_i32 = arith.constant 0 : i32
    %c0_i32_0 = arith.constant 0 : i32
    %c0_i32_1 = arith.constant 0 : i32
    return %arg0, %c0_i32, %c0_i32_0 : i32, i32, i32
  }
  func.func @transform_5(%arg0: i32) -> (i32, i32, i32) {
    %c0_i32 = arith.constant 0 : i32
    %c0_i32_0 = arith.constant 0 : i32
    %c0_i32_1 = arith.constant 0 : i32
    return %arg0, %c0_i32, %c0_i32_0 : i32, i32, i32
  }
}

module attributes {stable_mosaic.version = 11 : i64} {
  func.func @_pconv_relu_kernel(%arg0: i32, %arg1: memref<1x8x342xbf16, #tpu.memory_space<vmem>>, %arg2: memref<1x1x342xf32, #tpu.memory_space<vmem>>, %arg3: memref<4x72xf32, #tpu.memory_space<vmem>>, %arg4: memref<4x1xf32, #tpu.memory_space<vmem>>, %arg5: memref<1x4x288xbf16, #tpu.memory_space<vmem>>, %arg6: memref<1x1x288xf32, #tpu.memory_space<vmem>>, %arg7: memref<72x288xf32, #tpu.memory_space<vmem>>) attributes {dimension_semantics = [#tpu.dimension_semantics<parallel>], iteration_bounds = array<i64: 2>, scalar_prefetch = 0 : i64, scratch_operands = 1 : i64, tpu.core_type = #tpu.core_type<tc>, window_params = [{transform_indices = @transform_0, window_bounds = array<i64: 1, 8, 342>}, {transform_indices = @transform_1, window_bounds = array<i64: 1, 1, 342>}, {pipeline_mode = #tpu.pipeline_mode<synchronous>, transform_indices = @transform_2, window_bounds = array<i64: 4, 72>}, {pipeline_mode = #tpu.pipeline_mode<synchronous>, transform_indices = @transform_3, window_bounds = array<i64: 4, 1>}, {transform_indices = @transform_4, window_bounds = array<i64: 1, 4, 288>}, {transform_indices = @transform_5, window_bounds = array<i64: 1, 1, 288>}]} {
    %c0 = arith.constant 0 : index
    %c0_0 = arith.constant 0 : index
    %c0_1 = arith.constant 0 : index
    %0 = vector.load %arg1[%c0, %c0_0, %c0_1] : memref<1x8x342xbf16, #tpu.memory_space<vmem>>, vector<1x8x342xbf16>
    %1 = vector.shape_cast %0 : vector<1x8x342xbf16> to vector<8x342xbf16>
    %2 = arith.extf %1 : vector<8x342xbf16> to vector<8x342xf32>
    %c0_2 = arith.constant 0 : index
    %c0_3 = arith.constant 0 : index
    %c0_4 = arith.constant 0 : index
    %3 = vector.load %arg2[%c0_2, %c0_3, %c0_4] : memref<1x1x342xf32, #tpu.memory_space<vmem>>, vector<1x1x342xf32>
    %4 = vector.shape_cast %3 : vector<1x1x342xf32> to vector<1x342xf32>
    %5 = vector.broadcast %4 : vector<1x342xf32> to vector<8x342xf32>
    %6 = arith.mulf %2, %5 : vector<8x342xf32>
    %7 = vector.extract_strided_slice %6 {offsets = [0, 0], sizes = [8, 288], strides = [1, 1]} : vector<8x342xf32> to vector<8x288xf32>
    %c0_5 = arith.constant 0 : index
    %c0_6 = arith.constant 0 : index
    %8 = vector.load %arg7[%c0_5, %c0_6] : memref<72x288xf32, #tpu.memory_space<vmem>>, vector<8x288xf32>
    tpu.vector_store %arg7[%c0_5, %c0_6], %7 {strides = array<i32>} : memref<72x288xf32, #tpu.memory_space<vmem>>, vector<8x288xf32>,
    %9 = vector.extract_strided_slice %6 {offsets = [0, 1], sizes = [8, 288], strides = [1, 1]} : vector<8x342xf32> to vector<8x288xf32>
    %c8 = arith.constant 8 : index
    %c0_7 = arith.constant 0 : index
    %10 = vector.load %arg7[%c8, %c0_7] : memref<72x288xf32, #tpu.memory_space<vmem>>, vector<8x288xf32>
    tpu.vector_store %arg7[%c8, %c0_7], %9 {strides = array<i32>} : memref<72x288xf32, #tpu.memory_space<vmem>>, vector<8x288xf32>,
    %11 = vector.extract_strided_slice %6 {offsets = [0, 2], sizes = [8, 288], strides = [1, 1]} : vector<8x342xf32> to vector<8x288xf32>
    %c16 = arith.constant 16 : index
    %c0_8 = arith.constant 0 : index
    %12 = vector.load %arg7[%c16, %c0_8] : memref<72x288xf32, #tpu.memory_space<vmem>>, vector<8x288xf32>
    tpu.vector_store %arg7[%c16, %c0_8], %11 {strides = array<i32>} : memref<72x288xf32, #tpu.memory_space<vmem>>, vector<8x288xf32>,
    %13 = vector.extract_strided_slice %6 {offsets = [0, 18], sizes = [8, 288], strides = [1, 1]} : vector<8x342xf32> to vector<8x288xf32>
    %c24 = arith.constant 24 : index
    %c0_9 = arith.constant 0 : index
    %14 = vector.load %arg7[%c24, %c0_9] : memref<72x288xf32, #tpu.memory_space<vmem>>, vector<8x288xf32>
    tpu.vector_store %arg7[%c24, %c0_9], %13 {strides = array<i32>} : memref<72x288xf32, #tpu.memory_space<vmem>>, vector<8x288xf32>,
    %15 = vector.extract_strided_slice %6 {offsets = [0, 19], sizes = [8, 288], strides = [1, 1]} : vector<8x342xf32> to vector<8x288xf32>
    %c32 = arith.constant 32 : index
    %c0_10 = arith.constant 0 : index
    %16 = vector.load %arg7[%c32, %c0_10] : memref<72x288xf32, #tpu.memory_space<vmem>>, vector<8x288xf32>
    tpu.vector_store %arg7[%c32, %c0_10], %15 {strides = array<i32>} : memref<72x288xf32, #tpu.memory_space<vmem>>, vector<8x288xf32>,
    %17 = vector.extract_strided_slice %6 {offsets = [0, 20], sizes = [8, 288], strides = [1, 1]} : vector<8x342xf32> to vector<8x288xf32>
    %c40 = arith.constant 40 : index
    %c0_11 = arith.constant 0 : index
    %18 = vector.load %arg7[%c40, %c0_11] : memref<72x288xf32, #tpu.memory_space<vmem>>, vector<8x288xf32>
    tpu.vector_store %arg7[%c40, %c0_11], %17 {strides = array<i32>} : memref<72x288xf32, #tpu.memory_space<vmem>>, vector<8x288xf32>,
    %19 = vector.extract_strided_slice %6 {offsets = [0, 36], sizes = [8, 288], strides = [1, 1]} : vector<8x342xf32> to vector<8x288xf32>
    %c48 = arith.constant 48 : index
    %c0_12 = arith.constant 0 : index
    %20 = vector.load %arg7[%c48, %c0_12] : memref<72x288xf32, #tpu.memory_space<vmem>>, vector<8x288xf32>
    tpu.vector_store %arg7[%c48, %c0_12], %19 {strides = array<i32>} : memref<72x288xf32, #tpu.memory_space<vmem>>, vector<8x288xf32>,
    %21 = vector.extract_strided_slice %6 {offsets = [0, 37], sizes = [8, 288], strides = [1, 1]} : vector<8x342xf32> to vector<8x288xf32>
    %c56 = arith.constant 56 : index
    %c0_13 = arith.constant 0 : index
    %22 = vector.load %arg7[%c56, %c0_13] : memref<72x288xf32, #tpu.memory_space<vmem>>, vector<8x288xf32>
    tpu.vector_store %arg7[%c56, %c0_13], %21 {strides = array<i32>} : memref<72x288xf32, #tpu.memory_space<vmem>>, vector<8x288xf32>,
    %23 = vector.extract_strided_slice %6 {offsets = [0, 38], sizes = [8, 288], strides = [1, 1]} : vector<8x342xf32> to vector<8x288xf32>
    %c64 = arith.constant 64 : index
    %c0_14 = arith.constant 0 : index
    %24 = vector.load %arg7[%c64, %c0_14] : memref<72x288xf32, #tpu.memory_space<vmem>>, vector<8x288xf32>
    tpu.vector_store %arg7[%c64, %c0_14], %23 {strides = array<i32>} : memref<72x288xf32, #tpu.memory_space<vmem>>, vector<8x288xf32>,
    %25 = vector.extract_strided_slice %4 {offsets = [0, 0], sizes = [1, 288], strides = [1, 1]} : vector<1x342xf32> to vector<1x288xf32>
    %26 = vector.extract_strided_slice %4 {offsets = [0, 1], sizes = [1, 288], strides = [1, 1]} : vector<1x342xf32> to vector<1x288xf32>
    %27 = arith.addf %25, %26 : vector<1x288xf32>
    %28 = vector.extract_strided_slice %4 {offsets = [0, 2], sizes = [1, 288], strides = [1, 1]} : vector<1x342xf32> to vector<1x288xf32>
    %29 = arith.addf %27, %28 : vector<1x288xf32>
    %30 = vector.extract_strided_slice %4 {offsets = [0, 18], sizes = [1, 288], strides = [1, 1]} : vector<1x342xf32> to vector<1x288xf32>
    %31 = arith.addf %29, %30 : vector<1x288xf32>
    %32 = vector.extract_strided_slice %4 {offsets = [0, 19], sizes = [1, 288], strides = [1, 1]} : vector<1x342xf32> to vector<1x288xf32>
    %33 = arith.addf %31, %32 : vector<1x288xf32>
    %34 = vector.extract_strided_slice %4 {offsets = [0, 20], sizes = [1, 288], strides = [1, 1]} : vector<1x342xf32> to vector<1x288xf32>
    %35 = arith.addf %33, %34 : vector<1x288xf32>
    %36 = vector.extract_strided_slice %4 {offsets = [0, 36], sizes = [1, 288], strides = [1, 1]} : vector<1x342xf32> to vector<1x288xf32>
    %37 = arith.addf %35, %36 : vector<1x288xf32>
    %38 = vector.extract_strided_slice %4 {offsets = [0, 37], sizes = [1, 288], strides = [1, 1]} : vector<1x342xf32> to vector<1x288xf32>
    %39 = arith.addf %37, %38 : vector<1x288xf32>
    %40 = vector.extract_strided_slice %4 {offsets = [0, 38], sizes = [1, 288], strides = [1, 1]} : vector<1x342xf32> to vector<1x288xf32>
    %41 = arith.addf %39, %40 : vector<1x288xf32>
    %cst = arith.constant 8.000000e+00 : f32
    %42 = vector.broadcast %cst : f32 to vector<1x288xf32>
    %43 = arith.mulf %41, %42 : vector<1x288xf32>
    %cst_15 = arith.constant 9.99999993E-9 : f32
    %44 = vector.broadcast %cst_15 : f32 to vector<1x288xf32>
    %45 = arith.addf %43, %44 : vector<1x288xf32>
    %46 = tpu.reciprocal %45 {approx = true} : vector<1x288xf32> -> vector<1x288xf32>
    %cst_16 = arith.constant 7.200000e+01 : f32
    %47 = vector.broadcast %cst_16 : f32 to vector<1x288xf32>
    %48 = arith.mulf %47, %46 : vector<1x288xf32>
    %cst_17 = arith.constant 0.000000e+00 : f32
    %cst_18 = arith.constant 1.000000e+00 : f32
    %49 = vector.broadcast %cst_17 : f32 to vector<1x288xf32>
    %50 = arith.maximumf %49, %43 : vector<1x288xf32>
    %51 = vector.broadcast %cst_18 : f32 to vector<1x288xf32>
    %52 = arith.minimumf %51, %50 : vector<1x288xf32>
    %53 = arith.mulf %48, %52 : vector<1x288xf32>
    %54 = arith.mulf %53, %52 : vector<1x288xf32>
    %c0_19 = arith.constant 0 : index
    %c0_20 = arith.constant 0 : index
    %55 = vector.load %arg3[%c0_19, %c0_20] : memref<4x72xf32, #tpu.memory_space<vmem>>, vector<4x72xf32>
    %c0_21 = arith.constant 0 : index
    %c0_22 = arith.constant 0 : index
    %56 = vector.load %arg7[%c0_21, %c0_22] : memref<72x288xf32, #tpu.memory_space<vmem>>, vector<72x288xf32>
    %cst_23 = arith.constant dense<0.000000e+00> : vector<4x288xf32>
    %57 = tpu.matmul %55, %56, %cst_23 {dimension_numbers = #tpu.dot_dimension_numbers<[1], [0], [0], [1], [0, 0, 1, 1], [], []>} : vector<4x72xf32>, vector<72x288xf32>, vector<4x288xf32> -> vector<4x288xf32>
    %c0_24 = arith.constant 0 : index
    %c0_25 = arith.constant 0 : index
    %58 = vector.load %arg4[%c0_24, %c0_25] : memref<4x1xf32, #tpu.memory_space<vmem>>, vector<4x1xf32>
    %59 = vector.broadcast %54 : vector<1x288xf32> to vector<4x288xf32>
    %60 = arith.mulf %57, %59 : vector<4x288xf32>
    %61 = vector.broadcast %58 : vector<4x1xf32> to vector<4x288xf32>
    %62 = vector.broadcast %52 : vector<1x288xf32> to vector<4x288xf32>
    %63 = arith.mulf %61, %62 : vector<4x288xf32>
    %64 = arith.addf %60, %63 : vector<4x288xf32>
    %cst_26 = arith.constant 0.000000e+00 : f32
    %65 = vector.broadcast %cst_26 : f32 to vector<4x288xf32>
    %66 = arith.maximumf %64, %65 : vector<4x288xf32>
    %67 = arith.truncf %66 : vector<4x288xf32> to vector<4x288xbf16>
    %c0_27 = arith.constant 0 : index
    %c0_28 = arith.constant 0 : index
    %c0_29 = arith.constant 0 : index
    %68 = vector.load %arg5[%c0_27, %c0_28, %c0_29] : memref<1x4x288xbf16, #tpu.memory_space<vmem>>, vector<1x4x288xbf16>
    %69 = vector.shape_cast %68 : vector<1x4x288xbf16> to vector<4x288xbf16>
    %70 = vector.shape_cast %67 : vector<4x288xbf16> to vector<1x4x288xbf16>
    tpu.vector_store %arg5[%c0_27, %c0_28, %c0_29], %70 {strides = array<i32>} : memref<1x4x288xbf16, #tpu.memory_space<vmem>>, vector<1x4x288xbf16>,
    %c0_30 = arith.constant 0 : index
    %c0_31 = arith.constant 0 : index
    %c0_32 = arith.constant 0 : index
    %71 = vector.load %arg6[%c0_30, %c0_31, %c0_32] : memref<1x1x288xf32, #tpu.memory_space<vmem>>, vector<1x1x288xf32>
    %72 = vector.shape_cast %71 : vector<1x1x288xf32> to vector<1x288xf32>
    %73 = vector.shape_cast %52 : vector<1x288xf32> to vector<1x1x288xf32>
    tpu.vector_store %arg6[%c0_30, %c0_31, %c0_32], %73 {strides = array<i32>} : memref<1x1x288xf32, #tpu.memory_space<vmem>>, vector<1x1x288xf32>,
    return
  }
  func.func @transform_0(%arg0: i32) -> (i32, i32, i32) {
    %c0_i32 = arith.constant 0 : i32
    %c0_i32_0 = arith.constant 0 : i32
    %c0_i32_1 = arith.constant 0 : i32
    return %arg0, %c0_i32, %c0_i32_0 : i32, i32, i32
  }
  func.func @transform_1(%arg0: i32) -> (i32, i32, i32) {
    %c0_i32 = arith.constant 0 : i32
    %c0_i32_0 = arith.constant 0 : i32
    %c0_i32_1 = arith.constant 0 : i32
    return %arg0, %c0_i32, %c0_i32_0 : i32, i32, i32
  }
  func.func @transform_2(%arg0: i32) -> (i32, i32) {
    %c0_i32 = arith.constant 0 : i32
    %c0_i32_0 = arith.constant 0 : i32
    %c0_i32_1 = arith.constant 0 : i32
    return %c0_i32, %c0_i32_0 : i32, i32
  }
  func.func @transform_3(%arg0: i32) -> (i32, i32) {
    %c0_i32 = arith.constant 0 : i32
    %c0_i32_0 = arith.constant 0 : i32
    %c0_i32_1 = arith.constant 0 : i32
    return %c0_i32, %c0_i32_0 : i32, i32
  }
  func.func @transform_4(%arg0: i32) -> (i32, i32, i32) {
    %c0_i32 = arith.constant 0 : i32
    %c0_i32_0 = arith.constant 0 : i32
    %c0_i32_1 = arith.constant 0 : i32
    return %arg0, %c0_i32, %c0_i32_0 : i32, i32, i32
  }
  func.func @transform_5(%arg0: i32) -> (i32, i32, i32) {
    %c0_i32 = arith.constant 0 : i32
    %c0_i32_0 = arith.constant 0 : i32
    %c0_i32_1 = arith.constant 0 : i32
    return %arg0, %c0_i32, %c0_i32_0 : i32, i32, i32
  }
}

</mosaic_0001>

<bundles_post_ra>
// kernel: dincae_pconvs_forward.10
= control target key start
LH: loop header
LB: loop body
LE: loop exit
PB: predicated region body
PF: predicated region fallthrough
CT: control target
= control target key end

     0   :  { %s1032_s18 = smov 0   ;;  %s1195_s0 = inlined_call_operand.vmem [shape: bf16[2,4,342], index: 0, kind: input, shape index: {}]   ;;  %s1196_s1 = inlined_call_operand.vmem [shape: bf16[2,4,342], index: 1, kind: input, shape index: {}]   ;;  %s1197_s2 = inlined_call_operand.vmem [shape: f32[8,36], index: 2, kind: input, shape index: {}]   ;;  %s1198_s3 = inlined_call_operand.vmem [shape: f32[8,1], index: 3, kind: input, shape index: {}]   ;;  %s1199_s4 = inlined_call_operand.vmem [shape: bf16[2,8,288], index: 4, kind: output, shape index: {0}]   ;;  %s1200_s5 = inlined_call_operand.vmem [shape: f32[2,1,288], index: 5, kind: output, shape index: {1}]  }
   0x1 LB: > { %s914_s19 = sadd.s32 4294967295, %s988_s18   ;;  %p918_p0 = scmp.ge.s32.totalorder %s988_s18, 1  ;;  %s988_s18 = sphi %s1032_s18, %s16_s18  }
   0x2   : > { %p200_p1 = scmp.lt.s32.totalorder %s988_s18, 3 }
   0x4   : > { %p201_p2 = pnand %p918_p0, %p200_p1 }
   0x5   : > { %p237_p3 = scmp.lt.s32.totalorder (!%p201_p2), %s914_s19, 1  ;;  %s991_s27 = smov (!%p201_p2), 90  }
   0x6   : > { %204 = sbr.rel (%p201_p2) target bundleno = 395 (0x18b), region = 36  ;;  %s992_s28 = smov (!%p201_p2), 92  }
   0x7   : > { %s993_s29 = smov (!%p201_p2), 91   ;;  %s994_s30 = smov (!%p201_p2), 109  }
   0x8   : > { %s995_s6 = smov (!%p201_p2), 108   ;;  %s996_s7 = smov (!%p201_p2), 126  }
   0x9   : > { %s997_s8 = smov (!%p201_p2), 110   ;;  %s999_s9 = smov (!%p201_p2), 127  }
   0xb   : > { %s1202_s19 = smov (!%p237_p3, %s914_s19), 1  ;;  %v990_v0 = vmov 0.0   ;;  %vm270_vm0 = vcmask 257024   ;;  %vm398_vm1 = vcmask 1043456   ;;  %vm413_vm2 = vcmask 699392   ;;  %v727_v35 = vld [vmem:[%s1198_s3] sm:$0xff] }
   0xc   : > { %s952_s20 = smul.u32 6, %s1202_s19  ;;  %939 = vmatprep.subr.mxu1 %v990_v0  ;;  %650 = vmatprep.mubr.f32.mxu0 %v990_v0  ;;  %vm998_vm3 = vmmov 0   ;;  %v1000_v30 = vmov 0   ;;  %vm386_vm4 = vcmask 736256   ;;  %vm356_vm5 = vcmask 752640  }
   0xd   : > { %949 = vmatprep.mubr.msk.f32.mxu1 %vm998_vm3, %v990_v0  ;;  %975 = vset.pattern.permute.xlu0 %v1000_v30  ;;  %vm288_vm6 = vcmask 261124   ;;  %vm371_vm7 = vcmask 744448   ;;  %vm326_vm8 = vcmask 891904   ;;  %vm341_vm9 = vcmask 883712   ;;  %s954_s14 = smul.u32 3, %s1202_s19 }
   0xe   : > { %s241_s23 = scalar_lea.vmem %s1195_s0, %s952_s20  ;;  %s246_s26 = scalar_lea.vmem %s1196_s1, %s952_s20  ;;  %vm296_vm10 = vcmask 1031168   ;;  %vm311_vm11 = vcmask 900096   ;;  %vm280_vm12 = vcmask 1039360   ;;  %vm573_vm13 = vcmask 293888  }
   0xf   : > { %v256_v1 = vld [vmem:[%s241_s23] sm:$0x3f]  ;;  %s255_s17 = scalar_lea.vmem %s1200_s5, %s954_s14  ;;  %s953_s20 = smul.u32 12, %s1202_s19 }
  0x10   : > { %v259_v2 = vld [vmem:[%s246_s26] sm:$0x3f]  ;;  %v258_v3 = vunpack.c.h.bf16 %v256_v1  ;;  %v257_v6 = vunpack.c.l.bf16 %v256_v1 }
  0x11   : > { %v260_v4 = vunpack.c.l.bf16 %v259_v2  ;;  %v261_v5 = vunpack.c.h.bf16 %v259_v2  ;;  %s251_s23 = scalar_lea.vmem %s1199_s4, %s953_s20 }
  0x13   : > { %v263_v7 = vmul.f32 %v261_v5, %v258_v3  ;;  %v262_v8 = vmul.f32 %v260_v4, %v257_v6  ;;  %v396_v12 = vcombine.high %v260_v4, %v260_v4  ;;  %v399_v13 = vsel %vm398_vm1, %v260_v4, 0.0 }
  0x14   : > { %v400_v15 = vrot.slane %v399_v13, 4  ;;  %v414_v17 = vsel %vm413_vm2, %v261_v5, 0.0 }
  0x15   : > { %384 = vrot.lane.b32.xlu0 %v263_v7, %s991_s27  ;;  %268 = vst [vmem:[#allocation2] sm:$0xf] %v262_v8  ;;  %380 = vrot.lane.b32.xlu1 %v262_v8, %s991_s27  ;;  %v266_v9 = vcombine.high %v262_v8, %v262_v8  ;;  %271 = vst.msk [vmem:[#allocation2 + $0x10] sm:$0xf] %vm270_vm0, %v263_v7  ;;  %v273_v10 = vcombine.low %v263_v7, %v263_v7  ;;  %v406_v14 = vsel %vm398_vm1, %v396_v12, 0.0 }
  0x16   : > { %v272_v11 = vcombine.low %v262_v8, %v262_v8  ;;  %v407_v16 = vrot.slane %v406_v14, 4  ;;  %v415_v18 = vrot.slane %v414_v17, 4  ;;  %v401_v19 = vadd.f32 %v400_v15, %v399_v13 }
  0x17   : > { %269 = vst [vmem:[#allocation2 + $0x8] sm:$0xf] %v266_v9 }
  0x18   : > { %v408_v20 = vadd.f32 %v407_v16, %v406_v14  ;;  %v416_v21 = vadd.f32 %v415_v18, %v414_v17  ;;  %v402_v22 = vrot.slane %v401_v19, 2 }
  0x19   : > { %354 = vrot.lane.b32.xlu0 %v263_v7, %s992_s28  ;;  %367 = vrot.lane.b32.xlu1 %v262_v8, %s993_s29 }
  0x1a   : > { %v409_v23 = vrot.slane %v408_v20, 2  ;;  %v417_v24 = vrot.slane %v416_v21, 2  ;;  %v403_v25 = vadd.f32 %v402_v22, %v401_v19 }
  0x1c   : > { %v410_v26 = vadd.f32 %v409_v23, %v408_v20  ;;  %v418_v27 = vadd.f32 %v417_v24, %v416_v21  ;;  %v404_v28 = vrot.slane %v403_v25, 1 }
  0x1d   : > { %350 = vrot.lane.b32.xlu1 %v262_v8, %s992_s28  ;;  %382 = vrot.lane.b32.xlu0 %v266_v9, %s991_s27 }
  0x1e   : > { %v411_v29 = vrot.slane %v410_v26, 1  ;;  %v419_v31 = vrot.slane %v418_v27, 1  ;;  %v1076_v32 = vadd.f32 %v404_v28, %v403_v25 }
  0x20   : > { %v1078_v33 = vadd.f32 %v411_v29, %v410_v26  ;;  %v1080_v34 = vadd.f32 %v419_v31, %v418_v27  ;;  %v557_v27 = vld [vmem:[%s1197_s2] sm:$0xff] }
  0x21   : > { %352 = vrot.lane.b32.xlu1 %v266_v9, %s992_s28  ;;  %369 = vrot.lane.b32.xlu0 %v273_v10, %s993_s29 }
  0x25   : > { %322 = vrot.lane.b32.xlu1 %v266_v9, %s994_s30  ;;  %365 = vrot.lane.b32.xlu0 %v272_v11, %s993_s29 }
  0x29   : > { %337 = vrot.lane.b32.xlu1 %v262_v8, %s995_s6  ;;  %324 = vrot.lane.b32.xlu0 %v263_v7, %s994_s30 }
  0x2d   : > { %320 = vrot.lane.b32.xlu1 %v262_v8, %s994_s30  ;;  %339 = vrot.lane.b32.xlu0 %v273_v10, %s995_s6 }
  0x31   : > { %292 = vrot.lane.b32.xlu1 %v266_v9, %s996_s7  ;;  %335 = vrot.lane.b32.xlu0 %v272_v11, %s995_s6 }
  0x35   : > { %307 = vrot.lane.b32.xlu1 %v262_v8, %s997_s8  ;;  %294 = vrot.lane.b32.xlu0 %v263_v7, %s996_s7 }
  0x39   : > { %290 = vrot.lane.b32.xlu1 %v262_v8, %s996_s7  ;;  %309 = vrot.lane.b32.xlu0 %v273_v10, %s997_s8 }
  0x3d   : > { %276 = vrot.lane.b32.xlu1 %v262_v8, %s999_s9  ;;  %305 = vrot.lane.b32.xlu0 %v272_v11, %s997_s8 }
  0x41   : > { %274 = vrot.lane.b32.xlu1 %v272_v11, %s999_s9  ;;  %278 = vrot.lane.b32.xlu0 %v273_v10, %s999_s9 }
  0x45   : > { %426 = vrot.lane.b32.xlu1 %v1078_v33, %s999_s9  ;;  %424 = vrot.lane.b32.xlu0 %v1076_v32, %s999_s9 }
  0x49   : > { %438 = vrot.lane.b32.xlu1 %v1076_v32, %s996_s7  ;;  %428 = vrot.lane.b32.xlu0 %v1080_v34, %s999_s9 }
  0x4d   : > { %442 = vrot.lane.b32.xlu1 %v1080_v34, %s996_s7  ;;  %440 = vrot.lane.b32.xlu0 %v1078_v33, %s996_s7 }
  0x51   : > { %454 = vrot.lane.b32.xlu1 %v1078_v33, %s997_s8  ;;  %452 = vrot.lane.b32.xlu0 %v1076_v32, %s997_s8 }
  0x55   : > { %466 = vrot.lane.b32.xlu1 %v1076_v32, %s994_s30  ;;  %456 = vrot.lane.b32.xlu0 %v1080_v34, %s997_s8 }
  0x59   : > { %470 = vrot.lane.b32.xlu1 %v1080_v34, %s994_s30  ;;  %468 = vrot.lane.b32.xlu0 %v1078_v33, %s994_s30 }
  0x5d   : > { %482 = vrot.lane.b32.xlu1 %v1078_v33, %s995_s6  ;;  %480 = vrot.lane.b32.xlu0 %v1076_v32, %s995_s6 }
  0x61   : > { %494 = vrot.lane.b32.xlu1 %v1076_v32, %s992_s28  ;;  %484 = vrot.lane.b32.xlu0 %v1080_v34, %s995_s6 }
  0x65   : > { %498 = vrot.lane.b32.xlu1 %v1080_v34, %s992_s28  ;;  %496 = vrot.lane.b32.xlu0 %v1078_v33, %s992_s28 }
  0x69   : > { %510 = vrot.lane.b32.xlu1 %v1078_v33, %s993_s29  ;;  %508 = vrot.lane.b32.xlu0 %v1076_v32, %s993_s29 }
  0x6d   : > { %522 = vrot.lane.b32.xlu1 %v1076_v32, %s991_s27  ;;  %512 = vrot.lane.b32.xlu0 %v1080_v34, %s993_s29 }
  0x71   : > { %526 = vrot.lane.b32.xlu1 %v1080_v34, %s991_s27  ;;  %524 = vrot.lane.b32.xlu0 %v1078_v33, %s991_s27 }
  0x75   : > { %745 = vperm.xlu0 %975, %v727_v35  }
  0x87   : > { %v385_v36 = vpop.permute.xlu0 %384  ;;  %v381_v37 = vpop.permute.xlu1 %380 }
  0x88   : > { %394 = vst.msk [vmem:[#allocation2 + $0x70] sm:$0xf] %vm270_vm0, %v385_v36 }
  0x8b   : > { %v355_v38 = vpop.permute.xlu0 %354  ;;  %v368_v39 = vpop.permute.xlu1 %367 }
  0x8c   : > { %364 = vst.msk [vmem:[#allocation2 + $0x58] sm:$0xf] %vm270_vm0, %v355_v38 }
  0x8f   : > { %v351_v40 = vpop.permute.xlu1 %350  ;;  %v383_v41 = vpop.permute.xlu0 %382  ;;  %v572_v42 = vld [vmem:[#allocation2 + $0x70] sm:$0xf] }
  0x90   : > { %v387_v43 = vsel %vm386_vm4, %v381_v37, %v383_v41  ;;  %v388_v44 = vsel %vm386_vm4, %v383_v41, %v385_v36  ;;  %940 = vmatpush3.msk.msra.mxu1 %vm398_vm1, %v572_v42 }
  0x91   : > { %392 = vst [vmem:[#allocation2 + $0x60] sm:$0xf] %v387_v43  ;;  %393 = vst [vmem:[#allocation2 + $0x68] sm:$0xf] %v388_v44  ;;  %941 = vmatprep.subr.mxu1 %v990_v0 }
  0x93   : > { %v353_v45 = vpop.permute.xlu1 %352  ;;  %v370_v46 = vpop.permute.xlu0 %369 }
  0x94   : > { %v357_v47 = vsel %vm356_vm5, %v351_v40, %v353_v45  ;;  %v358_v48 = vsel %vm356_vm5, %v353_v45, %v355_v38  ;;  %v373_v49 = vsel %vm371_vm7, %v368_v39, %v370_v46  ;;  %379 = vst.msk [vmem:[#allocation2 + $0x58] sm:$0xf0] %vm288_vm6, %v370_v46 }
  0x95   : > { %362 = vst [vmem:[#allocation2 + $0x48] sm:$0xf] %v357_v47  ;;  %363 = vst [vmem:[#allocation2 + $0x50] sm:$0xf] %v358_v48 }
  0x96   : > { %378 = vst [vmem:[#allocation2 + $0x50] sm:$0xf0] %v373_v49 }
  0x97   : > { %v323_v50 = vpop.permute.xlu1 %322  ;;  %v366_v51 = vpop.permute.xlu0 %365 }
  0x98   : > { %v372_v52 = vsel %vm371_vm7, %v366_v51, %v368_v39  ;;  %v571_v53 = vld [vmem:[#allocation2 + $0x68] sm:$0xf]  ;;  %v570_v54 = vld [vmem:[#allocation2 + $0x60] sm:$0xf] }
  0x99   : > { %377 = vst [vmem:[#allocation2 + $0x48] sm:$0xf0] %v372_v52  ;;  %922 = vmatprep.subr.msk.mxu0 %vm398_vm1, %v571_v53 }
  0x9a   : > { %923 = vmatpush1.msk.msra.mxu0 %vm398_vm1, %v570_v54 }
  0x9b   : > { %v338_v55 = vpop.permute.xlu1 %337  ;;  %v325_v56 = vpop.permute.xlu0 %324  ;;  %v569_v57 = vld [vmem:[#allocation2 + $0x58] sm:$0xff] }
  0x9c   : > { %v328_v58 = vsel %vm326_vm8, %v323_v50, %v325_v56  ;;  %334 = vst.msk [vmem:[#allocation2 + $0x40] sm:$0xf] %vm270_vm0, %v325_v56  ;;  %942 = vmatpush3.msra.mxu1 %v569_v57 }
  0x9d   : > { %v568_v59 = vld [vmem:[#allocation2 + $0x50] sm:$0xff]  ;;  %333 = vst [vmem:[#allocation2 + $0x38] sm:$0xf] %v328_v58  ;;  %943 = vmatprep.subr.mxu1 %v990_v0 }
  0x9e   : > { %610 = vmatprep.subr.mxu0 %v568_v59 }
  0x9f   : > { %v321_v60 = vpop.permute.xlu1 %320  ;;  %v340_v61 = vpop.permute.xlu0 %339 }
  0xa0   : > { %v327_v62 = vsel %vm326_vm8, %v321_v60, %v323_v50  ;;  %v343_v63 = vsel %vm341_vm9, %v338_v55, %v340_v61  ;;  %349 = vst.msk [vmem:[#allocation2 + $0x40] sm:$0xf0] %vm288_vm6, %v340_v61  ;;  %v567_v1 = vld [vmem:[#allocation2 + $0x48] sm:$0xff] }
  0xa1   : > { %332 = vst [vmem:[#allocation2 + $0x30] sm:$0xf] %v327_v62  ;;  %348 = vst [vmem:[#allocation2 + $0x38] sm:$0xf0] %v343_v63  ;;  %611 = vmatpush1.msra.mxu0 %v567_v1 }
  0xa3   : > { %v293_v2 = vpop.permute.xlu1 %292  ;;  %v336_v3 = vpop.permute.xlu0 %335 }
  0xa4   : > { %v342_v4 = vsel %vm341_vm9, %v336_v3, %v338_v55 }
  0xa5   : > { %347 = vst [vmem:[#allocation2 + $0x30] sm:$0xf0] %v342_v4 }
  0xa7   : > { %v308_v5 = vpop.permute.xlu1 %307  ;;  %v295_v6 = vpop.permute.xlu0 %294  ;;  %v566_v7 = vld [vmem:[#allocation2 + $0x40] sm:$0xff] }
  0xa8   : > { %v298_v8 = vsel %vm296_vm10, %v293_v2, %v295_v6  ;;  %304 = vst.msk [vmem:[#allocation2 + $0x28] sm:$0xf] %vm270_vm0, %v295_v6  ;;  %944 = vmatpush3.msra.mxu1 %v566_v7  ;;  %v565_v9 = vld [vmem:[#allocation2 + $0x38] sm:$0xff] }
  0xa9   : > { %303 = vst [vmem:[#allocation2 + $0x20] sm:$0xf] %v298_v8  ;;  %612 = vmatprep.subr.mxu0 %v565_v9  ;;  %945 = vmatprep.subr.mxu1 %v990_v0 }
  0xab   : > { %v291_v10 = vpop.permute.xlu1 %290  ;;  %v310_v11 = vpop.permute.xlu0 %309 }
  0xac   : > { %v297_v12 = vsel %vm296_vm10, %v291_v10, %v293_v2  ;;  %v313_v13 = vsel %vm311_vm11, %v308_v5, %v310_v11  ;;  %319 = vst.msk [vmem:[#allocation2 + $0x28] sm:$0xf0] %vm288_vm6, %v310_v11  ;;  %v564_v14 = vld [vmem:[#allocation2 + $0x30] sm:$0xff] }
  0xad   : > { %302 = vst [vmem:[#allocation2 + $0x18] sm:$0xf] %v297_v12  ;;  %318 = vst [vmem:[#allocation2 + $0x20] sm:$0xf0] %v313_v13  ;;  %613 = vmatpush1.msra.mxu0 %v564_v14 }
  0xaf   : > { %v277_v15 = vpop.permute.xlu1 %276  ;;  %v306_v16 = vpop.permute.xlu0 %305 }
  0xb0   : > { %v312_v17 = vsel %vm311_vm11, %v306_v16, %v308_v5  ;;  %v728_v16 = vlaneseq }
  0xb1   : > { %317 = vst [vmem:[#allocation2 + $0x18] sm:$0xf0] %v312_v17  ;;  %v1001_v17 = vmov 1966171168  }
  0xb2   : > { %vm813_vm14 = vcmp.lt.s32.totalorder %v728_v16, 288 }
  0xb3   : > { %v275_v18 = vpop.permute.xlu1 %274  ;;  %v279_v19 = vpop.permute.xlu0 %278  ;;  %v563_v20 = vld [vmem:[#allocation2 + $0x28] sm:$0xff] }
  0xb4   : > { %v281_v21 = vsel %vm280_vm12, %v275_v18, %v277_v15  ;;  %v282_v22 = vsel %vm280_vm12, %v277_v15, %v279_v19  ;;  %289 = vst.msk [vmem:[#allocation2 + $0x10] sm:$0xf0] %vm288_vm6, %v279_v19  ;;  %946 = vmatpush3.msra.mxu1 %v563_v20  ;;  %v562_v23 = vld [vmem:[#allocation2 + $0x20] sm:$0xff]  ;;  %v789_v18 = vunpack.c.l.s4 %v1001_v17 }
  0xb5   : > { %286 = vst [vmem:[#allocation2] sm:$0xf0] %v281_v21  ;;  %287 = vst [vmem:[#allocation2 + $0x8] sm:$0xf0] %v282_v22  ;;  %614 = vmatprep.subr.mxu0 %v562_v23  ;;  %947 = vmatprep.subr.mxu1 %v990_v0 }
  0xb7   : > { %v427_v24 = vpop.permute.xlu1 %426  ;;  %v425_v25 = vpop.permute.xlu0 %424 }
  0xb8   : > { %v561_v26 = vld [vmem:[#allocation2 + $0x18] sm:$0xff]  ;;  %v430_v39 = vsel %vm280_vm12, %v425_v25, %v427_v24  ;;  %v729_v25 = vshrl.u32 %v728_v16, 7 }
  0xb9   : > { %615 = vmatpush1.msra.mxu0 %v561_v26  ;;  %v435_v44 = vadd.f32 %v430_v39, %v1076_v32  ;;  %v790_v26 = vunpack.c.0.s8 %v789_v18 }
  0xbb   : > { %v560_v28 = vld [vmem:[#allocation2 + $0x10] sm:$0xff]  ;;  %v439_v29 = vpop.permute.xlu1 %438  ;;  %v429_v30 = vpop.permute.xlu0 %428 }
  0xbc   : > { %948 = vmatpush3.msra.mxu1 %v560_v28  ;;  %v559_v31 = vld [vmem:[#allocation2 + $0x8] sm:$0xff]  ;;  %v558_v35 = vld [vmem:[#allocation2] sm:$0xff]  ;;  %v431_v40 = vsel %vm280_vm12, %v427_v24, %v429_v30  ;;  %v437_v43 = vadd.f32 %v429_v30, %v1080_v34 }
  0xbd   : > { %616 = vmatprep.subr.mxu0 %v559_v31  ;;  %950 = vmatmul.mubr.msk.f32.vlgmr.msra.gmra.mxu1 %vm573_vm13, %v557_v27  ;;  %v436_v45 = vadd.f32 %v431_v40, %v1078_v33 }
  0xbe   : > { %617 = vmatpush1.msra.mxu0 %v558_v35 }
  0xbf   : > { %924 = vmatmul.mubr.msk.f32.vlgmr.msra.gmra.mxu0 %vm573_vm13, %v557_v27  ;;  %v443_v0 = vpop.permute.xlu1 %442  ;;  %v441_v36 = vpop.permute.xlu0 %440 }
  0xc0   : > { %v444_v46 = vsel %vm296_vm10, %v439_v29, %v441_v36  ;;  %v445_v47 = vsel %vm296_vm10, %v441_v36, %v443_v0  ;;  %v451_v50 = vadd.f32 %v443_v0, %v437_v43  ;;  %v730_v36 = vsub.s32 0, %v729_v25 }
  0xc1   : > { %v449_v51 = vadd.f32 %v444_v46, %v435_v44  ;;  %v450_v52 = vadd.f32 %v445_v47, %v436_v45 }
  0xc3   : > { %v455_v37 = vpop.permute.xlu1 %454  ;;  %v453_v38 = vpop.permute.xlu0 %452 }
  0xc4   : > { %v458_v53 = vsel %vm311_vm11, %v453_v38, %v455_v37 }
  0xc5   : > { %v463_v57 = vadd.f32 %v458_v53, %v449_v51 }
  0xc7   : > { %v467_v41 = vpop.permute.xlu1 %466  ;;  %v457_v42 = vpop.permute.xlu0 %456 }
  0xc8   : > { %v459_v54 = vsel %vm311_vm11, %v455_v37, %v457_v42  ;;  %v465_v34 = vadd.f32 %v457_v42, %v451_v50  ;;  %v793_v37 = vsub.s32 %v790_v26, %v729_v25 }
  0xc9   : > { %v464_v32 = vadd.f32 %v459_v54, %v450_v52 }
  0xcb   : > { %v471_v48 = vpop.permute.xlu1 %470  ;;  %v469_v49 = vpop.permute.xlu0 %468 }
  0xcc   : > { %v472_v33 = vsel %vm326_vm8, %v467_v41, %v469_v49  ;;  %v473_v58 = vsel %vm326_vm8, %v469_v49, %v471_v48  ;;  %v479_v61 = vadd.f32 %v471_v48, %v465_v34 }
  0xcd   : > { %v477_v62 = vadd.f32 %v472_v33, %v463_v57  ;;  %v478_v63 = vadd.f32 %v473_v58, %v464_v32 }
  0xcf   : > { %v483_v55 = vpop.permute.xlu1 %482  ;;  %v481_v56 = vpop.permute.xlu0 %480 }
  0xd0   : > { %v486_v1 = vsel %vm341_vm9, %v481_v56, %v483_v55 }
  0xd1   : > { %v491_v6 = vadd.f32 %v486_v1, %v477_v62 }
  0xd3   : > { %v495_v59 = vpop.permute.xlu1 %494  ;;  %v485_v60 = vpop.permute.xlu0 %484 }
  0xd4   : > { %v487_v2 = vsel %vm341_vm9, %v483_v55, %v485_v60  ;;  %v493_v5 = vadd.f32 %v485_v60, %v479_v61 }
  0xd5   : > { %v492_v7 = vadd.f32 %v487_v2, %v478_v63 }
  0xd7   : > { %v499_v3 = vpop.permute.xlu1 %498  ;;  %v497_v4 = vpop.permute.xlu0 %496 }
  0xd8   : > { %v500_v8 = vsel %vm356_vm5, %v495_v59, %v497_v4  ;;  %v501_v9 = vsel %vm356_vm5, %v497_v4, %v499_v3  ;;  %v507_v12 = vadd.f32 %v499_v3, %v493_v5 }
  0xd9   : > { %v505_v13 = vadd.f32 %v500_v8, %v491_v6  ;;  %v506_v14 = vadd.f32 %v501_v9, %v492_v7 }
  0xdb   : > { %v511_v10 = vpop.permute.xlu1 %510  ;;  %v509_v11 = vpop.permute.xlu0 %508 }
  0xdc   : > { %v514_v15 = vsel %vm371_vm7, %v509_v11, %v511_v10 }
  0xdd   : > { %v519_v23 = vadd.f32 %v514_v15, %v505_v13 }
  0xdf   : > { %v523_v19 = vpop.permute.xlu1 %522  ;;  %v513_v20 = vpop.permute.xlu0 %512 }
  0xe0   : > { %v515_v21 = vsel %vm371_vm7, %v511_v10, %v513_v20  ;;  %v521_v22 = vadd.f32 %v513_v20, %v507_v12 }
  0xe1   : > { %v520_v24 = vadd.f32 %v515_v21, %v506_v14 }
  0xe3   : > { %v527_v27 = vpop.permute.xlu1 %526  ;;  %v525_v28 = vpop.permute.xlu0 %524 }
  0xe4   : > { %v535_v29 = vadd.f32 %v527_v27, %v521_v22  ;;  %v528_v30 = vsel %vm386_vm4, %v523_v19, %v525_v28  ;;  %v529_v31 = vsel %vm386_vm4, %v525_v28, %v527_v27 }
  0xe5   : > { %v533_v35 = vadd.f32 %v528_v30, %v519_v23  ;;  %v534_v0 = vadd.f32 %v529_v31, %v520_v24 }
  0xe6   : > { %v538_v38 = vadd.f32 1e-08, %v535_v29  ;;  %v547_v39 = vmax.f32 %v535_v29, 0.0 }
  0xe7   : > { %v536_v40 = vadd.f32 1e-08, %v533_v35  ;;  %v537_v41 = vadd.f32 1e-08, %v534_v0  ;;  %v545_v42 = vmax.f32 %v533_v35, 0.0  ;;  %v546_v43 = vmax.f32 %v534_v0, 0.0 }
  0xe8   : > { %976 = vrcp.f32 %v538_v38  ;;  %v550_v44 = vmin.f32 %v547_v39, 1.0 }
  0xe9   : > { %978 = vrcp.f32 %v536_v40  ;;  %v548_v45 = vmin.f32 %v545_v42, 1.0  ;;  %v549_v46 = vmin.f32 %v546_v43, 1.0 }
  0xea   : > { %980 = vrcp.f32 %v537_v41  ;;  %v759_v47 = vrot.slane %v550_v44, %v730_v36  ;;  %v801_v48 = vrot.slane %v550_v44, %v793_v37 }
  0xeb   : > { %v787_v49 = vcombine.low %v548_v45, %v549_v46  ;;  %v751_v50 = vrot.slane %v548_v45, %v730_v36  ;;  %v755_v51 = vrot.slane %v549_v46, %v730_v36 }
  0xed   : > { %v794_v52 = vrot.slane %v787_v49, %v793_v37 }
  0xef   : > { %v802_v53 = vcombine.low %v794_v52, %v801_v48 }
  0xf0   : > { %v746_v4 = vpop.permute.xlu0 %745 }
  0xf1   : > { %v809_v54 = vrot.slane %v802_v53, %v793_v37  ;;  %v762_v6 = vmul.f32 %v759_v47, %v746_v4  ;;  %v760_v10 = vmul.f32 %v751_v50, %v746_v4  ;;  %v761_v14 = vmul.f32 %v755_v51, %v746_v4 }
  0xf3   : > { %815 = vst.msk [vmem:[%s255_s17] sm:$0x7] %vm813_vm14, %v809_v54 }
  0xf5   : > { %v977_v55 = vpop.eup %976 }
  0xf6   : > { %v979_v56 = vpop.eup %978  ;;  %v544_v34 = vmul.f32 36.0, %v977_v55 }
  0xf7   : > { %v981_v57 = vpop.eup %980  ;;  %v542_v32 = vmul.f32 36.0, %v979_v56 }
  0xf8   : > { %v553_v33 = vmul.f32 %v550_v44, %v544_v34  ;;  %v543_v58 = vmul.f32 36.0, %v981_v57 }
  0xf9   : > { %v551_v59 = vmul.f32 %v548_v45, %v542_v32 }
  0xfa   : > { %v556_v60 = vmul.f32 %v553_v33, %v550_v44  ;;  %v552_v61 = vmul.f32 %v549_v46, %v543_v58 }
  0xfb   : > { %v554_v62 = vmul.f32 %v551_v59, %v548_v45 }
  0xfc   : > { %v739_v63 = vrot.slane %v556_v60, %v730_v36  ;;  %v555_v1 = vmul.f32 %v552_v61, %v549_v46 }
  0xfd   : > { %v731_v2 = vrot.slane %v554_v62, %v730_v36 }
  0xfe   : > { %v735_v3 = vrot.slane %v555_v1, %v730_v36 }
 0x17d   : > { %v723_v5 = vpop.f32.mrf.mxu1 }
 0x17e   : > { %v742_v7 = vmul.f32 %v739_v63, %v723_v5 }
 0x17f   : > { %v652_v8 = vpop.f32.mrf.mxu0  ;;  %v951_v9 = vpop.f32.mrf.mxu1 }
 0x180   : > { %v765_v11 = vadd.f32 %v762_v6, %v742_v7  ;;  %v740_v12 = vmul.f32 %v731_v2, %v652_v8 }
 0x181   : > { %v654_v13 = vpop.f32.mrf.mxu0 }
 0x182   : > { %v768_v15 = vmax.f32 %v765_v11, 0.0  ;;  %v763_v16 = vadd.f32 %v760_v10, %v740_v12  ;;  %v741_v17 = vmul.f32 %v735_v3, %v654_v13 }
 0x184   : > { %v932_v18 = vpack.c.bf16 %v768_v15, %v768_v15  ;;  %v764_v19 = vadd.f32 %v761_v14, %v741_v17  ;;  %v766_v20 = vmax.f32 %v763_v16, 0.0 }
 0x186   : > { %783 = vst.msk [vmem:[%s251_s23 + $0x8] sm:$0xf] %vm270_vm0, %v932_v18  ;;  %v767_v21 = vmax.f32 %v764_v19, 0.0 }
 0x188   : > { %v931_v22 = vpack.c.bf16 %v767_v21, %v766_v20 }
 0x18a   : > { %782 = vst [vmem:[%s251_s23] sm:$0xff] %v931_v22 }
 0x18b PF: > { %s16_s18 = sadd.s32 1, %s988_s18  }
 0x18c   : > { %p13_p4 = scmp.ge.s32.totalorder %s16_s18, 4  }
 0x18e   :  { %15 = sbr.rel (!%p13_p4) target bundleno = 1 (0x1), region = 81 }

// kernel: dincae_pconvs_forward.11
= control target key start
LH: loop header
LB: loop body
LE: loop exit
PB: predicated region body
PF: predicated region fallthrough
CT: control target
= control target key end

     0   :  { %v23_v0 = vlaneseq  ;;  %v412_v2 = vmov 0   ;;  %vm29_vm0 = vcmask 654336   ;;  %s414_s24 = smov 107   ;;  %s416_s25 = smov 59   ;;  %v429_v13 = vmov 0.0   ;;  %s571_s0 = inlined_call_operand.vmem [shape: bf16[2,8,110], index: 0, kind: input, shape index: {}]   ;;  %s572_s1 = inlined_call_operand.vmem [shape: f32[2,1,110], index: 1, kind: input, shape index: {}]   ;;  %s573_s3 = inlined_call_operand.vmem [shape: f32[8,1], index: 3, kind: input, shape index: {}]   ;;  %s574_s2 = inlined_call_operand.vmem [shape: f32[8,72], index: 2, kind: input, shape index: {}]   ;;  %s575_s5 = inlined_call_operand.vmem [shape: f32[1,1,160], index: 5, kind: output, shape index: {1}]   ;;  %s576_s4 = inlined_call_operand.vmem [shape: bf16[1,8,160], index: 4, kind: output, shape index: {0}]  }
   0x1   :  { %v19_v1 = vld [vmem:[%s571_s0] sm:$0xff]   ;;  %406 = vset.pattern.permute.xlu1 %v412_v2  ;;  %407 = vset.pattern.permute.xlu0 %v412_v2  ;;  %s413_s0 = smov 106   ;;  %s417_s26 = smov 108   ;;  %vm120_vm1 = vcmask 1048192   ;;  %vm122_vm2 = vcmask 261120   ;;  %vm223_vm3 = vcmask 588800  }
   0x2   :  { %v24_v3 = vshrl.u32 %v23_v0, 7  ;;  %v468_v4 = vld [vmem:[%s572_s1] sm:$0x1]  ;;  %v473_v5 = vld [vmem:[%s572_s1 + $0x1] sm:$0x1]  ;;  %v20_v6 = vunpack.c.l.bf16 %v19_v1  ;;  %v106_v9 = vunpack.c.h.bf16 %v19_v1  ;;  %s415_s1 = smov 58   ;;  %291 = vmatprep.mubr.f32.mxu0 %v429_v13 }
   0x3   :  { %s418_s27 = smov 60   ;;  %s419_s28 = smov 116   ;;  %v298_v14 = vld [vmem:[%s573_s3] sm:$0xff]  ;;  %vm325_vm4 = vcmp.lt.s32.totalorder %v23_v0, 80  ;;  %vm370_vm5 = vcmp.ge.s32.totalorder %v23_v0, 80  ;;  %vm371_vm6 = vcmp.lt.s32.totalorder %v23_v0, 160 }
   0x4   :  { %v475_v7 = vsub.s32 0, %v24_v3  ;;  %s420_s29 = smov 68   ;;  %s421_s30 = smov 117   ;;  %v204_v56 = vld [vmem:[%s574_s2] sm:$0xff]  ;;  %vm372_vm7 = vmand %vm370_vm5, %vm371_vm6  ;;  %vm361_vm8 = vcmask 1044096   ;;  %vm362_vm9 = vcmask 261124  }
   0x5   :  { %s422_s6 = smov 69   ;;  %s423_s7 = smov 118   ;;  %vm321_vm10 = vcmask 650240   ;;  %vm363_vm11 = vmor %vm362_vm9, %vm361_vm8 }
   0x6   :  { %v26_v8 = vrot.slane %v468_v4, %v475_v7  ;;  %v113_v10 = vrot.slane %v473_v5, %v475_v7  ;;  %s424_s8 = smov 70   ;;  %s425_s9 = smov 126  }
   0x7   :  { %s426_s10 = smov 78   ;;  %s427_s11 = smov 127  }
   0x8   :  { %v28_v11 = vmul.f32 %v26_v8, %v20_v6  ;;  %v115_v12 = vmul.f32 %v113_v10, %v106_v9  ;;  %s428_s12 = smov 79   ;;  %s430_s13 = smov 80  }
   0xa   :  { %60 = vrot.lane.b32.xlu0 %v28_v11, %s413_s0  ;;  %56 = vrot.lane.b32.xlu1 %v28_v11, %s414_s24  ;;  %30 = vst.msk [vmem:[#allocation2] sm:$0xff] %vm29_vm0, %v28_v11 }
   0xe   :  { %159 = vrot.lane.b32.xlu0 %v115_v12, %s415_s1  ;;  %154 = vrot.lane.b32.xlu1 %v115_v12, %s416_s25 }
  0x12   :  { %52 = vrot.lane.b32.xlu0 %v28_v11, %s417_s26  ;;  %149 = vrot.lane.b32.xlu1 %v115_v12, %s418_s27 }
  0x16   :  { %48 = vrot.lane.b32.xlu0 %v28_v11, %s419_s28  ;;  %144 = vrot.lane.b32.xlu1 %v115_v12, %s420_s29 }
  0x1a   :  { %44 = vrot.lane.b32.xlu0 %v28_v11, %s421_s30  ;;  %139 = vrot.lane.b32.xlu1 %v115_v12, %s422_s6 }
  0x1e   :  { %40 = vrot.lane.b32.xlu0 %v28_v11, %s423_s7  ;;  %134 = vrot.lane.b32.xlu1 %v115_v12, %s424_s8 }
  0x22   :  { %36 = vrot.lane.b32.xlu0 %v28_v11, %s425_s9  ;;  %129 = vrot.lane.b32.xlu1 %v115_v12, %s426_s10 }
  0x26   :  { %32 = vrot.lane.b32.xlu0 %v28_v11, %s427_s11  ;;  %124 = vrot.lane.b32.xlu1 %v115_v12, %s428_s12 }
  0x2a   :  { %117 = vrot.lane.b32.xlu0 %v115_v12, %s430_s13  ;;  %164 = vrot.lane.b32.xlu1 %v473_v5, %s427_s11 }
  0x2e   :  { %168 = vrot.lane.b32.xlu0 %v473_v5, %s425_s9  ;;  %172 = vrot.lane.b32.xlu1 %v473_v5, %s423_s7 }
  0x32   :  { %176 = vrot.lane.b32.xlu0 %v473_v5, %s421_s30  ;;  %180 = vrot.lane.b32.xlu1 %v473_v5, %s419_s28 }
  0x36   :  { %184 = vrot.lane.b32.xlu0 %v473_v5, %s417_s26  ;;  %188 = vrot.lane.b32.xlu1 %v473_v5, %s414_s24 }
  0x3a   :  { %192 = vrot.lane.b32.xlu0 %v473_v5, %s413_s0  ;;  %308 = vperm.xlu1 %406, %v298_v14  }
  0x3e   :  { %64 = vrot.lane.b32.xlu0 %v468_v4, %s427_s11  ;;  %68 = vrot.lane.b32.xlu1 %v468_v4, %s425_s9 }
  0x42   :  { %72 = vrot.lane.b32.xlu0 %v468_v4, %s423_s7  ;;  %76 = vrot.lane.b32.xlu1 %v468_v4, %s421_s30 }
  0x46   :  { %80 = vrot.lane.b32.xlu0 %v468_v4, %s419_s28  ;;  %84 = vrot.lane.b32.xlu1 %v468_v4, %s417_s26 }
  0x4a   :  { %88 = vrot.lane.b32.xlu0 %v468_v4, %s414_s24  ;;  %92 = vrot.lane.b32.xlu1 %v468_v4, %s413_s0 }
  0x7c   :  { %v61_v15 = vpop.permute.xlu0 %60  ;;  %v57_v16 = vpop.permute.xlu1 %56 }
  0x7d   :  { %63 = vst.msk [vmem:[#allocation2 + $0x80] sm:$0xff] %vm29_vm0, %v61_v15  ;;  %59 = vst.msk [vmem:[#allocation2 + $0x70] sm:$0xff] %vm29_vm0, %v57_v16 }
  0x80   :  { %v160_v17 = vpop.permute.xlu0 %159  ;;  %v155_v18 = vpop.permute.xlu1 %154 }
  0x81   :  { %162 = vst.msk [vmem:[#allocation2 + $0x80] sm:$0xff] %vm120_vm1, %v160_v17  ;;  %157 = vst.msk [vmem:[#allocation2 + $0x70] sm:$0xff] %vm120_vm1, %v155_v18 }
  0x82   :  { %163 = vst.msk [vmem:[#allocation2 + $0x88] sm:$0xff] %vm122_vm2, %v160_v17  ;;  %158 = vst.msk [vmem:[#allocation2 + $0x78] sm:$0xff] %vm122_vm2, %v155_v18 }
  0x84   :  { %v53_v19 = vpop.permute.xlu0 %52  ;;  %v150_v20 = vpop.permute.xlu1 %149 }
  0x85   :  { %55 = vst.msk [vmem:[#allocation2 + $0x60] sm:$0xff] %vm29_vm0, %v53_v19 }
  0x86   :  { %153 = vst.msk [vmem:[#allocation2 + $0x68] sm:$0xff] %vm122_vm2, %v150_v20 }
  0x87   :  { %152 = vst.msk [vmem:[#allocation2 + $0x60] sm:$0xff] %vm120_vm1, %v150_v20 }
  0x88   :  { %v49_v21 = vpop.permute.xlu0 %48  ;;  %v145_v22 = vpop.permute.xlu1 %144  ;;  %v221_v24 = vld [vmem:[#allocation2 + $0x80] sm:$0xff]  ;;  %v219_v26 = vld [vmem:[#allocation2 + $0x70] sm:$0xff] }
  0x89   :  { %v222_v23 = vld [vmem:[#allocation2 + $0x88] sm:$0xff]  ;;  %v220_v25 = vld [vmem:[#allocation2 + $0x78] sm:$0xff]  ;;  %51 = vst.msk [vmem:[#allocation2 + $0x50] sm:$0xff] %vm29_vm0, %v49_v21 }
  0x8a   :  { %148 = vst.msk [vmem:[#allocation2 + $0x58] sm:$0xff] %vm122_vm2, %v145_v22  ;;  %241 = vmatprep.subr.mxu0 %v222_v23 }
  0x8b   :  { %147 = vst.msk [vmem:[#allocation2 + $0x50] sm:$0xff] %vm120_vm1, %v145_v22  ;;  %242 = vmatpush1.msra.mxu0 %v221_v24 }
  0x8c   :  { %243 = vmatprep.subr.mxu0 %v220_v25  ;;  %v45_v27 = vpop.permute.xlu0 %44  ;;  %v140_v28 = vpop.permute.xlu1 %139 }
  0x8d   :  { %244 = vmatpush1.msra.mxu0 %v219_v26  ;;  %v218_v29 = vld [vmem:[#allocation2 + $0x68] sm:$0xff]  ;;  %47 = vst.msk [vmem:[#allocation2 + $0x40] sm:$0xff] %vm29_vm0, %v45_v27 }
  0x8e   :  { %143 = vst.msk [vmem:[#allocation2 + $0x48] sm:$0xff] %vm122_vm2, %v140_v28  ;;  %245 = vmatprep.subr.mxu0 %v218_v29  ;;  %v217_v30 = vld [vmem:[#allocation2 + $0x60] sm:$0xff] }
  0x8f   :  { %142 = vst.msk [vmem:[#allocation2 + $0x40] sm:$0xff] %vm120_vm1, %v140_v28  ;;  %246 = vmatpush1.msra.mxu0 %v217_v30 }
  0x90   :  { %v41_v31 = vpop.permute.xlu0 %40  ;;  %v135_v32 = vpop.permute.xlu1 %134 }
  0x91   :  { %v216_v33 = vld [vmem:[#allocation2 + $0x58] sm:$0xff]  ;;  %43 = vst.msk [vmem:[#allocation2 + $0x30] sm:$0xff] %vm29_vm0, %v41_v31 }
  0x92   :  { %138 = vst.msk [vmem:[#allocation2 + $0x38] sm:$0xff] %vm122_vm2, %v135_v32  ;;  %247 = vmatprep.subr.mxu0 %v216_v33  ;;  %v215_v34 = vld [vmem:[#allocation2 + $0x50] sm:$0xff] }
  0x93   :  { %137 = vst.msk [vmem:[#allocation2 + $0x30] sm:$0xff] %vm120_vm1, %v135_v32  ;;  %248 = vmatpush1.msra.mxu0 %v215_v34 }
  0x94   :  { %v37_v35 = vpop.permute.xlu0 %36  ;;  %v130_v36 = vpop.permute.xlu1 %129 }
  0x95   :  { %v214_v37 = vld [vmem:[#allocation2 + $0x48] sm:$0xff]  ;;  %39 = vst.msk [vmem:[#allocation2 + $0x20] sm:$0xff] %vm29_vm0, %v37_v35 }
  0x96   :  { %133 = vst.msk [vmem:[#allocation2 + $0x28] sm:$0xff] %vm122_vm2, %v130_v36  ;;  %249 = vmatprep.subr.mxu0 %v214_v37  ;;  %v213_v38 = vld [vmem:[#allocation2 + $0x40] sm:$0xff] }
  0x97   :  { %132 = vst.msk [vmem:[#allocation2 + $0x20] sm:$0xff] %vm120_vm1, %v130_v36  ;;  %250 = vmatpush1.msra.mxu0 %v213_v38 }
  0x98   :  { %v33_v39 = vpop.permute.xlu0 %32  ;;  %v125_v40 = vpop.permute.xlu1 %124 }
  0x99   :  { %v212_v41 = vld [vmem:[#allocation2 + $0x38] sm:$0xff]  ;;  %35 = vst.msk [vmem:[#allocation2 + $0x10] sm:$0xff] %vm29_vm0, %v33_v39 }
  0x9a   :  { %128 = vst.msk [vmem:[#allocation2 + $0x18] sm:$0xff] %vm122_vm2, %v125_v40  ;;  %251 = vmatprep.subr.mxu0 %v212_v41  ;;  %v211_v42 = vld [vmem:[#allocation2 + $0x30] sm:$0xff] }
  0x9b   :  { %127 = vst.msk [vmem:[#allocation2 + $0x10] sm:$0xff] %vm120_vm1, %v125_v40  ;;  %252 = vmatpush1.msra.mxu0 %v211_v42 }
  0x9c   :  { %v118_v43 = vpop.permute.xlu0 %117  ;;  %v165_v45 = vpop.permute.xlu1 %164 }
  0x9d   :  { %v210_v44 = vld [vmem:[#allocation2 + $0x28] sm:$0xff]  ;;  %121 = vst.msk [vmem:[#allocation2] sm:$0xff] %vm120_vm1, %v118_v43  ;;  %v167_v47 = vadd.f32 %v473_v5, %v165_v45 }
  0x9e   :  { %123 = vst.msk [vmem:[#allocation2 + $0x8] sm:$0xff] %vm122_vm2, %v118_v43  ;;  %253 = vmatprep.subr.mxu0 %v210_v44  ;;  %v209_v46 = vld [vmem:[#allocation2 + $0x20] sm:$0xff] }
  0x9f   :  { %254 = vmatpush1.msra.mxu0 %v209_v46 }
  0xa0   :  { %v169_v49 = vpop.permute.xlu0 %168  ;;  %v173_v50 = vpop.permute.xlu1 %172 }
  0xa1   :  { %v208_v48 = vld [vmem:[#allocation2 + $0x18] sm:$0xff]  ;;  %v171_v52 = vadd.f32 %v169_v49, %v167_v47 }
  0xa2   :  { %255 = vmatprep.subr.mxu0 %v208_v48  ;;  %v207_v51 = vld [vmem:[#allocation2 + $0x10] sm:$0xff] }
  0xa3   :  { %256 = vmatpush1.msra.mxu0 %v207_v51  ;;  %v175_v53 = vadd.f32 %v173_v50, %v171_v52 }
  0xa4   :  { %v205_v55 = vld [vmem:[#allocation2] sm:$0xff]  ;;  %v177_v57 = vpop.permute.xlu0 %176  ;;  %v181_v58 = vpop.permute.xlu1 %180 }
  0xa5   :  { %v206_v54 = vld [vmem:[#allocation2 + $0x8] sm:$0xff]  ;;  %v179_v59 = vadd.f32 %v177_v57, %v175_v53 }
  0xa6   :  { %257 = vmatprep.subr.mxu0 %v206_v54 }
  0xa7   :  { %258 = vmatpush1.msra.mxu0 %v205_v55  ;;  %v183_v60 = vadd.f32 %v181_v58, %v179_v59 }
  0xa8   :  { %384 = vmatmul.mubr.msk.f32.vlgmr.msra.gmra.mxu0 %vm223_vm3, %v204_v56  ;;  %v185_v61 = vpop.permute.xlu0 %184  ;;  %v189_v62 = vpop.permute.xlu1 %188 }
  0xa9   :  { %v187_v63 = vadd.f32 %v185_v61, %v183_v60 }
  0xab   :  { %v191_v1 = vadd.f32 %v189_v62, %v187_v63 }
  0xac   :  { %v193_v2 = vpop.permute.xlu0 %192 }
  0xad   :  { %v195_v3 = vadd.f32 %v193_v2, %v191_v1 }
  0xaf   :  { %v196_v5 = vmul.f32 8.0, %v195_v3 }
  0xb0   :  { %v65_v6 = vpop.permute.xlu0 %64 }
  0xb1   :  { %v197_v8 = vadd.f32 1e-08, %v196_v5  ;;  %v200_v9 = vmax.f32 %v196_v5, 0.0  ;;  %v67_v14 = vadd.f32 %v65_v6, %v468_v4 }
  0xb3   :  { %408 = vrcp.f32 %v197_v8  ;;  %v201_v10 = vmin.f32 %v200_v9, 1.0 }
  0xb4   :  { %v73_v13 = vpop.permute.xlu0 %72 }
  0xb5   :  { %v309_v11 = vpop.permute.xlu1 %308  ;;  %v342_v12 = vrot.slane %v201_v10, %v475_v7 }
  0xb7   :  { %v344_v15 = vmul.f32 %v342_v12, %v309_v11 }
  0xb8   :  { %v81_v18 = vpop.permute.xlu0 %80 }
  0xb9   :  { %v69_v16 = vpop.permute.xlu1 %68  ;;  %346 = vrot.lane.b32.xlu1 %v344_v15, %s430_s13 }
  0xba   :  { %v71_v17 = vadd.f32 %v69_v16, %v67_v14 }
  0xbc   :  { %v75_v19 = vadd.f32 %v73_v13, %v71_v17  ;;  %v89_v26 = vpop.permute.xlu0 %88 }
  0xbd   :  { %v77_v20 = vpop.permute.xlu1 %76 }
  0xbe   :  { %v79_v21 = vadd.f32 %v77_v20, %v75_v19 }
  0xc0   :  { %v409_v22 = vpop.eup %408  ;;  %v83_v23 = vadd.f32 %v81_v18, %v79_v21 }
  0xc1   :  { %v199_v24 = vmul.f32 72.0, %v409_v22  ;;  %v85_v25 = vpop.permute.xlu1 %84 }
  0xc2   :  { %v87_v27 = vadd.f32 %v85_v25, %v83_v23 }
  0xc3   :  { %v202_v28 = vmul.f32 %v201_v10, %v199_v24 }
  0xc4   :  { %v91_v29 = vadd.f32 %v89_v26, %v87_v27 }
  0xc5   :  { %v203_v30 = vmul.f32 %v202_v28, %v201_v10  ;;  %v93_v31 = vpop.permute.xlu1 %92 }
  0xc6   :  { %v95_v4 = vadd.f32 %v93_v31, %v91_v29 }
  0xc7   :  { %v332_v32 = vrot.slane %v203_v30, %v475_v7 }
  0xc8   :  { %v96_v33 = vmul.f32 8.0, %v95_v4 }
  0xc9   :  { %333 = vrot.lane.b32.xlu0 %v332_v32, %s430_s13 }
  0xca   :  { %v97_v34 = vadd.f32 1e-08, %v96_v33  ;;  %v100_v35 = vmax.f32 %v96_v33, 0.0 }
  0xcc   :  { %410 = vrcp.f32 %v97_v34  ;;  %v101_v36 = vmin.f32 %v100_v35, 1.0 }
  0xcd   :  { %365 = vrot.lane.b32.xlu0 %v201_v10, %s430_s13 }
  0xce   :  { %327 = vst.msk [vmem:[%s575_s5] sm:$0x1] %vm325_vm4, %v101_v36  ;;  %v315_v37 = vrot.slane %v101_v36, %v475_v7 }
  0xd0   :  { %v317_v38 = vmul.f32 %v315_v37, %v309_v11 }
  0xd9   :  { %v411_v39 = vpop.eup %410 }
  0xda   :  { %v99_v40 = vmul.f32 72.0, %v411_v39 }
  0xdc   :  { %v102_v41 = vmul.f32 %v101_v36, %v99_v40 }
  0xde   :  { %v103_v42 = vmul.f32 %v102_v41, %v101_v36 }
  0xe0   :  { %v303_v47 = vrot.slane %v103_v42, %v475_v7 }
 0x12b   :  { %v347_v51 = vpop.permute.xlu1 %346 }
 0x13b   :  { %v334_v43 = vpop.permute.xlu0 %333 }
 0x13f   :  { %v366_v44 = vpop.permute.xlu0 %365 }
 0x140   :  { %v367_v45 = vrot.slane %v366_v44, 7 }
 0x142   :  { %v368_v46 = vsel %vm29_vm0, %v367_v45, %v366_v44 }
 0x143   :  { %373 = vst.msk [vmem:[%s575_s5] sm:$0x3] %vm372_vm7, %v368_v46 }
 0x168   :  { %v293_v48 = vpop.f32.mrf.mxu0 }
 0x169   :  { %v305_v49 = vmul.f32 %v303_v47, %v293_v48  ;;  %v336_v50 = vmul.f32 %v334_v43, %v293_v48 }
 0x16a   :  { %v295_v52 = vpop.f32.mrf.mxu0 }
 0x16b   :  { %v318_v53 = vadd.f32 %v317_v38, %v305_v49  ;;  %v349_v54 = vadd.f32 %v347_v51, %v336_v50  ;;  %v337_v55 = vmul.f32 %v334_v43, %v295_v52 }
 0x16d   :  { %v319_v0 = vmax.f32 %v318_v53, 0.0  ;;  %v350_v56 = vadd.f32 %v347_v51, %v337_v55  ;;  %v351_v58 = vmax.f32 %v349_v54, 0.0 }
 0x16f   :  { %v320_v57 = vpack.c.bf16 %v319_v0, %v319_v0  ;;  %v352_v59 = vmax.f32 %v350_v56, 0.0 }
 0x171   :  { %322 = vst.msk [vmem:[%s576_s4] sm:$0xf] %vm321_vm10, %v320_v57  ;;  %v386_v7 = vpack.c.bf16 %v352_v59, %v351_v58 }
 0x173   :  { %364 = vst.msk [vmem:[%s576_s4] sm:$0xff] %vm363_vm11, %v386_v7 }

// kernel: dincae_pconvs_forward.12
= control target key start
LH: loop header
LB: loop body
LE: loop exit
PB: predicated region body
PF: predicated region fallthrough
CT: control target
= control target key end

     0   :  { %v23_v0 = vlaneseq  ;;  %v403_v2 = vmov 0   ;;  %v404_v11 = vmov 0.0   ;;  %vm29_vm0 = vcmask 195584   ;;  %s407_s24 = smov 10   ;;  %s408_s25 = smov 11   ;;  %s559_s0 = inlined_call_operand.vmem [shape: bf16[2,8,42], index: 0, kind: input, shape index: {}]   ;;  %s560_s1 = inlined_call_operand.vmem [shape: f32[2,1,42], index: 1, kind: input, shape index: {}]   ;;  %s561_s3 = inlined_call_operand.vmem [shape: f32[8,1], index: 3, kind: input, shape index: {}]   ;;  %s562_s2 = inlined_call_operand.vmem [shape: f32[8,72], index: 2, kind: input, shape index: {}]   ;;  %s563_s5 = inlined_call_operand.vmem [shape: f32[1,1,48], index: 5, kind: output, shape index: {1}]   ;;  %s564_s4 = inlined_call_operand.vmem [shape: bf16[1,8,48], index: 4, kind: output, shape index: {0}]  }
   0x1   :  { %v19_v1 = vld [vmem:[%s559_s0] sm:$0xff]   ;;  %397 = vset.pattern.permute.xlu1 %v403_v2  ;;  %398 = vset.pattern.permute.xlu0 %v403_v2  ;;  %s405_s0 = smov 114   ;;  %s409_s26 = smov 116   ;;  %vm419_vm1 = vmmov 0   ;;  %vm120_vm2 = vcmask 392384   ;;  %vm204_vm3 = vcmask 588800  }
   0x2   :  { %v24_v3 = vshrl.u32 %v23_v0, 7  ;;  %v459_v4 = vld [vmem:[%s560_s1] sm:$0x1]  ;;  %v464_v5 = vld [vmem:[%s560_s1 + $0x1] sm:$0x1]  ;;  %v20_v6 = vunpack.c.l.bf16 %v19_v1  ;;  %v106_v9 = vunpack.c.h.bf16 %v19_v1  ;;  %356 = vmatprep.subr.mxu0 %v404_v11  ;;  %s406_s1 = smov 115   ;;  %374 = vmatprep.mubr.msk.f32.mxu0 %vm419_vm1, %v404_v11 }
   0x3   :  { %s410_s27 = smov 12   ;;  %s411_s28 = smov 120   ;;  %v278_v14 = vld [vmem:[%s561_s3] sm:$0xff]  ;;  %vm303_vm4 = vcmask 188416   ;;  %vm333_vm5 = vcmask 385216   ;;  %vm301_vm6 = vcmask 191488  }
   0x4   :  { %v466_v7 = vsub.s32 0, %v24_v3  ;;  %s412_s29 = smov 16   ;;  %s413_s30 = smov 121   ;;  %v194_v45 = vld [vmem:[%s562_s2] sm:$0xff]  ;;  %vm328_vm7 = vcmask 388288  }
   0x5   :  { %s414_s6 = smov 17   ;;  %s415_s7 = smov 122  }
   0x6   :  { %v26_v8 = vrot.slane %v459_v4, %v466_v7  ;;  %v113_v10 = vrot.slane %v464_v5, %v466_v7  ;;  %s416_s8 = smov 18   ;;  %s417_s9 = smov 126  }
   0x7   :  { %s418_s10 = smov 22   ;;  %s420_s11 = smov 127  }
   0x8   :  { %v28_v12 = vmul.f32 %v26_v8, %v20_v6  ;;  %v115_v13 = vmul.f32 %v113_v10, %v106_v9  ;;  %s421_s12 = smov 23   ;;  %s422_s13 = smov 24  }
   0xa   :  { %60 = vrot.lane.b32.xlu0 %v28_v12, %s405_s0  ;;  %56 = vrot.lane.b32.xlu1 %v28_v12, %s406_s1  ;;  %30 = vst.msk [vmem:[#allocation2] sm:$0xff] %vm29_vm0, %v28_v12 }
   0xe   :  { %150 = vrot.lane.b32.xlu0 %v115_v13, %s407_s24  ;;  %146 = vrot.lane.b32.xlu1 %v115_v13, %s408_s25 }
  0x12   :  { %52 = vrot.lane.b32.xlu0 %v28_v12, %s409_s26  ;;  %142 = vrot.lane.b32.xlu1 %v115_v13, %s410_s27 }
  0x16   :  { %48 = vrot.lane.b32.xlu0 %v28_v12, %s411_s28  ;;  %138 = vrot.lane.b32.xlu1 %v115_v13, %s412_s29 }
  0x1a   :  { %44 = vrot.lane.b32.xlu0 %v28_v12, %s413_s30  ;;  %134 = vrot.lane.b32.xlu1 %v115_v13, %s414_s6 }
  0x1e   :  { %40 = vrot.lane.b32.xlu0 %v28_v12, %s415_s7  ;;  %130 = vrot.lane.b32.xlu1 %v115_v13, %s416_s8 }
  0x22   :  { %36 = vrot.lane.b32.xlu0 %v28_v12, %s417_s9  ;;  %126 = vrot.lane.b32.xlu1 %v115_v13, %s418_s10 }
  0x26   :  { %32 = vrot.lane.b32.xlu0 %v28_v12, %s420_s11  ;;  %122 = vrot.lane.b32.xlu1 %v115_v13, %s421_s12 }
  0x2a   :  { %117 = vrot.lane.b32.xlu0 %v115_v13, %s422_s13  ;;  %154 = vrot.lane.b32.xlu1 %v464_v5, %s420_s11 }
  0x2e   :  { %158 = vrot.lane.b32.xlu0 %v464_v5, %s417_s9  ;;  %162 = vrot.lane.b32.xlu1 %v464_v5, %s415_s7 }
  0x32   :  { %166 = vrot.lane.b32.xlu0 %v464_v5, %s413_s30  ;;  %170 = vrot.lane.b32.xlu1 %v464_v5, %s411_s28 }
  0x36   :  { %174 = vrot.lane.b32.xlu0 %v464_v5, %s409_s26  ;;  %178 = vrot.lane.b32.xlu1 %v464_v5, %s406_s1 }
  0x3a   :  { %182 = vrot.lane.b32.xlu0 %v464_v5, %s405_s0  ;;  %288 = vperm.xlu1 %397, %v278_v14  }
  0x3e   :  { %64 = vrot.lane.b32.xlu0 %v459_v4, %s420_s11  ;;  %68 = vrot.lane.b32.xlu1 %v459_v4, %s417_s9 }
  0x42   :  { %72 = vrot.lane.b32.xlu0 %v459_v4, %s415_s7  ;;  %76 = vrot.lane.b32.xlu1 %v459_v4, %s413_s30 }
  0x46   :  { %80 = vrot.lane.b32.xlu0 %v459_v4, %s411_s28  ;;  %84 = vrot.lane.b32.xlu1 %v459_v4, %s409_s26 }
  0x4a   :  { %88 = vrot.lane.b32.xlu0 %v459_v4, %s406_s1  ;;  %92 = vrot.lane.b32.xlu1 %v459_v4, %s405_s0 }
  0x7c   :  { %v61_v15 = vpop.permute.xlu0 %60  ;;  %v57_v16 = vpop.permute.xlu1 %56 }
  0x7d   :  { %63 = vst.msk [vmem:[#allocation2 + $0x40] sm:$0xff] %vm29_vm0, %v61_v15  ;;  %59 = vst.msk [vmem:[#allocation2 + $0x38] sm:$0xff] %vm29_vm0, %v57_v16 }
  0x80   :  { %v151_v17 = vpop.permute.xlu0 %150  ;;  %v147_v18 = vpop.permute.xlu1 %146 }
  0x81   :  { %153 = vst.msk [vmem:[#allocation2 + $0x40] sm:$0xff] %vm120_vm2, %v151_v17  ;;  %149 = vst.msk [vmem:[#allocation2 + $0x38] sm:$0xff] %vm120_vm2, %v147_v18 }
  0x84   :  { %v53_v19 = vpop.permute.xlu0 %52  ;;  %v143_v20 = vpop.permute.xlu1 %142 }
  0x85   :  { %55 = vst.msk [vmem:[#allocation2 + $0x30] sm:$0xff] %vm29_vm0, %v53_v19 }
  0x86   :  { %145 = vst.msk [vmem:[#allocation2 + $0x30] sm:$0xff] %vm120_vm2, %v143_v20 }
  0x88   :  { %v49_v21 = vpop.permute.xlu0 %48  ;;  %v203_v22 = vld [vmem:[#allocation2 + $0x40] sm:$0xff]  ;;  %v139_v23 = vpop.permute.xlu1 %138  ;;  %v202_v24 = vld [vmem:[#allocation2 + $0x38] sm:$0xff] }
  0x89   :  { %51 = vst.msk [vmem:[#allocation2 + $0x28] sm:$0xff] %vm29_vm0, %v49_v21  ;;  %357 = vmatpush3.msra.mxu0 %v203_v22 }
  0x8a   :  { %141 = vst.msk [vmem:[#allocation2 + $0x28] sm:$0xff] %vm120_vm2, %v139_v23  ;;  %358 = vmatprep.subr.mxu0 %v404_v11 }
  0x8b   :  { %359 = vmatpush3.msra.mxu0 %v202_v24 }
  0x8c   :  { %v45_v25 = vpop.permute.xlu0 %44  ;;  %v135_v26 = vpop.permute.xlu1 %134  ;;  %360 = vmatprep.subr.mxu0 %v404_v11 }
  0x8d   :  { %47 = vst.msk [vmem:[#allocation2 + $0x20] sm:$0xff] %vm29_vm0, %v45_v25  ;;  %v201_v27 = vld [vmem:[#allocation2 + $0x30] sm:$0xff] }
  0x8e   :  { %137 = vst.msk [vmem:[#allocation2 + $0x20] sm:$0xff] %vm120_vm2, %v135_v26  ;;  %361 = vmatpush3.msra.mxu0 %v201_v27 }
  0x8f   :  { %362 = vmatprep.subr.mxu0 %v404_v11 }
  0x90   :  { %v41_v28 = vpop.permute.xlu0 %40  ;;  %v131_v29 = vpop.permute.xlu1 %130 }
  0x91   :  { %43 = vst.msk [vmem:[#allocation2 + $0x18] sm:$0xff] %vm29_vm0, %v41_v28  ;;  %v200_v30 = vld [vmem:[#allocation2 + $0x28] sm:$0xff] }
  0x92   :  { %133 = vst.msk [vmem:[#allocation2 + $0x18] sm:$0xff] %vm120_vm2, %v131_v29  ;;  %363 = vmatpush3.msra.mxu0 %v200_v30 }
  0x93   :  { %364 = vmatprep.subr.mxu0 %v404_v11 }
  0x94   :  { %v37_v31 = vpop.permute.xlu0 %36  ;;  %v127_v32 = vpop.permute.xlu1 %126 }
  0x95   :  { %39 = vst.msk [vmem:[#allocation2 + $0x10] sm:$0xff] %vm29_vm0, %v37_v31  ;;  %v199_v33 = vld [vmem:[#allocation2 + $0x20] sm:$0xff] }
  0x96   :  { %129 = vst.msk [vmem:[#allocation2 + $0x10] sm:$0xff] %vm120_vm2, %v127_v32  ;;  %365 = vmatpush3.msra.mxu0 %v199_v33 }
  0x97   :  { %366 = vmatprep.subr.mxu0 %v404_v11 }
  0x98   :  { %v33_v34 = vpop.permute.xlu0 %32  ;;  %v123_v35 = vpop.permute.xlu1 %122 }
  0x99   :  { %35 = vst.msk [vmem:[#allocation2 + $0x8] sm:$0xff] %vm29_vm0, %v33_v34  ;;  %v198_v36 = vld [vmem:[#allocation2 + $0x18] sm:$0xff] }
  0x9a   :  { %125 = vst.msk [vmem:[#allocation2 + $0x8] sm:$0xff] %vm120_vm2, %v123_v35  ;;  %367 = vmatpush3.msra.mxu0 %v198_v36 }
  0x9b   :  { %368 = vmatprep.subr.mxu0 %v404_v11 }
  0x9c   :  { %v118_v37 = vpop.permute.xlu0 %117  ;;  %v155_v38 = vpop.permute.xlu1 %154 }
  0x9d   :  { %121 = vst.msk [vmem:[#allocation2] sm:$0xff] %vm120_vm2, %v118_v37  ;;  %v197_v39 = vld [vmem:[#allocation2 + $0x10] sm:$0xff]  ;;  %v157_v40 = vadd.f32 %v464_v5, %v155_v38 }
  0x9e   :  { %369 = vmatpush3.msra.mxu0 %v197_v39 }
  0x9f   :  { %370 = vmatprep.subr.mxu0 %v404_v11 }
  0xa0   :  { %v159_v41 = vpop.permute.xlu0 %158  ;;  %v163_v42 = vpop.permute.xlu1 %162 }
  0xa1   :  { %v196_v43 = vld [vmem:[#allocation2 + $0x8] sm:$0xff]  ;;  %v161_v44 = vadd.f32 %v159_v41, %v157_v40 }
  0xa2   :  { %371 = vmatpush3.msra.mxu0 %v196_v43 }
  0xa3   :  { %372 = vmatprep.subr.mxu0 %v404_v11  ;;  %v165_v46 = vadd.f32 %v163_v42, %v161_v44 }
  0xa4   :  { %v195_v47 = vld [vmem:[#allocation2] sm:$0xff]  ;;  %v167_v48 = vpop.permute.xlu0 %166  ;;  %v171_v49 = vpop.permute.xlu1 %170 }
  0xa5   :  { %373 = vmatpush3.msra.mxu0 %v195_v47  ;;  %v169_v50 = vadd.f32 %v167_v48, %v165_v46 }
  0xa6   :  { %375 = vmatmul.mubr.msk.f32.vlgmr.msra.gmra.mxu0 %vm204_vm3, %v194_v45 }
  0xa7   :  { %v173_v51 = vadd.f32 %v171_v49, %v169_v50 }
  0xa8   :  { %v175_v52 = vpop.permute.xlu0 %174  ;;  %v179_v53 = vpop.permute.xlu1 %178 }
  0xa9   :  { %v177_v54 = vadd.f32 %v175_v52, %v173_v51 }
  0xab   :  { %v181_v55 = vadd.f32 %v179_v53, %v177_v54 }
  0xac   :  { %v183_v56 = vpop.permute.xlu0 %182 }
  0xad   :  { %v185_v57 = vadd.f32 %v183_v56, %v181_v55 }
  0xaf   :  { %v186_v58 = vmul.f32 8.0, %v185_v57 }
  0xb0   :  { %v65_v59 = vpop.permute.xlu0 %64 }
  0xb1   :  { %v187_v60 = vadd.f32 1e-08, %v186_v58  ;;  %v190_v61 = vmax.f32 %v186_v58, 0.0  ;;  %v67_v2 = vadd.f32 %v65_v59, %v459_v4 }
  0xb3   :  { %399 = vrcp.f32 %v187_v60  ;;  %v191_v62 = vmin.f32 %v190_v61, 1.0 }
  0xb4   :  { %v73_v1 = vpop.permute.xlu0 %72 }
  0xb5   :  { %v289_v63 = vpop.permute.xlu1 %288  ;;  %v318_v0 = vrot.slane %v191_v62, %v466_v7 }
  0xb7   :  { %v320_v3 = vmul.f32 %v318_v0, %v289_v63 }
  0xb8   :  { %v81_v8 = vpop.permute.xlu0 %80 }
  0xb9   :  { %v69_v5 = vpop.permute.xlu1 %68  ;;  %322 = vrot.lane.b32.xlu1 %v320_v3, %s422_s13 }
  0xba   :  { %v71_v6 = vadd.f32 %v69_v5, %v67_v2 }
  0xbc   :  { %v75_v9 = vadd.f32 %v73_v1, %v71_v6  ;;  %v89_v16 = vpop.permute.xlu0 %88 }
  0xbd   :  { %v77_v10 = vpop.permute.xlu1 %76 }
  0xbe   :  { %v79_v11 = vadd.f32 %v77_v10, %v75_v9 }
  0xc0   :  { %v400_v12 = vpop.eup %399  ;;  %v83_v13 = vadd.f32 %v81_v8, %v79_v11 }
  0xc1   :  { %v189_v14 = vmul.f32 72.0, %v400_v12  ;;  %v85_v15 = vpop.permute.xlu1 %84 }
  0xc2   :  { %v87_v17 = vadd.f32 %v85_v15, %v83_v13 }
  0xc3   :  { %v192_v18 = vmul.f32 %v191_v62, %v189_v14 }
  0xc4   :  { %v91_v19 = vadd.f32 %v89_v16, %v87_v17 }
  0xc5   :  { %v193_v20 = vmul.f32 %v192_v18, %v191_v62  ;;  %v93_v21 = vpop.permute.xlu1 %92 }
  0xc6   :  { %v95_v4 = vadd.f32 %v93_v21, %v91_v19 }
  0xc7   :  { %v309_v22 = vrot.slane %v193_v20, %v466_v7 }
  0xc8   :  { %v96_v23 = vmul.f32 8.0, %v95_v4 }
  0xc9   :  { %310 = vrot.lane.b32.xlu0 %v309_v22, %s422_s13 }
  0xca   :  { %v97_v24 = vadd.f32 1e-08, %v96_v23  ;;  %v100_v25 = vmax.f32 %v96_v23, 0.0 }
  0xcc   :  { %401 = vrcp.f32 %v97_v24  ;;  %v101_v26 = vmin.f32 %v100_v25, 1.0 }
  0xcd   :  { %330 = vrot.lane.b32.xlu0 %v318_v0, %s422_s13 }
  0xce   :  { %304 = vst.msk [vmem:[%s563_s5] sm:$0x1] %vm303_vm4, %v101_v26  ;;  %v295_v27 = vrot.slane %v101_v26, %v466_v7 }
  0xd0   :  { %v297_v28 = vmul.f32 %v295_v27, %v289_v63 }
  0xd9   :  { %v402_v29 = vpop.eup %401 }
  0xda   :  { %v99_v30 = vmul.f32 72.0, %v402_v29 }
  0xdc   :  { %v102_v31 = vmul.f32 %v101_v26, %v99_v30 }
  0xde   :  { %v103_v32 = vmul.f32 %v102_v31, %v101_v26 }
  0xe0   :  { %v283_v35 = vrot.slane %v103_v32, %v466_v7 }
 0x12b   :  { %v323_v39 = vpop.permute.xlu1 %322 }
 0x13b   :  { %v311_v33 = vpop.permute.xlu0 %310 }
 0x13f   :  { %v331_v34 = vpop.permute.xlu0 %330 }
 0x140   :  { %334 = vst.msk [vmem:[%s563_s5] sm:$0x1] %vm333_vm5, %v331_v34 }
 0x166   :  { %v274_v36 = vpop.f32.mrf.mxu0 }
 0x167   :  { %v285_v37 = vmul.f32 %v283_v35, %v274_v36  ;;  %v313_v38 = vmul.f32 %v311_v33, %v274_v36 }
 0x168   :  { %v376_v40 = vpop.f32.mrf.mxu0 }
 0x169   :  { %v298_v41 = vadd.f32 %v297_v28, %v285_v37  ;;  %v325_v42 = vadd.f32 %v323_v39, %v313_v38 }
 0x16b   :  { %v299_v43 = vmax.f32 %v298_v41, 0.0  ;;  %v326_v44 = vmax.f32 %v325_v42, 0.0 }
 0x16d   :  { %v300_v45 = vpack.c.bf16 %v299_v43, %v299_v43  ;;  %v327_v46 = vpack.c.bf16 %v326_v44, %v326_v44 }
 0x16f   :  { %302 = vst.msk [vmem:[%s564_s4] sm:$0xf] %vm301_vm6, %v300_v45 }
 0x170   :  { %329 = vst.msk [vmem:[%s564_s4] sm:$0xf] %vm328_vm7, %v327_v46 }

// kernel: dincae_pconvs_forward.13
= control target key start
LH: loop header
LB: loop body
LE: loop exit
PB: predicated region body
PF: predicated region fallthrough
CT: control target
= control target key end

     0   :  { %v23_v0 = vlaneseq  ;;  %v396_v2 = vmov 0   ;;  %v397_v11 = vmov 0.0   ;;  %vm29_vm0 = vcmask 64512   ;;  %s400_s24 = smov 126   ;;  %s401_s25 = smov 127   ;;  %s557_s0 = inlined_call_operand.vmem [shape: bf16[2,8,20], index: 0, kind: input, shape index: {}]   ;;  %s558_s1 = inlined_call_operand.vmem [shape: f32[2,1,20], index: 1, kind: input, shape index: {}]   ;;  %s559_s3 = inlined_call_operand.vmem [shape: f32[8,1], index: 3, kind: input, shape index: {}]   ;;  %s560_s2 = inlined_call_operand.vmem [shape: f32[8,72], index: 2, kind: input, shape index: {}]   ;;  %s561_s5 = inlined_call_operand.vmem [shape: f32[1,1,16], index: 5, kind: output, shape index: {1}]   ;;  %s562_s4 = inlined_call_operand.vmem [shape: bf16[1,8,16], index: 4, kind: output, shape index: {0}]  }
   0x1   :  { %v19_v1 = vld [vmem:[%s557_s0] sm:$0xff]   ;;  %391 = vset.pattern.permute.xlu0 %v396_v2  ;;  %353 = vmatprep.subr.mxu0 %v397_v11  ;;  %s398_s0 = smov 118   ;;  %s402_s26 = smov 120   ;;  %vm410_vm1 = vmmov 0   ;;  %vm120_vm2 = vcmask 130112   ;;  %vm201_vm3 = vcmask 588800  }
   0x2   :  { %v24_v3 = vshrl.u32 %v23_v0, 7  ;;  %v449_v4 = vld [vmem:[%s558_s1] sm:$0x1]  ;;  %v454_v5 = vld [vmem:[%s558_s1 + $0x1] sm:$0x1]  ;;  %v20_v6 = vunpack.c.l.bf16 %v19_v1  ;;  %v106_v9 = vunpack.c.h.bf16 %v19_v1  ;;  %s399_s1 = smov 119   ;;  %371 = vmatprep.mubr.msk.f32.mxu0 %vm410_vm1, %v397_v11 }
   0x3   :  { %s403_s27 = smov 122   ;;  %s404_s28 = smov 2   ;;  %v275_v14 = vld [vmem:[%s559_s3] sm:$0xff]  ;;  %vm300_vm4 = vcmask 57344   ;;  %vm330_vm5 = vcmask 122944   ;;  %vm298_vm6 = vcmask 60416  }
   0x4   :  { %v456_v7 = vsub.s32 0, %v24_v3  ;;  %s405_s29 = smov 123   ;;  %s406_s30 = smov 3   ;;  %v191_v46 = vld [vmem:[%s560_s2] sm:$0xff]  ;;  %vm325_vm7 = vcmask 126016  }
   0x5   :  { %s407_s6 = smov 124   ;;  %s408_s7 = smov 4  }
   0x6   :  { %v26_v8 = vrot.slane %v449_v4, %v456_v7  ;;  %v113_v10 = vrot.slane %v454_v5, %v456_v7  ;;  %s409_s8 = smov 6   ;;  %s411_s9 = smov 7  }
   0x7   :  { %s412_s10 = smov 8  }
   0x8   :  { %v28_v12 = vmul.f32 %v26_v8, %v20_v6  ;;  %v115_v13 = vmul.f32 %v113_v10, %v106_v9 }
   0xa   :  { %60 = vrot.lane.b32.xlu0 %v28_v12, %s398_s0  ;;  %56 = vrot.lane.b32.xlu1 %v28_v12, %s399_s1  ;;  %30 = vst.msk [vmem:[#allocation2] sm:$0xff] %vm29_vm0, %v28_v12 }
   0xe   :  { %147 = vrot.lane.b32.xlu0 %v115_v13, %s400_s24  ;;  %143 = vrot.lane.b32.xlu1 %v115_v13, %s401_s25 }
  0x12   :  { %52 = vrot.lane.b32.xlu0 %v28_v12, %s402_s26  ;;  %48 = vrot.lane.b32.xlu1 %v28_v12, %s403_s27 }
  0x16   :  { %138 = vrot.lane.b32.xlu0 %v115_v13, %s404_s28  ;;  %44 = vrot.lane.b32.xlu1 %v28_v12, %s405_s29 }
  0x1a   :  { %134 = vrot.lane.b32.xlu0 %v115_v13, %s406_s30  ;;  %40 = vrot.lane.b32.xlu1 %v28_v12, %s407_s6 }
  0x1e   :  { %130 = vrot.lane.b32.xlu0 %v115_v13, %s408_s7  ;;  %36 = vrot.lane.b32.xlu1 %v28_v12, %s400_s24 }
  0x22   :  { %126 = vrot.lane.b32.xlu0 %v115_v13, %s409_s8  ;;  %32 = vrot.lane.b32.xlu1 %v28_v12, %s401_s25 }
  0x26   :  { %122 = vrot.lane.b32.xlu0 %v115_v13, %s411_s9  ;;  %117 = vrot.lane.b32.xlu1 %v115_v13, %s412_s10 }
  0x2a   :  { %151 = vrot.lane.b32.xlu0 %v454_v5, %s401_s25  ;;  %155 = vrot.lane.b32.xlu1 %v454_v5, %s400_s24 }
  0x2e   :  { %159 = vrot.lane.b32.xlu0 %v454_v5, %s407_s6  ;;  %163 = vrot.lane.b32.xlu1 %v454_v5, %s405_s29 }
  0x32   :  { %167 = vrot.lane.b32.xlu0 %v454_v5, %s403_s27  ;;  %171 = vrot.lane.b32.xlu1 %v454_v5, %s402_s26 }
  0x36   :  { %175 = vrot.lane.b32.xlu0 %v454_v5, %s399_s1  ;;  %179 = vrot.lane.b32.xlu1 %v454_v5, %s398_s0 }
  0x3a   :  { %285 = vperm.xlu0 %391, %v275_v14   ;;  %64 = vrot.lane.b32.xlu1 %v449_v4, %s401_s25 }
  0x3e   :  { %68 = vrot.lane.b32.xlu1 %v449_v4, %s400_s24  ;;  %72 = vrot.lane.b32.xlu0 %v449_v4, %s407_s6 }
  0x42   :  { %76 = vrot.lane.b32.xlu1 %v449_v4, %s405_s29  ;;  %80 = vrot.lane.b32.xlu0 %v449_v4, %s403_s27 }
  0x46   :  { %84 = vrot.lane.b32.xlu1 %v449_v4, %s402_s26  ;;  %88 = vrot.lane.b32.xlu0 %v449_v4, %s399_s1 }
  0x4a   :  { %92 = vrot.lane.b32.xlu1 %v449_v4, %s398_s0 }
  0x7c   :  { %v61_v15 = vpop.permute.xlu0 %60  ;;  %v57_v16 = vpop.permute.xlu1 %56 }
  0x7d   :  { %63 = vst.msk [vmem:[#allocation2 + $0x40] sm:$0xff] %vm29_vm0, %v61_v15  ;;  %59 = vst.msk [vmem:[#allocation2 + $0x38] sm:$0xff] %vm29_vm0, %v57_v16 }
  0x80   :  { %v148_v17 = vpop.permute.xlu0 %147  ;;  %v144_v18 = vpop.permute.xlu1 %143 }
  0x81   :  { %150 = vst.msk [vmem:[#allocation2 + $0x40] sm:$0xff] %vm120_vm2, %v148_v17  ;;  %146 = vst.msk [vmem:[#allocation2 + $0x38] sm:$0xff] %vm120_vm2, %v144_v18 }
  0x84   :  { %v53_v19 = vpop.permute.xlu0 %52  ;;  %v49_v20 = vpop.permute.xlu1 %48 }
  0x85   :  { %55 = vst.msk [vmem:[#allocation2 + $0x30] sm:$0xff] %vm29_vm0, %v53_v19  ;;  %51 = vst.msk [vmem:[#allocation2 + $0x28] sm:$0xff] %vm29_vm0, %v49_v20 }
  0x86   :  { %142 = vst.msk [vmem:[#allocation2 + $0x30] sm:$0xff] %vm120_vm2, %v115_v13 }
  0x88   :  { %v139_v21 = vpop.permute.xlu0 %138  ;;  %v200_v22 = vld [vmem:[#allocation2 + $0x40] sm:$0xff]  ;;  %v45_v23 = vpop.permute.xlu1 %44  ;;  %v199_v24 = vld [vmem:[#allocation2 + $0x38] sm:$0xff] }
  0x89   :  { %141 = vst.msk [vmem:[#allocation2 + $0x28] sm:$0xff] %vm120_vm2, %v139_v21  ;;  %354 = vmatpush3.msra.mxu0 %v200_v22 }
  0x8a   :  { %47 = vst.msk [vmem:[#allocation2 + $0x20] sm:$0xff] %vm29_vm0, %v45_v23  ;;  %355 = vmatprep.subr.mxu0 %v397_v11 }
  0x8b   :  { %356 = vmatpush3.msra.mxu0 %v199_v24 }
  0x8c   :  { %v135_v25 = vpop.permute.xlu0 %134  ;;  %v41_v26 = vpop.permute.xlu1 %40  ;;  %357 = vmatprep.subr.mxu0 %v397_v11 }
  0x8d   :  { %137 = vst.msk [vmem:[#allocation2 + $0x20] sm:$0xff] %vm120_vm2, %v135_v25  ;;  %v198_v27 = vld [vmem:[#allocation2 + $0x30] sm:$0xff] }
  0x8e   :  { %43 = vst.msk [vmem:[#allocation2 + $0x18] sm:$0xff] %vm29_vm0, %v41_v26  ;;  %358 = vmatpush3.msra.mxu0 %v198_v27 }
  0x8f   :  { %359 = vmatprep.subr.mxu0 %v397_v11 }
  0x90   :  { %v131_v28 = vpop.permute.xlu0 %130  ;;  %v197_v29 = vld [vmem:[#allocation2 + $0x28] sm:$0xff]  ;;  %v37_v30 = vpop.permute.xlu1 %36 }
  0x91   :  { %133 = vst.msk [vmem:[#allocation2 + $0x18] sm:$0xff] %vm120_vm2, %v131_v28  ;;  %360 = vmatpush3.msra.mxu0 %v197_v29 }
  0x92   :  { %39 = vst.msk [vmem:[#allocation2 + $0x10] sm:$0xff] %vm29_vm0, %v37_v30  ;;  %361 = vmatprep.subr.mxu0 %v397_v11 }
  0x94   :  { %v127_v31 = vpop.permute.xlu0 %126  ;;  %v196_v32 = vld [vmem:[#allocation2 + $0x20] sm:$0xff]  ;;  %v33_v33 = vpop.permute.xlu1 %32 }
  0x95   :  { %129 = vst.msk [vmem:[#allocation2 + $0x10] sm:$0xff] %vm120_vm2, %v127_v31  ;;  %362 = vmatpush3.msra.mxu0 %v196_v32 }
  0x96   :  { %35 = vst.msk [vmem:[#allocation2 + $0x8] sm:$0xff] %vm29_vm0, %v33_v33  ;;  %363 = vmatprep.subr.mxu0 %v397_v11 }
  0x98   :  { %v123_v34 = vpop.permute.xlu0 %122  ;;  %v195_v35 = vld [vmem:[#allocation2 + $0x18] sm:$0xff]  ;;  %v118_v36 = vpop.permute.xlu1 %117 }
  0x99   :  { %125 = vst.msk [vmem:[#allocation2 + $0x8] sm:$0xff] %vm120_vm2, %v123_v34  ;;  %364 = vmatpush3.msra.mxu0 %v195_v35  ;;  %121 = vst.msk [vmem:[#allocation2] sm:$0xff] %vm120_vm2, %v118_v36 }
  0x9a   :  { %365 = vmatprep.subr.mxu0 %v397_v11 }
  0x9c   :  { %v194_v37 = vld [vmem:[#allocation2 + $0x10] sm:$0xff]  ;;  %v152_v38 = vpop.permute.xlu0 %151  ;;  %v156_v39 = vpop.permute.xlu1 %155 }
  0x9d   :  { %366 = vmatpush3.msra.mxu0 %v194_v37  ;;  %v154_v40 = vadd.f32 %v454_v5, %v152_v38 }
  0x9e   :  { %367 = vmatprep.subr.mxu0 %v397_v11 }
  0x9f   :  { %v158_v41 = vadd.f32 %v156_v39, %v154_v40 }
  0xa0   :  { %v193_v42 = vld [vmem:[#allocation2 + $0x8] sm:$0xff]  ;;  %v192_v43 = vld [vmem:[#allocation2] sm:$0xff]  ;;  %v160_v44 = vpop.permute.xlu0 %159  ;;  %v164_v45 = vpop.permute.xlu1 %163 }
  0xa1   :  { %368 = vmatpush3.msra.mxu0 %v193_v42  ;;  %v162_v47 = vadd.f32 %v160_v44, %v158_v41 }
  0xa2   :  { %369 = vmatprep.subr.mxu0 %v397_v11 }
  0xa3   :  { %370 = vmatpush3.msra.mxu0 %v192_v43  ;;  %v166_v48 = vadd.f32 %v164_v45, %v162_v47 }
  0xa4   :  { %372 = vmatmul.mubr.msk.f32.vlgmr.msra.gmra.mxu0 %vm201_vm3, %v191_v46  ;;  %v168_v49 = vpop.permute.xlu0 %167  ;;  %v172_v50 = vpop.permute.xlu1 %171 }
  0xa5   :  { %v170_v51 = vadd.f32 %v168_v49, %v166_v48 }
  0xa7   :  { %v174_v52 = vadd.f32 %v172_v50, %v170_v51 }
  0xa8   :  { %v176_v53 = vpop.permute.xlu0 %175  ;;  %v180_v54 = vpop.permute.xlu1 %179 }
  0xa9   :  { %v178_v55 = vadd.f32 %v176_v53, %v174_v52 }
  0xab   :  { %v182_v56 = vadd.f32 %v180_v54, %v178_v55 }
  0xac   :  { %v65_v57 = vpop.permute.xlu1 %64 }
  0xad   :  { %v183_v58 = vmul.f32 8.0, %v182_v56  ;;  %v67_v63 = vadd.f32 %v65_v57, %v449_v4 }
  0xaf   :  { %v184_v59 = vadd.f32 1e-08, %v183_v58  ;;  %v187_v60 = vmax.f32 %v183_v58, 0.0 }
  0xb0   :  { %v69_v61 = vpop.permute.xlu1 %68 }
  0xb1   :  { %392 = vrcp.f32 %v184_v59  ;;  %v188_v62 = vmin.f32 %v187_v60, 1.0  ;;  %v71_v5 = vadd.f32 %v69_v61, %v67_v63 }
  0xb3   :  { %v315_v0 = vrot.slane %v188_v62, %v456_v7 }
  0xb4   :  { %v77_v2 = vpop.permute.xlu1 %76 }
  0xb5   :  { %v286_v1 = vpop.permute.xlu0 %285 }
  0xb6   :  { %v317_v3 = vmul.f32 %v315_v0, %v286_v1 }
  0xb8   :  { %319 = vrot.lane.b32.xlu1 %v317_v3, %s412_s10  ;;  %v85_v9 = vpop.permute.xlu1 %84 }
  0xb9   :  { %v73_v6 = vpop.permute.xlu0 %72 }
  0xba   :  { %v75_v8 = vadd.f32 %v73_v6, %v71_v5 }
  0xbc   :  { %v79_v10 = vadd.f32 %v77_v2, %v75_v8  ;;  %v93_v4 = vpop.permute.xlu1 %92 }
  0xbd   :  { %v81_v11 = vpop.permute.xlu0 %80 }
  0xbe   :  { %v393_v12 = vpop.eup %392  ;;  %v83_v13 = vadd.f32 %v81_v11, %v79_v10 }
  0xbf   :  { %v186_v14 = vmul.f32 72.0, %v393_v12 }
  0xc0   :  { %v87_v15 = vadd.f32 %v85_v9, %v83_v13 }
  0xc1   :  { %v189_v16 = vmul.f32 %v188_v62, %v186_v14  ;;  %v89_v17 = vpop.permute.xlu0 %88 }
  0xc2   :  { %v91_v18 = vadd.f32 %v89_v17, %v87_v15 }
  0xc3   :  { %v190_v19 = vmul.f32 %v189_v16, %v188_v62 }
  0xc4   :  { %v95_v20 = vadd.f32 %v93_v4, %v91_v18 }
  0xc5   :  { %v306_v21 = vrot.slane %v190_v19, %v456_v7 }
  0xc6   :  { %v96_v22 = vmul.f32 8.0, %v95_v20 }
  0xc7   :  { %307 = vrot.lane.b32.xlu0 %v306_v21, %s412_s10 }
  0xc8   :  { %v97_v23 = vadd.f32 1e-08, %v96_v22  ;;  %v100_v24 = vmax.f32 %v96_v22, 0.0 }
  0xca   :  { %394 = vrcp.f32 %v97_v23  ;;  %v101_v25 = vmin.f32 %v100_v24, 1.0 }
  0xcb   :  { %327 = vrot.lane.b32.xlu0 %v315_v0, %s412_s10 }
  0xcc   :  { %301 = vst.msk [vmem:[%s561_s5] sm:$0x1] %vm300_vm4, %v101_v25  ;;  %v292_v26 = vrot.slane %v101_v25, %v456_v7 }
  0xce   :  { %v294_v27 = vmul.f32 %v292_v26, %v286_v1 }
  0xd7   :  { %v395_v28 = vpop.eup %394 }
  0xd8   :  { %v99_v29 = vmul.f32 72.0, %v395_v28 }
  0xda   :  { %v102_v30 = vmul.f32 %v101_v25, %v99_v29 }
  0xdc   :  { %v103_v31 = vmul.f32 %v102_v30, %v101_v25 }
  0xde   :  { %v280_v34 = vrot.slane %v103_v31, %v456_v7 }
 0x12a   :  { %v320_v38 = vpop.permute.xlu1 %319 }
 0x139   :  { %v308_v32 = vpop.permute.xlu0 %307 }
 0x13d   :  { %v328_v33 = vpop.permute.xlu0 %327 }
 0x13e   :  { %331 = vst.msk [vmem:[%s561_s5] sm:$0x1] %vm330_vm5, %v328_v33 }
 0x164   :  { %v271_v35 = vpop.f32.mrf.mxu0 }
 0x165   :  { %v282_v36 = vmul.f32 %v280_v34, %v271_v35  ;;  %v310_v37 = vmul.f32 %v308_v32, %v271_v35 }
 0x166   :  { %v373_v39 = vpop.f32.mrf.mxu0 }
 0x167   :  { %v295_v40 = vadd.f32 %v294_v27, %v282_v36  ;;  %v322_v41 = vadd.f32 %v320_v38, %v310_v37 }
 0x169   :  { %v296_v42 = vmax.f32 %v295_v40, 0.0  ;;  %v323_v43 = vmax.f32 %v322_v41, 0.0 }
 0x16b   :  { %v297_v44 = vpack.c.bf16 %v296_v42, %v296_v42  ;;  %v324_v45 = vpack.c.bf16 %v323_v43, %v323_v43 }
 0x16d   :  { %299 = vst.msk [vmem:[%s562_s4] sm:$0xf] %vm298_vm6, %v297_v44 }
 0x16e   :  { %326 = vst.msk [vmem:[%s562_s4] sm:$0xf] %vm325_vm7, %v324_v45 }

// kernel: dincae_pconvs_forward.14
= control target key start
LH: loop header
LB: loop body
LE: loop exit
PB: predicated region body
PF: predicated region fallthrough
CT: control target
= control target key end

     0   :  { %v23_v0 = vlaneseq  ;;  %v393_v2 = vmov 0   ;;  %v394_v11 = vmov 0.0   ;;  %vm29_vm0 = vcmask 23552   ;;  %s397_s24 = smov 123   ;;  %s398_s25 = smov 124   ;;  %s560_s0 = inlined_call_operand.vmem [shape: bf16[2,8,12], index: 0, kind: input, shape index: {}]   ;;  %s561_s1 = inlined_call_operand.vmem [shape: f32[2,1,12], index: 1, kind: input, shape index: {}]   ;;  %s562_s3 = inlined_call_operand.vmem [shape: f32[8,1], index: 3, kind: input, shape index: {}]   ;;  %s563_s2 = inlined_call_operand.vmem [shape: f32[8,72], index: 2, kind: input, shape index: {}]   ;;  %s564_s5 = inlined_call_operand.vmem [shape: f32[1,1,6], index: 5, kind: output, shape index: {1}]   ;;  %s565_s4 = inlined_call_operand.vmem [shape: bf16[1,8,6], index: 4, kind: output, shape index: {0}]  }
   0x1   :  { %v19_v1 = vld [vmem:[%s560_s0] sm:$0xff]   ;;  %388 = vset.pattern.permute.xlu0 %v393_v2  ;;  %353 = vmatprep.subr.mxu0 %v394_v11  ;;  %s395_s0 = smov 120   ;;  %s399_s26 = smov 122   ;;  %vm404_vm1 = vmmov 0   ;;  %vm120_vm2 = vcmask 48152   ;;  %vm201_vm3 = vcmask 588800  }
   0x2   :  { %v24_v3 = vshrl.u32 %v23_v0, 7  ;;  %v443_v4 = vld [vmem:[%s561_s1] sm:$0x1]  ;;  %v448_v5 = vld [vmem:[%s561_s1 + $0x1] sm:$0x1]  ;;  %v20_v6 = vunpack.c.l.bf16 %v19_v1  ;;  %v106_v9 = vunpack.c.h.bf16 %v19_v1  ;;  %s396_s1 = smov 121   ;;  %371 = vmatprep.mubr.msk.f32.mxu0 %vm404_vm1, %v394_v11 }
   0x3   :  { %s400_s27 = smov 125   ;;  %s401_s28 = smov 126   ;;  %v275_v14 = vld [vmem:[%s562_s3] sm:$0xff]  ;;  %vm300_vm4 = vcmask 16384   ;;  %vm330_vm5 = vcmask 40984   ;;  %vm298_vm6 = vcmask 19456  }
   0x4   :  { %v450_v7 = vsub.s32 0, %v24_v3  ;;  %s402_s29 = smov 127   ;;  %s403_s30 = smov 1   ;;  %v191_v46 = vld [vmem:[%s563_s2] sm:$0xff]  ;;  %vm325_vm7 = vcmask 44056  }
   0x5   :  { %s405_s6 = smov 2   ;;  %s406_s7 = smov 3  }
   0x6   :  { %v26_v8 = vrot.slane %v443_v4, %v450_v7  ;;  %v113_v10 = vrot.slane %v448_v5, %v450_v7 }
   0x8   :  { %v28_v12 = vmul.f32 %v26_v8, %v20_v6  ;;  %v459_v13 = vmul.f32 %v113_v10, %v106_v9 }
   0xa   :  { %60 = vrot.lane.b32.xlu0 %v28_v12, %s395_s0  ;;  %56 = vrot.lane.b32.xlu1 %v28_v12, %s396_s1  ;;  %30 = vst.msk [vmem:[#allocation2] sm:$0xff] %vm29_vm0, %v28_v12 }
   0xe   :  { %147 = vrot.lane.b32.xlu0 %v459_v13, %s397_s24  ;;  %143 = vrot.lane.b32.xlu1 %v459_v13, %s398_s25 }
  0x12   :  { %52 = vrot.lane.b32.xlu0 %v28_v12, %s399_s26  ;;  %139 = vrot.lane.b32.xlu1 %v459_v13, %s400_s27 }
  0x16   :  { %48 = vrot.lane.b32.xlu0 %v28_v12, %s397_s24  ;;  %135 = vrot.lane.b32.xlu1 %v459_v13, %s401_s28 }
  0x1a   :  { %44 = vrot.lane.b32.xlu0 %v28_v12, %s398_s25  ;;  %131 = vrot.lane.b32.xlu1 %v459_v13, %s402_s29 }
  0x1e   :  { %40 = vrot.lane.b32.xlu0 %v28_v12, %s400_s27  ;;  %36 = vrot.lane.b32.xlu1 %v28_v12, %s401_s28 }
  0x22   :  { %126 = vrot.lane.b32.xlu0 %v459_v13, %s403_s30  ;;  %32 = vrot.lane.b32.xlu1 %v28_v12, %s402_s29 }
  0x26   :  { %122 = vrot.lane.b32.xlu0 %v459_v13, %s405_s6  ;;  %117 = vrot.lane.b32.xlu1 %v459_v13, %s406_s7 }
  0x2a   :  { %151 = vrot.lane.b32.xlu0 %v448_v5, %s402_s29  ;;  %155 = vrot.lane.b32.xlu1 %v448_v5, %s401_s28 }
  0x2e   :  { %159 = vrot.lane.b32.xlu0 %v448_v5, %s400_s27  ;;  %163 = vrot.lane.b32.xlu1 %v448_v5, %s398_s25 }
  0x32   :  { %167 = vrot.lane.b32.xlu0 %v448_v5, %s397_s24  ;;  %171 = vrot.lane.b32.xlu1 %v448_v5, %s399_s26 }
  0x36   :  { %175 = vrot.lane.b32.xlu0 %v448_v5, %s396_s1  ;;  %179 = vrot.lane.b32.xlu1 %v448_v5, %s395_s0 }
  0x3a   :  { %285 = vperm.xlu0 %388, %v275_v14   ;;  %64 = vrot.lane.b32.xlu1 %v443_v4, %s402_s29 }
  0x3e   :  { %68 = vrot.lane.b32.xlu1 %v443_v4, %s401_s28  ;;  %72 = vrot.lane.b32.xlu0 %v443_v4, %s400_s27 }
  0x42   :  { %76 = vrot.lane.b32.xlu1 %v443_v4, %s398_s25  ;;  %80 = vrot.lane.b32.xlu0 %v443_v4, %s397_s24 }
  0x46   :  { %84 = vrot.lane.b32.xlu1 %v443_v4, %s399_s26  ;;  %88 = vrot.lane.b32.xlu0 %v443_v4, %s396_s1 }
  0x4a   :  { %92 = vrot.lane.b32.xlu1 %v443_v4, %s395_s0 }
  0x7c   :  { %v61_v15 = vpop.permute.xlu0 %60  ;;  %v57_v16 = vpop.permute.xlu1 %56 }
  0x7d   :  { %63 = vst.msk [vmem:[#allocation2 + $0x40] sm:$0xff] %vm29_vm0, %v61_v15  ;;  %59 = vst.msk [vmem:[#allocation2 + $0x38] sm:$0xff] %vm29_vm0, %v57_v16 }
  0x80   :  { %v148_v17 = vpop.permute.xlu0 %147  ;;  %v144_v18 = vpop.permute.xlu1 %143 }
  0x81   :  { %150 = vst.msk [vmem:[#allocation2 + $0x40] sm:$0xff] %vm120_vm2, %v148_v17  ;;  %146 = vst.msk [vmem:[#allocation2 + $0x38] sm:$0xff] %vm120_vm2, %v144_v18 }
  0x84   :  { %v53_v19 = vpop.permute.xlu0 %52  ;;  %v140_v20 = vpop.permute.xlu1 %139 }
  0x85   :  { %55 = vst.msk [vmem:[#allocation2 + $0x30] sm:$0xff] %vm29_vm0, %v53_v19 }
  0x86   :  { %142 = vst.msk [vmem:[#allocation2 + $0x30] sm:$0xff] %vm120_vm2, %v140_v20 }
  0x88   :  { %v49_v21 = vpop.permute.xlu0 %48  ;;  %v200_v22 = vld [vmem:[#allocation2 + $0x40] sm:$0xff]  ;;  %v136_v23 = vpop.permute.xlu1 %135  ;;  %v199_v24 = vld [vmem:[#allocation2 + $0x38] sm:$0xff] }
  0x89   :  { %51 = vst.msk [vmem:[#allocation2 + $0x28] sm:$0xff] %vm29_vm0, %v49_v21  ;;  %354 = vmatpush3.msra.mxu0 %v200_v22 }
  0x8a   :  { %138 = vst.msk [vmem:[#allocation2 + $0x28] sm:$0xff] %vm120_vm2, %v136_v23  ;;  %355 = vmatprep.subr.mxu0 %v394_v11 }
  0x8b   :  { %356 = vmatpush3.msra.mxu0 %v199_v24 }
  0x8c   :  { %v45_v25 = vpop.permute.xlu0 %44  ;;  %v132_v26 = vpop.permute.xlu1 %131  ;;  %357 = vmatprep.subr.mxu0 %v394_v11 }
  0x8d   :  { %47 = vst.msk [vmem:[#allocation2 + $0x20] sm:$0xff] %vm29_vm0, %v45_v25  ;;  %v198_v27 = vld [vmem:[#allocation2 + $0x30] sm:$0xff] }
  0x8e   :  { %134 = vst.msk [vmem:[#allocation2 + $0x20] sm:$0xff] %vm120_vm2, %v132_v26  ;;  %358 = vmatpush3.msra.mxu0 %v198_v27 }
  0x8f   :  { %359 = vmatprep.subr.mxu0 %v394_v11 }
  0x90   :  { %v41_v28 = vpop.permute.xlu0 %40  ;;  %v37_v29 = vpop.permute.xlu1 %36 }
  0x91   :  { %43 = vst.msk [vmem:[#allocation2 + $0x18] sm:$0xff] %vm29_vm0, %v41_v28  ;;  %39 = vst.msk [vmem:[#allocation2 + $0x10] sm:$0xff] %vm29_vm0, %v37_v29  ;;  %v197_v30 = vld [vmem:[#allocation2 + $0x28] sm:$0xff] }
  0x92   :  { %130 = vst.msk [vmem:[#allocation2 + $0x18] sm:$0xff] %vm120_vm2, %v459_v13  ;;  %360 = vmatpush3.msra.mxu0 %v197_v30 }
  0x93   :  { %361 = vmatprep.subr.mxu0 %v394_v11 }
  0x94   :  { %v127_v31 = vpop.permute.xlu0 %126  ;;  %v33_v32 = vpop.permute.xlu1 %32 }
  0x95   :  { %129 = vst.msk [vmem:[#allocation2 + $0x10] sm:$0xff] %vm120_vm2, %v127_v31  ;;  %v196_v33 = vld [vmem:[#allocation2 + $0x20] sm:$0xff] }
  0x96   :  { %35 = vst.msk [vmem:[#allocation2 + $0x8] sm:$0xff] %vm29_vm0, %v33_v32  ;;  %362 = vmatpush3.msra.mxu0 %v196_v33 }
  0x97   :  { %363 = vmatprep.subr.mxu0 %v394_v11 }
  0x98   :  { %v123_v34 = vpop.permute.xlu0 %122  ;;  %v118_v35 = vpop.permute.xlu1 %117 }
  0x99   :  { %125 = vst.msk [vmem:[#allocation2 + $0x8] sm:$0xff] %vm120_vm2, %v123_v34  ;;  %121 = vst.msk [vmem:[#allocation2] sm:$0xff] %vm120_vm2, %v118_v35  ;;  %v195_v36 = vld [vmem:[#allocation2 + $0x18] sm:$0xff] }
  0x9a   :  { %364 = vmatpush3.msra.mxu0 %v195_v36 }
  0x9b   :  { %365 = vmatprep.subr.mxu0 %v394_v11 }
  0x9c   :  { %v194_v37 = vld [vmem:[#allocation2 + $0x10] sm:$0xff]  ;;  %v152_v38 = vpop.permute.xlu0 %151  ;;  %v156_v39 = vpop.permute.xlu1 %155 }
  0x9d   :  { %366 = vmatpush3.msra.mxu0 %v194_v37  ;;  %v154_v40 = vadd.f32 %v448_v5, %v152_v38 }
  0x9e   :  { %367 = vmatprep.subr.mxu0 %v394_v11 }
  0x9f   :  { %v158_v41 = vadd.f32 %v156_v39, %v154_v40 }
  0xa0   :  { %v193_v42 = vld [vmem:[#allocation2 + $0x8] sm:$0xff]  ;;  %v192_v43 = vld [vmem:[#allocation2] sm:$0xff]  ;;  %v160_v44 = vpop.permute.xlu0 %159  ;;  %v164_v45 = vpop.permute.xlu1 %163 }
  0xa1   :  { %368 = vmatpush3.msra.mxu0 %v193_v42  ;;  %v162_v47 = vadd.f32 %v160_v44, %v158_v41 }
  0xa2   :  { %369 = vmatprep.subr.mxu0 %v394_v11 }
  0xa3   :  { %370 = vmatpush3.msra.mxu0 %v192_v43  ;;  %v166_v48 = vadd.f32 %v164_v45, %v162_v47 }
  0xa4   :  { %372 = vmatmul.mubr.msk.f32.vlgmr.msra.gmra.mxu0 %vm201_vm3, %v191_v46  ;;  %v168_v49 = vpop.permute.xlu0 %167  ;;  %v172_v50 = vpop.permute.xlu1 %171 }
  0xa5   :  { %v170_v51 = vadd.f32 %v168_v49, %v166_v48 }
  0xa7   :  { %v174_v52 = vadd.f32 %v172_v50, %v170_v51 }
  0xa8   :  { %v176_v53 = vpop.permute.xlu0 %175  ;;  %v180_v54 = vpop.permute.xlu1 %179 }
  0xa9   :  { %v178_v55 = vadd.f32 %v176_v53, %v174_v52 }
  0xab   :  { %v182_v56 = vadd.f32 %v180_v54, %v178_v55 }
  0xac   :  { %v65_v57 = vpop.permute.xlu1 %64 }
  0xad   :  { %v183_v58 = vmul.f32 8.0, %v182_v56  ;;  %v67_v63 = vadd.f32 %v65_v57, %v443_v4 }
  0xaf   :  { %v184_v59 = vadd.f32 1e-08, %v183_v58  ;;  %v187_v60 = vmax.f32 %v183_v58, 0.0 }
  0xb0   :  { %v69_v61 = vpop.permute.xlu1 %68 }
  0xb1   :  { %389 = vrcp.f32 %v184_v59  ;;  %v188_v62 = vmin.f32 %v187_v60, 1.0  ;;  %v71_v5 = vadd.f32 %v69_v61, %v67_v63 }
  0xb3   :  { %v315_v0 = vrot.slane %v188_v62, %v450_v7 }
  0xb4   :  { %v77_v2 = vpop.permute.xlu1 %76 }
  0xb5   :  { %v286_v1 = vpop.permute.xlu0 %285 }
  0xb6   :  { %v317_v3 = vmul.f32 %v315_v0, %v286_v1 }
  0xb8   :  { %319 = vrot.lane.b32.xlu1 %v317_v3, %s406_s7  ;;  %v85_v9 = vpop.permute.xlu1 %84 }
  0xb9   :  { %v73_v6 = vpop.permute.xlu0 %72 }
  0xba   :  { %v75_v8 = vadd.f32 %v73_v6, %v71_v5 }
  0xbc   :  { %v79_v10 = vadd.f32 %v77_v2, %v75_v8  ;;  %v93_v4 = vpop.permute.xlu1 %92 }
  0xbd   :  { %v81_v11 = vpop.permute.xlu0 %80 }
  0xbe   :  { %v390_v12 = vpop.eup %389  ;;  %v83_v13 = vadd.f32 %v81_v11, %v79_v10 }
  0xbf   :  { %v186_v14 = vmul.f32 72.0, %v390_v12 }
  0xc0   :  { %v87_v15 = vadd.f32 %v85_v9, %v83_v13 }
  0xc1   :  { %v189_v16 = vmul.f32 %v188_v62, %v186_v14  ;;  %v89_v17 = vpop.permute.xlu0 %88 }
  0xc2   :  { %v91_v18 = vadd.f32 %v89_v17, %v87_v15 }
  0xc3   :  { %v190_v19 = vmul.f32 %v189_v16, %v188_v62 }
  0xc4   :  { %v95_v20 = vadd.f32 %v93_v4, %v91_v18 }
  0xc5   :  { %v306_v21 = vrot.slane %v190_v19, %v450_v7 }
  0xc6   :  { %v96_v22 = vmul.f32 8.0, %v95_v20 }
  0xc7   :  { %307 = vrot.lane.b32.xlu0 %v306_v21, %s406_s7 }
  0xc8   :  { %v97_v23 = vadd.f32 1e-08, %v96_v22  ;;  %v100_v24 = vmax.f32 %v96_v22, 0.0 }
  0xca   :  { %391 = vrcp.f32 %v97_v23  ;;  %v101_v25 = vmin.f32 %v100_v24, 1.0 }
  0xcb   :  { %327 = vrot.lane.b32.xlu0 %v315_v0, %s406_s7 }
  0xcc   :  { %301 = vst.msk [vmem:[%s564_s5] sm:$0x1] %vm300_vm4, %v101_v25  ;;  %v292_v26 = vrot.slane %v101_v25, %v450_v7 }
  0xce   :  { %v294_v27 = vmul.f32 %v292_v26, %v286_v1 }
  0xd7   :  { %v392_v28 = vpop.eup %391 }
  0xd8   :  { %v99_v29 = vmul.f32 72.0, %v392_v28 }
  0xda   :  { %v102_v30 = vmul.f32 %v101_v25, %v99_v29 }
  0xdc   :  { %v103_v31 = vmul.f32 %v102_v30, %v101_v25 }
  0xde   :  { %v280_v34 = vrot.slane %v103_v31, %v450_v7 }
 0x12a   :  { %v320_v38 = vpop.permute.xlu1 %319 }
 0x139   :  { %v308_v32 = vpop.permute.xlu0 %307 }
 0x13d   :  { %v328_v33 = vpop.permute.xlu0 %327 }
 0x13e   :  { %331 = vst.msk [vmem:[%s564_s5] sm:$0x1] %vm330_vm5, %v328_v33 }
 0x164   :  { %v271_v35 = vpop.f32.mrf.mxu0 }
 0x165   :  { %v282_v36 = vmul.f32 %v280_v34, %v271_v35  ;;  %v310_v37 = vmul.f32 %v308_v32, %v271_v35 }
 0x166   :  { %v373_v39 = vpop.f32.mrf.mxu0 }
 0x167   :  { %v295_v40 = vadd.f32 %v294_v27, %v282_v36  ;;  %v322_v41 = vadd.f32 %v320_v38, %v310_v37 }
 0x169   :  { %v296_v42 = vmax.f32 %v295_v40, 0.0  ;;  %v323_v43 = vmax.f32 %v322_v41, 0.0 }
 0x16b   :  { %v297_v44 = vpack.c.bf16 %v296_v42, %v296_v42  ;;  %v324_v45 = vpack.c.bf16 %v323_v43, %v323_v43 }
 0x16d   :  { %299 = vst.msk [vmem:[%s565_s4] sm:$0xf] %vm298_vm6, %v297_v44 }
 0x16e   :  { %326 = vst.msk [vmem:[%s565_s4] sm:$0xf] %vm325_vm7, %v324_v45 }

// kernel: dincae_pconvs_forward.19
= control target key start
LH: loop header
LB: loop body
LE: loop exit
PB: predicated region body
PF: predicated region fallthrough
CT: control target
= control target key end

     0   :  { %s935_s18 = smov 0   ;;  %s1090_s0 = inlined_call_operand.vmem [shape: bf16[2,8,342], index: 0, kind: input, shape index: {}]   ;;  %s1091_s1 = inlined_call_operand.vmem [shape: f32[2,1,342], index: 1, kind: input, shape index: {}]   ;;  %s1092_s2 = inlined_call_operand.vmem [shape: f32[4,72], index: 2, kind: input, shape index: {}]   ;;  %s1093_s3 = inlined_call_operand.vmem [shape: f32[4,1], index: 3, kind: input, shape index: {}]   ;;  %s1094_s4 = inlined_call_operand.vmem [shape: bf16[2,4,288], index: 4, kind: output, shape index: {0}]   ;;  %s1095_s5 = inlined_call_operand.vmem [shape: f32[2,1,288], index: 5, kind: output, shape index: {1}]  }
   0x1 LB: > { %s816_s19 = sadd.s32 4294967295, %s891_s18   ;;  %p820_p0 = scmp.ge.s32.totalorder %s891_s18, 1  ;;  %s891_s18 = sphi %s935_s18, %s16_s18  }
   0x2   : > { %p199_p1 = scmp.lt.s32.totalorder %s891_s18, 3 }
   0x4   : > { %p200_p2 = pnand %p820_p0, %p199_p1 }
   0x5   : > { %p235_p3 = scmp.lt.s32.totalorder (!%p200_p2), %s816_s19, 1  ;;  %s894_s28 = smov (!%p200_p2), 90  }
   0x6   : > { %203 = sbr.rel (%p200_p2) target bundleno = 397 (0x18d), region = 36  ;;  %s895_s29 = smov (!%p200_p2), 91  }
   0x7   : > { %s896_s30 = smov (!%p200_p2), 92   ;;  %s897_s6 = smov (!%p200_p2), 108  }
   0x8   : > { %s898_s7 = smov (!%p200_p2), 109   ;;  %s899_s8 = smov (!%p200_p2), 110  }
   0x9   : > { %s900_s9 = smov (!%p200_p2), 126   ;;  %s901_s10 = smov (!%p200_p2), 127  }
   0xb   : > { %v260_v0 = vlaneseq  ;;  %s1097_s19 = smov (!%p235_p3, %s816_s19), 1  ;;  %v893_v14 = vmov 0.0   ;;  %vm280_vm0 = vcmask 261120   ;;  %vm902_vm1 = vmmov 0   ;;  %v634_v19 = vld [vmem:[%s1093_s3] sm:$0xf] }
   0xc   : > { %s859_s20 = smul.u32 12, %s1097_s19  ;;  %838 = vmatprep.subr.mxu1 %v893_v14  ;;  %557 = vmatprep.mubr.f32.mxu0 %v893_v14  ;;  %v903_v18 = vmov 0   ;;  %vm396_vm2 = vcmask 736256   ;;  %vm381_vm3 = vcmask 744448   ;;  %vm366_vm4 = vcmask 752640  }
   0xd   : > { %v946_v1 = vshrl.u32 %v260_v0, 7  ;;  %s860_s21 = smul.u32 3, %s1097_s19  ;;  %856 = vmatprep.mubr.msk.f32.mxu1 %vm902_vm1, %v893_v14  ;;  %882 = vset.pattern.permute.xlu0 %v903_v18  ;;  %vm351_vm5 = vcmask 883712   ;;  %vm336_vm6 = vcmask 891904   ;;  %vm321_vm7 = vcmask 900096  }
   0xe   : > { %s239_s24 = scalar_lea.vmem %s1090_s0, %s859_s20  ;;  %vm306_vm8 = vcmask 1031168   ;;  %vm291_vm9 = vcmask 1039360   ;;  %vm489_vm10 = vcmask 588800   ;;  %vm715_vm11 = vcmp.lt.s32.totalorder %v260_v0, 288  ;;  %s861_s20 = smul.u32 6, %s1097_s19 }
   0xf   : > { %v951_v2 = vsub.s32 1, %v946_v1  ;;  %v954_v3 = vsub.s32 0, %v946_v1  ;;  %v957_v4 = vsub.s32 2, %v946_v1  ;;  %s243_s27 = scalar_lea.vmem %s1091_s1, %s860_s21  ;;  %v253_v5 = vld [vmem:[%s239_s24] sm:$0xff]  ;;  %v254_v6 = vld [vmem:[%s239_s24 + $0x8] sm:$0xf]  ;;  %s252_s17 = scalar_lea.vmem %s1095_s5, %s860_s21 }
  0x10   : > { %v256_v7 = vunpack.c.h.bf16 %v253_v5  ;;  %v967_v8 = vld [vmem:[%s243_s27] sm:$0x7]  ;;  %v255_v9 = vunpack.c.l.bf16 %v253_v5  ;;  %v257_v10 = vunpack.c.l.bf16 %v254_v6  ;;  %vm707_vm12 = vcmask 1041408   ;;  %s248_s23 = scalar_lea.vmem %s1094_s4, %s861_s20 }
  0x11   : > { %v267_v11 = vrot.slane %v967_v8, %v951_v2  ;;  %v263_v12 = vrot.slane %v967_v8, %v954_v3  ;;  %v271_v13 = vrot.slane %v967_v8, %v957_v4  ;;  %vm708_vm13 = vcmask 1043458  }
  0x12   : > { %vm709_vm14 = vmor %vm708_vm13, %vm707_vm12  ;;  %vm710_vm15 = vcmask 259076  }
  0x13   : > { %v977_v15 = vmul.f32 %v267_v11, %v256_v7  ;;  %v979_v16 = vmul.f32 %v263_v12, %v255_v9  ;;  %v277_v17 = vmul.f32 %v271_v13, %v257_v10  ;;  %v461_v9 = vld [vmem:[%s1092_s2] sm:$0xf] }
  0x15   : > { %392 = vrot.lane.b32.xlu0 %v977_v15, %s894_s28  ;;  %390 = vrot.lane.b32.xlu1 %v979_v16, %s894_s28  ;;  %281 = vst.msk [vmem:[#allocation2 + $0x10] sm:$0xff] %vm280_vm0, %v277_v17 }
  0x19   : > { %394 = vrot.lane.b32.xlu0 %v277_v17, %s894_s28  ;;  %377 = vrot.lane.b32.xlu1 %v977_v15, %s895_s29 }
  0x1d   : > { %379 = vrot.lane.b32.xlu0 %v277_v17, %s895_s29  ;;  %375 = vrot.lane.b32.xlu1 %v979_v16, %s895_s29 }
  0x21   : > { %362 = vrot.lane.b32.xlu0 %v977_v15, %s896_s30  ;;  %364 = vrot.lane.b32.xlu1 %v277_v17, %s896_s30 }
  0x25   : > { %360 = vrot.lane.b32.xlu0 %v979_v16, %s896_s30  ;;  %347 = vrot.lane.b32.xlu1 %v977_v15, %s897_s6 }
  0x29   : > { %349 = vrot.lane.b32.xlu0 %v277_v17, %s897_s6  ;;  %345 = vrot.lane.b32.xlu1 %v979_v16, %s897_s6 }
  0x2d   : > { %332 = vrot.lane.b32.xlu0 %v977_v15, %s898_s7  ;;  %334 = vrot.lane.b32.xlu1 %v277_v17, %s898_s7 }
  0x31   : > { %330 = vrot.lane.b32.xlu0 %v979_v16, %s898_s7  ;;  %317 = vrot.lane.b32.xlu1 %v977_v15, %s899_s8 }
  0x35   : > { %319 = vrot.lane.b32.xlu0 %v277_v17, %s899_s8  ;;  %315 = vrot.lane.b32.xlu1 %v979_v16, %s899_s8 }
  0x39   : > { %302 = vrot.lane.b32.xlu0 %v977_v15, %s900_s9  ;;  %304 = vrot.lane.b32.xlu1 %v277_v17, %s900_s9 }
  0x3d   : > { %300 = vrot.lane.b32.xlu0 %v979_v16, %s900_s9  ;;  %287 = vrot.lane.b32.xlu1 %v977_v15, %s901_s10 }
  0x41   : > { %289 = vrot.lane.b32.xlu0 %v277_v17, %s901_s10  ;;  %285 = vrot.lane.b32.xlu1 %v979_v16, %s901_s10 }
  0x45   : > { %405 = vrot.lane.b32.xlu0 %v967_v8, %s901_s10  ;;  %411 = vrot.lane.b32.xlu1 %v967_v8, %s900_s9 }
  0x49   : > { %417 = vrot.lane.b32.xlu0 %v967_v8, %s899_s8  ;;  %423 = vrot.lane.b32.xlu1 %v967_v8, %s898_s7 }
  0x4d   : > { %429 = vrot.lane.b32.xlu0 %v967_v8, %s897_s6  ;;  %435 = vrot.lane.b32.xlu1 %v967_v8, %s896_s30 }
  0x51   : > { %441 = vrot.lane.b32.xlu0 %v967_v8, %s895_s29  ;;  %447 = vrot.lane.b32.xlu1 %v967_v8, %s894_s28 }
  0x55   : > { %656 = vperm.xlu0 %882, %v634_v19  }
  0x87   : > { %v393_v20 = vpop.permute.xlu0 %392  ;;  %v391_v21 = vpop.permute.xlu1 %390 }
  0x88   : > { %v397_v22 = vsel %vm396_vm2, %v391_v21, %v393_v20 }
  0x8b   : > { %v395_v23 = vpop.permute.xlu0 %394  ;;  %v378_v24 = vpop.permute.xlu1 %377 }
  0x8c   : > { %v398_v25 = vsel %vm396_vm2, %v393_v20, %v395_v23  ;;  %404 = vst.msk [vmem:[#allocation2 + $0xd0] sm:$0xff] %vm280_vm0, %v395_v23  ;;  %v464_v20 = vld [vmem:[#allocation2 + $0x10] sm:$0xff] }
  0x8d   : > { %507 = vmatprep.subr.mxu0 %v398_v25 }
  0x8e   : > { %508 = vmatpush1.msra.mxu0 %v397_v22 }
  0x8f   : > { %v380_v26 = vpop.permute.xlu0 %379  ;;  %v376_v27 = vpop.permute.xlu1 %375 }
  0x90   : > { %v383_v28 = vsel %vm381_vm3, %v378_v24, %v380_v26  ;;  %389 = vst.msk [vmem:[#allocation2 + $0xb8] sm:$0xff] %vm280_vm0, %v380_v26  ;;  %v382_v29 = vsel %vm381_vm3, %v376_v27, %v378_v24 }
  0x91   : > { %509 = vmatprep.subr.mxu0 %v383_v28 }
  0x92   : > { %510 = vmatpush1.msra.mxu0 %v382_v29 }
  0x93   : > { %v363_v30 = vpop.permute.xlu0 %362  ;;  %v365_v31 = vpop.permute.xlu1 %364  ;;  %v488_v32 = vld [vmem:[#allocation2 + $0xd0] sm:$0xff] }
  0x94   : > { %v368_v33 = vsel %vm366_vm4, %v363_v30, %v365_v31  ;;  %374 = vst.msk [vmem:[#allocation2 + $0xa0] sm:$0xff] %vm280_vm0, %v365_v31  ;;  %839 = vmatpush3.msra.mxu1 %v488_v32 }
  0x95   : > { %840 = vmatprep.subr.mxu1 %v893_v14  ;;  %511 = vmatprep.subr.mxu0 %v368_v33 }
  0x97   : > { %v361_v34 = vpop.permute.xlu0 %360  ;;  %v348_v35 = vpop.permute.xlu1 %347  ;;  %v485_v36 = vld [vmem:[#allocation2 + $0xb8] sm:$0xff] }
  0x98   : > { %v367_v37 = vsel %vm366_vm4, %v361_v34, %v363_v30  ;;  %841 = vmatpush3.msra.mxu1 %v485_v36 }
  0x99   : > { %842 = vmatprep.subr.mxu1 %v893_v14  ;;  %512 = vmatpush1.msra.mxu0 %v367_v37 }
  0x9b   : > { %v350_v38 = vpop.permute.xlu0 %349  ;;  %v346_v39 = vpop.permute.xlu1 %345  ;;  %v482_v40 = vld [vmem:[#allocation2 + $0xa0] sm:$0xff] }
  0x9c   : > { %v353_v41 = vsel %vm351_vm5, %v348_v35, %v350_v38  ;;  %359 = vst.msk [vmem:[#allocation2 + $0x88] sm:$0xff] %vm280_vm0, %v350_v38  ;;  %v352_v42 = vsel %vm351_vm5, %v346_v39, %v348_v35  ;;  %843 = vmatpush3.msra.mxu1 %v482_v40 }
  0x9d   : > { %844 = vmatprep.subr.mxu1 %v893_v14  ;;  %513 = vmatprep.subr.mxu0 %v353_v41 }
  0x9e   : > { %514 = vmatpush1.msra.mxu0 %v352_v42 }
  0x9f   : > { %v333_v43 = vpop.permute.xlu0 %332  ;;  %v335_v44 = vpop.permute.xlu1 %334 }
  0xa0   : > { %v338_v45 = vsel %vm336_vm6, %v333_v43, %v335_v44  ;;  %344 = vst.msk [vmem:[#allocation2 + $0x70] sm:$0xff] %vm280_vm0, %v335_v44 }
  0xa1   : > { %515 = vmatprep.subr.mxu0 %v338_v45 }
  0xa3   : > { %v331_v46 = vpop.permute.xlu0 %330  ;;  %v318_v47 = vpop.permute.xlu1 %317  ;;  %v479_v48 = vld [vmem:[#allocation2 + $0x88] sm:$0xff] }
  0xa4   : > { %v337_v49 = vsel %vm336_vm6, %v331_v46, %v333_v43  ;;  %845 = vmatpush3.msra.mxu1 %v479_v48 }
  0xa5   : > { %846 = vmatprep.subr.mxu1 %v893_v14  ;;  %516 = vmatpush1.msra.mxu0 %v337_v49 }
  0xa7   : > { %v320_v50 = vpop.permute.xlu0 %319  ;;  %v316_v51 = vpop.permute.xlu1 %315  ;;  %v476_v52 = vld [vmem:[#allocation2 + $0x70] sm:$0xff] }
  0xa8   : > { %v323_v53 = vsel %vm321_vm7, %v318_v47, %v320_v50  ;;  %329 = vst.msk [vmem:[#allocation2 + $0x58] sm:$0xff] %vm280_vm0, %v320_v50  ;;  %v322_v54 = vsel %vm321_vm7, %v316_v51, %v318_v47  ;;  %847 = vmatpush3.msra.mxu1 %v476_v52 }
  0xa9   : > { %848 = vmatprep.subr.mxu1 %v893_v14  ;;  %517 = vmatprep.subr.mxu0 %v323_v53 }
  0xaa   : > { %518 = vmatpush1.msra.mxu0 %v322_v54 }
  0xab   : > { %v303_v55 = vpop.permute.xlu0 %302  ;;  %v305_v56 = vpop.permute.xlu1 %304 }
  0xac   : > { %v308_v57 = vsel %vm306_vm8, %v303_v55, %v305_v56  ;;  %314 = vst.msk [vmem:[#allocation2 + $0x40] sm:$0xff] %vm280_vm0, %v305_v56 }
  0xad   : > { %519 = vmatprep.subr.mxu0 %v308_v57 }
  0xaf   : > { %v301_v58 = vpop.permute.xlu0 %300  ;;  %v288_v59 = vpop.permute.xlu1 %287  ;;  %v473_v60 = vld [vmem:[#allocation2 + $0x58] sm:$0xff] }
  0xb0   : > { %v307_v61 = vsel %vm306_vm8, %v301_v58, %v303_v55  ;;  %849 = vmatpush3.msra.mxu1 %v473_v60 }
  0xb1   : > { %850 = vmatprep.subr.mxu1 %v893_v14  ;;  %520 = vmatpush1.msra.mxu0 %v307_v61  ;;  %v904_v61 = vmov 1983009808  }
  0xb3   : > { %v290_v62 = vpop.permute.xlu0 %289  ;;  %v286_v63 = vpop.permute.xlu1 %285  ;;  %v470_v5 = vld [vmem:[#allocation2 + $0x40] sm:$0xff] }
  0xb4   : > { %v293_v6 = vsel %vm291_vm9, %v288_v59, %v290_v62  ;;  %299 = vst.msk [vmem:[#allocation2 + $0x28] sm:$0xff] %vm280_vm0, %v290_v62  ;;  %v292_v7 = vsel %vm291_vm9, %v286_v63, %v288_v59  ;;  %851 = vmatpush3.msra.mxu1 %v470_v5  ;;  %v692_v62 = vunpack.c.l.s4 %v904_v61  ;;  %vm711_vm0 = vmor %vm710_vm15, %vm709_vm14 }
  0xb5   : > { %852 = vmatprep.subr.mxu1 %v893_v14  ;;  %521 = vmatprep.subr.mxu0 %v293_v6 }
  0xb6   : > { %522 = vmatpush1.msra.mxu0 %v292_v7 }
  0xb7   : > { %523 = vmatprep.subr.mxu0 %v977_v15  ;;  %v406_v10 = vpop.permute.xlu0 %405  ;;  %v412_v11 = vpop.permute.xlu1 %411 }
  0xb8   : > { %524 = vmatpush1.msra.mxu0 %v979_v16  ;;  %v407_v12 = vrot.slane %v406_v10, 1  ;;  %v413_v13 = vrot.slane %v412_v11, 1 }
  0xb9   : > { %823 = vmatmul.mubr.msk.f32.vlgmr.msra.gmra.mxu0 %vm489_vm10, %v461_v9 }
  0xba   : > { %v408_v17 = vsel %vm291_vm9, %v406_v10, %v407_v12  ;;  %v414_v18 = vsel %vm306_vm8, %v412_v11, %v413_v13  ;;  %v693_v11 = vunpack.c.0.s8 %v692_v62 }
  0xbb   : > { %v467_v19 = vld [vmem:[#allocation2 + $0x28] sm:$0xff]  ;;  %v410_v21 = vadd.f32 %v408_v17, %v967_v8  ;;  %v418_v22 = vpop.permute.xlu0 %417  ;;  %v424_v23 = vpop.permute.xlu1 %423 }
  0xbc   : > { %853 = vmatpush3.msra.mxu1 %v467_v19  ;;  %v419_v15 = vrot.slane %v418_v22, 1  ;;  %v425_v24 = vrot.slane %v424_v23, 1 }
  0xbd   : > { %854 = vmatprep.subr.mxu1 %v893_v14  ;;  %v416_v16 = vadd.f32 %v414_v18, %v410_v21 }
  0xbe   : > { %855 = vmatpush3.msra.mxu1 %v464_v20  ;;  %v420_v25 = vsel %vm321_vm7, %v418_v22, %v419_v15  ;;  %v426_v26 = vsel %vm336_vm6, %v424_v23, %v425_v24  ;;  %v696_v20 = vsub.s32 %v693_v11, %v946_v1 }
  0xbf   : > { %857 = vmatmul.mubr.msk.f32.vlgmr.msra.gmra.mxu1 %vm489_vm10, %v461_v9  ;;  %v422_v27 = vadd.f32 %v420_v25, %v416_v16  ;;  %v430_v28 = vpop.permute.xlu0 %429  ;;  %v436_v29 = vpop.permute.xlu1 %435 }
  0xc0   : > { %v431_v30 = vrot.slane %v430_v28, 1  ;;  %v437_v8 = vrot.slane %v436_v29, 1 }
  0xc1   : > { %v428_v31 = vadd.f32 %v426_v26, %v422_v27 }
  0xc2   : > { %v432_v32 = vsel %vm351_vm5, %v430_v28, %v431_v30  ;;  %v438_v33 = vsel %vm366_vm4, %v436_v29, %v437_v8 }
  0xc3   : > { %v434_v14 = vadd.f32 %v432_v32, %v428_v31  ;;  %v442_v34 = vpop.permute.xlu0 %441  ;;  %v448_v35 = vpop.permute.xlu1 %447 }
  0xc4   : > { %v443_v36 = vrot.slane %v442_v34, 1  ;;  %v449_v37 = vrot.slane %v448_v35, 1 }
  0xc5   : > { %v440_v38 = vadd.f32 %v438_v33, %v434_v14 }
  0xc6   : > { %v444_v39 = vsel %vm381_vm3, %v442_v34, %v443_v36  ;;  %v450_v40 = vsel %vm396_vm2, %v448_v35, %v449_v37 }
  0xc7   : > { %v446_v41 = vadd.f32 %v444_v39, %v440_v38 }
  0xc9   : > { %v452_v42 = vadd.f32 %v450_v40, %v446_v41 }
  0xcb   : > { %v453_v43 = vmul.f32 8.0, %v452_v42 }
  0xcd   : > { %v454_v44 = vadd.f32 1e-08, %v453_v43  ;;  %v457_v45 = vmax.f32 %v453_v43, 0.0 }
  0xcf   : > { %883 = vrcp.f32 %v454_v44  ;;  %v458_v46 = vmin.f32 %v457_v45, 1.0 }
  0xd0   : > { %v657_v52 = vpop.permute.xlu0 %656 }
  0xd1   : > { %717 = vst.msk [vmem:[%s252_s17] sm:$0x7] %vm715_vm11, %v458_v46  ;;  %v663_v51 = vrot.slane %v458_v46, %v954_v3  ;;  %v667_v53 = vrot.slane %v458_v46, %v951_v2  ;;  %v671_v0 = vrot.slane %v458_v46, %v957_v4 }
  0xd3   : > { %v675_v56 = vmul.f32 %v663_v51, %v657_v52  ;;  %v676_v60 = vmul.f32 %v667_v53, %v657_v52  ;;  %v677_v9 = vmul.f32 %v671_v0, %v657_v52 }
  0xdc   : > { %v884_v47 = vpop.eup %883 }
  0xdd   : > { %v456_v48 = vmul.f32 72.0, %v884_v47 }
  0xdf   : > { %v459_v49 = vmul.f32 %v458_v46, %v456_v48 }
  0xe1   : > { %v460_v50 = vmul.f32 %v459_v49, %v458_v46 }
  0xe3   : > { %v639_v54 = vrot.slane %v460_v50, %v954_v3  ;;  %v643_v58 = vrot.slane %v460_v50, %v951_v2  ;;  %v647_v6 = vrot.slane %v460_v50, %v957_v4 }
 0x179   : > { %v559_v55 = vpop.f32.mrf.mxu0 }
 0x17a   : > { %v651_v57 = vmul.f32 %v639_v54, %v559_v55 }
 0x17b   : > { %v561_v59 = vpop.f32.mrf.mxu0 }
 0x17c   : > { %v678_v63 = vadd.f32 %v675_v56, %v651_v57  ;;  %v652_v5 = vmul.f32 %v643_v58, %v561_v59 }
 0x17e   : > { %v679_v7 = vadd.f32 %v676_v60, %v652_v5  ;;  %v681_v12 = vmax.f32 %v678_v63, 0.0 }
 0x17f   : > { %v630_v10 = vpop.f32.mrf.mxu1 }
 0x180   : > { %v653_v3 = vmul.f32 %v647_v6, %v630_v10  ;;  %v682_v13 = vmax.f32 %v679_v7, 0.0 }
 0x181   : > { %v858_v17 = vpop.f32.mrf.mxu1 }
 0x182   : > { %v680_v2 = vadd.f32 %v677_v9, %v653_v3  ;;  %v825_v18 = vpack.c.bf16 %v682_v13, %v681_v12 }
 0x184   : > { %v683_v19 = vmax.f32 %v680_v2, 0.0  ;;  %v697_v22 = vrot.slane %v825_v18, %v696_v20 }
 0x186   : > { %v686_v21 = vpack.c.bf16 %v683_v19, %v683_v19 }
 0x188   : > { %v704_v4 = vrot.slane %v686_v21, %v696_v20 }
 0x18a   : > { %v705_v23 = vcombine.low %v697_v22, %v704_v4 }
 0x18c   : > { %712 = vst.msk [vmem:[%s248_s23] sm:$0x3f] %vm711_vm0, %v705_v23 }
 0x18d PF: > { %s16_s18 = sadd.s32 1, %s891_s18  }
 0x18e   : > { %p13_p4 = scmp.ge.s32.totalorder %s16_s18, 4  }
 0x190   :  { %15 = sbr.rel (!%p13_p4) target bundleno = 1 (0x1), region = 81 }

</bundles_post_ra>
